<compile_context>
chip_gen: v7x
topology: tpu7x:2x2x1
jax: 0.10.0
libtpu: 0.0.40
codegen_flags: <defaults>
</compile_context>

<pallas_src>
import functools

import jax
import jax.numpy as jnp
from jax.experimental import pallas as pl
from jax.experimental.pallas import tpu as pltpu

IN_FEATURES = 12288   # 3 * 64 * 64
H1, H2, OUT = 84, 50, 2
PAD = 128             # lane-padded width for hidden/output feature dims


def _mlp_kernel(x_ref, w1_ref, b1_ref, w2_ref, b2_ref, w3_ref, b3_ref, o_ref):
    # fc1 + relu.  W1 is streamed from HBM as bf16 (the bandwidth-bound
    # tensor); upcast in VMEM and accumulate in f32 on the MXU.
    w1 = w1_ref[...].astype(jnp.float32)
    h1 = jnp.dot(x_ref[...], w1, preferred_element_type=jnp.float32)
    h1 = jnp.maximum(h1 + b1_ref[...], 0.0)
    # fc2 + relu (padded cols of h1 are exactly 0, padded rows of w2 are 0).
    h2 = jnp.dot(h1, w2_ref[...], preferred_element_type=jnp.float32)
    h2 = jnp.maximum(h2 + b2_ref[...], 0.0)
    # fc3 (no activation).
    o_ref[...] = (jnp.dot(h2, w3_ref[...], preferred_element_type=jnp.float32)
                  + b3_ref[...])


def _vmem_limit_bytes(tm):
    """Size the scoped VMEM request to the actual footprint (+ headroom)."""
    x_buf   = 2 * tm * IN_FEATURES * 4           # double-buffered f32 x tiles
    w1_buf  = 2 * IN_FEATURES * PAD * 2          # bf16 W1 (resident)
    w1_f32  = IN_FEATURES * PAD * 4              # in-kernel f32 upcast of W1
    out_buf = 2 * tm * PAD * 4                   # double-buffered output tiles
    small   = 2 * (2 * PAD * PAD * 4 + 3 * PAD * 4) + 2 * tm * PAD * 4
    total = x_buf + w1_buf + w1_f32 + out_buf + small
    return int(total * 1.15) + (4 << 20)         # headroom for compiler scratch


@functools.partial(jax.jit, static_argnames=("tm",))
def simplenet_forward(x, params, *, tm=256):
    """x: (B, 3, 64, 64) float32 (NCHW).  Returns (B, 2) float32.

    tm: batch tile.  256 is VMEM-safe on v7x (64 MiB VMEM); v5e/v6e (128 MiB)
    can use 512-1024 for slightly better bandwidth utilization.
    """
    w1p, b1p, w2p, b2p, w3p, b3p = params
    B = x.shape[0]
    x2d = x.reshape(B, IN_FEATURES)              # same as torch .view(-1, 12288)

    # Only pad the batch when it is not sublane-aligned (no extra HBM copy in
    # the common aligned case).  Ragged last tiles are masked by Pallas.
    if B % 8 != 0:
        Bp = ((B + 7) // 8) * 8
        x2d = jnp.pad(x2d, ((0, Bp - B), (0, 0)))
    else:
        Bp = B

    TM = min(tm, Bp)
    grid = (pl.cdiv(Bp, TM),)

    resident = lambda shape: pl.BlockSpec(shape, lambda i: (0,) * len(shape))
    out = pl.pallas_call(
        _mlp_kernel,
        out_shape=jax.ShapeDtypeStruct((Bp, PAD), jnp.float32),
        grid=grid,
        in_specs=[
            pl.BlockSpec((TM, IN_FEATURES), lambda i: (i, 0)),  # x: batch-tiled
            resident((IN_FEATURES, PAD)), resident((1, PAD)),   # fc1 (bf16 W)
            resident((PAD, PAD)), resident((1, PAD)),           # fc2
            resident((PAD, PAD)), resident((1, PAD)),           # fc3
        ],
        out_specs=pl.BlockSpec((TM, PAD), lambda i: (i, 0)),
        compiler_params=pltpu.CompilerParams(
            dimension_semantics=("parallel",),
            vmem_limit_bytes=_vmem_limit_bytes(TM),
        ),
    )(x2d, w1p, b1p, w2p, b2p, w3p, b3p)

    return out[:B, :OUT]


def init_params(key):
    """Init mirroring torch.nn.Linear default (U(-1/sqrt(fan_in), +)).

    Padding / dtype conversion is done here ONCE so the forward path never
    re-pads weights.  W is stored (fan_in, fan_out) so the kernel computes
    x @ W; hidden/output dims are zero-padded to 128 lanes; W1 is bf16.
    """
    ks = jax.random.split(key, 6)

    def linear(kw, kb, fan_in, fan_out):
        bound = 1.0 / jnp.sqrt(jnp.float32(fan_in))
        w = jax.random.uniform(kw, (fan_in, fan_out), jnp.float32, -bound, bound)
        b = jax.random.uniform(kb, (1, fan_out), jnp.float32, -bound, bound)
        return w, b

    w1, b1 = linear(ks[0], ks[1], IN_FEATURES, H1)
    w2, b2 = linear(ks[2], ks[3], H1, H2)
    w3, b3 = linear(ks[4], ks[5], H2, OUT)

    w1p = (jnp.zeros((IN_FEATURES, PAD), jnp.bfloat16)
           .at[:, :H1].set(w1.astype(jnp.bfloat16)))
    b1p = jnp.zeros((1, PAD), jnp.float32).at[:, :H1].set(b1)
    w2p = jnp.zeros((PAD, PAD), jnp.float32).at[:H1, :H2].set(w2)
    b2p = jnp.zeros((1, PAD), jnp.float32).at[:, :H2].set(b2)
    w3p = jnp.zeros((PAD, PAD), jnp.float32).at[:H2, :OUT].set(w3)
    b3p = jnp.zeros((1, PAD), jnp.float32).at[:, :OUT].set(b3)
    return (w1p, b1p, w2p, b2p, w3p, b3p)


def _reference(x, params):
    """Pure-JAX reference using the same stored (bf16-rounded W1) parameters."""
    w1p, b1p, w2p, b2p, w3p, b3p = params
    w1 = w1p[:, :H1].astype(jnp.float32)
    b1 = b1p[:, :H1]
    w2 = w2p[:H1, :H2]
    b2 = b2p[:, :H2]
    w3 = w3p[:H2, :OUT]
    b3 = b3p[:, :OUT]
    h = x.reshape(-1, IN_FEATURES)
    h = jnp.maximum(h @ w1 + b1, 0.0)
    h = jnp.maximum(h @ w2 + b2, 0.0)
    return h @ w3 + b3


if __name__ == "__main__":
    key = jax.random.PRNGKey(0)
    k_x, k_p = jax.random.split(key)

    # Small batch; spatial/channel shape implied by fc1's 12288 = 3*64*64 input.
    x = jax.random.normal(k_x, (2, 3, 64, 64), jnp.float32)
    params = init_params(k_p)

    out = simplenet_forward(x, params)
    out = jax.block_until_ready(out)

    ref = _reference(x, params)
    assert out.shape == (2, 2), out.shape
    assert jnp.allclose(out, ref, atol=1e-3, rtol=1e-3), (out, ref)

    print("KERNEL_OK")
</pallas_src>

<mosaic_0001>
module attributes {stable_mosaic.version = 11 : i64} {
  func.func @_mlp_kernel(%arg0: i32, %arg1: memref<8x12288xf32, #tpu.memory_space<vmem>>, %arg2: memref<12288x128xbf16, #tpu.memory_space<vmem>>, %arg3: memref<1x128xf32, #tpu.memory_space<vmem>>, %arg4: memref<128x128xf32, #tpu.memory_space<vmem>>, %arg5: memref<1x128xf32, #tpu.memory_space<vmem>>, %arg6: memref<128x128xf32, #tpu.memory_space<vmem>>, %arg7: memref<1x128xf32, #tpu.memory_space<vmem>>, %arg8: memref<8x128xf32, #tpu.memory_space<vmem>>) attributes {dimension_semantics = [#tpu.dimension_semantics<parallel>], iteration_bounds = array<i64: 1>, scalar_prefetch = 0 : i64, scratch_operands = 0 : i64, tpu.core_type = #tpu.core_type<tc>, window_params = [{transform_indices = @transform_0, window_bounds = array<i64: 8, 12288>}, {pipeline_mode = #tpu.pipeline_mode<synchronous>, transform_indices = @transform_1, window_bounds = array<i64: 12288, 128>}, {pipeline_mode = #tpu.pipeline_mode<synchronous>, transform_indices = @transform_2, window_bounds = array<i64: 1, 128>}, {pipeline_mode = #tpu.pipeline_mode<synchronous>, transform_indices = @transform_3, window_bounds = array<i64: 128, 128>}, {pipeline_mode = #tpu.pipeline_mode<synchronous>, transform_indices = @transform_4, window_bounds = array<i64: 1, 128>}, {pipeline_mode = #tpu.pipeline_mode<synchronous>, transform_indices = @transform_5, window_bounds = array<i64: 128, 128>}, {pipeline_mode = #tpu.pipeline_mode<synchronous>, transform_indices = @transform_6, window_bounds = array<i64: 1, 128>}, {transform_indices = @transform_7, window_bounds = array<i64: 8, 128>}]} {
    %c0 = arith.constant 0 : index
    %c0_0 = arith.constant 0 : index
    %0 = vector.load %arg2[%c0, %c0_0] : memref<12288x128xbf16, #tpu.memory_space<vmem>>, vector<12288x128xbf16>
    %1 = arith.extf %0 : vector<12288x128xbf16> to vector<12288x128xf32>
    %c0_1 = arith.constant 0 : index
    %c0_2 = arith.constant 0 : index
    %2 = vector.load %arg1[%c0_1, %c0_2] : memref<8x12288xf32, #tpu.memory_space<vmem>>, vector<8x12288xf32>
    %cst = arith.constant dense<0.000000e+00> : vector<8x128xf32>
    %3 = tpu.matmul %2, %1, %cst {dimension_numbers = #tpu.dot_dimension_numbers<[1], [0], [0], [1], [0, 0, 1, 1], [], []>} : vector<8x12288xf32>, vector<12288x128xf32>, vector<8x128xf32> -> vector<8x128xf32>
    %c0_3 = arith.constant 0 : index
    %c0_4 = arith.constant 0 : index
    %4 = vector.load %arg3[%c0_3, %c0_4] : memref<1x128xf32, #tpu.memory_space<vmem>>, vector<1x128xf32>
    %5 = vector.broadcast %4 : vector<1x128xf32> to vector<8x128xf32>
    %6 = arith.addf %3, %5 : vector<8x128xf32>
    %cst_5 = arith.constant 0.000000e+00 : f32
    %7 = vector.broadcast %cst_5 : f32 to vector<8x128xf32>
    %8 = arith.maximumf %6, %7 : vector<8x128xf32>
    %c0_6 = arith.constant 0 : index
    %c0_7 = arith.constant 0 : index
    %9 = vector.load %arg4[%c0_6, %c0_7] : memref<128x128xf32, #tpu.memory_space<vmem>>, vector<128x128xf32>
    %cst_8 = arith.constant dense<0.000000e+00> : vector<8x128xf32>
    %10 = tpu.matmul %8, %9, %cst_8 {dimension_numbers = #tpu.dot_dimension_numbers<[1], [0], [0], [1], [0, 0, 1, 1], [], []>} : vector<8x128xf32>, vector<128x128xf32>, vector<8x128xf32> -> vector<8x128xf32>
    %c0_9 = arith.constant 0 : index
    %c0_10 = arith.constant 0 : index
    %11 = vector.load %arg5[%c0_9, %c0_10] : memref<1x128xf32, #tpu.memory_space<vmem>>, vector<1x128xf32>
    %12 = vector.broadcast %11 : vector<1x128xf32> to vector<8x128xf32>
    %13 = arith.addf %10, %12 : vector<8x128xf32>
    %cst_11 = arith.constant 0.000000e+00 : f32
    %14 = vector.broadcast %cst_11 : f32 to vector<8x128xf32>
    %15 = arith.maximumf %13, %14 : vector<8x128xf32>
    %c0_12 = arith.constant 0 : index
    %c0_13 = arith.constant 0 : index
    %16 = vector.load %arg6[%c0_12, %c0_13] : memref<128x128xf32, #tpu.memory_space<vmem>>, vector<128x128xf32>
    %cst_14 = arith.constant dense<0.000000e+00> : vector<8x128xf32>
    %17 = tpu.matmul %15, %16, %cst_14 {dimension_numbers = #tpu.dot_dimension_numbers<[1], [0], [0], [1], [0, 0, 1, 1], [], []>} : vector<8x128xf32>, vector<128x128xf32>, vector<8x128xf32> -> vector<8x128xf32>
    %c0_15 = arith.constant 0 : index
    %c0_16 = arith.constant 0 : index
    %18 = vector.load %arg7[%c0_15, %c0_16] : memref<1x128xf32, #tpu.memory_space<vmem>>, vector<1x128xf32>
    %19 = vector.broadcast %18 : vector<1x128xf32> to vector<8x128xf32>
    %20 = arith.addf %17, %19 : vector<8x128xf32>
    %c0_17 = arith.constant 0 : index
    %c0_18 = arith.constant 0 : index
    %21 = vector.load %arg8[%c0_17, %c0_18] : memref<8x128xf32, #tpu.memory_space<vmem>>, vector<8x128xf32>
    tpu.vector_store %arg8[%c0_17, %c0_18], %20 {strides = array<i32>} : memref<8x128xf32, #tpu.memory_space<vmem>>, vector<8x128xf32>,
    return
  }
  func.func @transform_0(%arg0: i32) -> (i32, i32) {
    %c0_i32 = arith.constant 0 : i32
    %c0_i32_0 = arith.constant 0 : i32
    return %arg0, %c0_i32 : i32, i32
  }
  func.func @transform_1(%arg0: i32) -> (i32, i32) {
    %c0_i32 = arith.constant 0 : i32
    %c0_i32_0 = arith.constant 0 : i32
    %c0_i32_1 = arith.constant 0 : i32
    return %c0_i32, %c0_i32_0 : i32, i32
  }
  func.func @transform_2(%arg0: i32) -> (i32, i32) {
    %c0_i32 = arith.constant 0 : i32
    %c0_i32_0 = arith.constant 0 : i32
    %c0_i32_1 = arith.constant 0 : i32
    return %c0_i32, %c0_i32_0 : i32, i32
  }
  func.func @transform_3(%arg0: i32) -> (i32, i32) {
    %c0_i32 = arith.constant 0 : i32
    %c0_i32_0 = arith.constant 0 : i32
    %c0_i32_1 = arith.constant 0 : i32
    return %c0_i32, %c0_i32_0 : i32, i32
  }
  func.func @transform_4(%arg0: i32) -> (i32, i32) {
    %c0_i32 = arith.constant 0 : i32
    %c0_i32_0 = arith.constant 0 : i32
    %c0_i32_1 = arith.constant 0 : i32
    return %c0_i32, %c0_i32_0 : i32, i32
  }
  func.func @transform_5(%arg0: i32) -> (i32, i32) {
    %c0_i32 = arith.constant 0 : i32
    %c0_i32_0 = arith.constant 0 : i32
    %c0_i32_1 = arith.constant 0 : i32
    return %c0_i32, %c0_i32_0 : i32, i32
  }
  func.func @transform_6(%arg0: i32) -> (i32, i32) {
    %c0_i32 = arith.constant 0 : i32
    %c0_i32_0 = arith.constant 0 : i32
    %c0_i32_1 = arith.constant 0 : i32
    return %c0_i32, %c0_i32_0 : i32, i32
  }
  func.func @transform_7(%arg0: i32) -> (i32, i32) {
    %c0_i32 = arith.constant 0 : i32
    %c0_i32_0 = arith.constant 0 : i32
    return %arg0, %c0_i32 : i32, i32
  }
}

</mosaic_0001>

<bundles_post_ra>
// kernel: simplenet_forward.1
= control target key start
LH: loop header
LB: loop body
LE: loop exit
PB: predicated region body
PF: predicated region fallthrough
CT: control target
= control target key end

     0   :  { %12 = vsyncpa [#allocation3], 0  ;;  %s14677_s0 = inlined_call_operand.vmem [shape: f32[8,12288], index: 0, kind: input, shape index: {}]   ;;  %s14678_s1 = inlined_call_operand.hbm [shape: bf16[12288,128], index: 1, kind: input, shape index: {}]   ;;  %s14679_s2 = inlined_call_operand.hbm [shape: f32[1,128], index: 2, kind: input, shape index: {}]   ;;  %s14680_s3 = inlined_call_operand.hbm [shape: f32[128,128], index: 3, kind: input, shape index: {}]   ;;  %s14681_s4 = inlined_call_operand.hbm [shape: f32[1,128], index: 4, kind: input, shape index: {}]   ;;  %s14682_s5 = inlined_call_operand.hbm [shape: f32[128,128], index: 5, kind: input, shape index: {}]   ;;  %s14683_s6 = inlined_call_operand.hbm [shape: f32[1,128], index: 6, kind: input, shape index: {}]   ;;  %s14684_s7 = inlined_call_operand.vmem [shape: f32[8,128], index: 7, kind: output, shape index: {}]  }
   0x1   :  { %13 = vsyncpa [#allocation5], 0 }
   0x2   :  { %14 = vsyncpa [#allocation8], 0 }
   0x3   :  { %15 = vsyncpa [#allocation11], 0  ;;  %s14197_s24 = smov [#allocation4]   ;;  %s14198_s26 = smov [#allocation7]  }
   0x4   :  { %s36_s25 = sshll.u32 %s14197_s24, 4  ;;  %s58_s27 = sshll.u32 %s14198_s26, 4  ;;  %s37_s25 = int_to_ptr.vmem [resolvable:$true] %s36_s25  ;;  %s59_s27 = int_to_ptr.vmem [resolvable:$true] %s58_s27 }
   0x5   :  { %s14057_s30 = scalar_lea.hbm %s14679_s2, 16 }
   0x6   :  { %p14058_p0 = scmp.ne.s32.totalorder %s14679_s2, %s14057_s30  ;;  %p14061_p1 = scmp.lt.u32.totalorder %s14057_s30, %s14679_s2 }
   0x8   :  { %p14063_p2 = pnand %p14061_p1, %p14058_p0 }
   0xa   :  { %14066 = shalt.err (!%p14063_p2)
}
   0xb   :  { %s14067_s12 = scalar_lea.vmem %s37_s25, 16  ;;  %s14071_s13 = scalar_lea.vmem %s37_s25, 32 }
   0xc   :  { %p14068_p3 = scmp.ne.s32.totalorder %s37_s25, %s14067_s12  ;;  %p14072_p4 = scmp.lt.s32.totalorder %s37_s25, %s37_s25 }
   0xd   :  { %p14073_p5 = scmp.lt.s32.totalorder %s14071_s13, %s14067_s12 }
   0xf   :  { %p14074_p6 = por %p14073_p5, %p14072_p4 }
  0x11   :  { %p14075_p7 = pnand %p14074_p6, %p14068_p3 }
  0x13   :  { %14078 = shalt.err (!%p14075_p7)
}
  0x14   :  { %39 = dma.hbm_to_vmem [thread:$0]  %s14679_s2, 16, %s37_s25, [#allocation5]  }
  0x15   :  { %s14079_s18 = scalar_lea.hbm %s14681_s4, 16 }
  0x16   :  { %p14080_p8 = scmp.ne.s32.totalorder %s14681_s4, %s14079_s18  ;;  %p14083_p9 = scmp.lt.u32.totalorder %s14079_s18, %s14681_s4 }
  0x18   :  { %p14085_p10 = pnand %p14083_p9, %p14080_p8 }
  0x1a   :  { %14088 = shalt.err (!%p14085_p10)
}
  0x1b   :  { %s14089_s23 = scalar_lea.vmem %s59_s27, 16  ;;  %s14093_s24 = scalar_lea.vmem %s59_s27, 32 }
  0x1c   :  { %p14090_p11 = scmp.ne.s32.totalorder %s59_s27, %s14089_s23  ;;  %p14094_p12 = scmp.lt.s32.totalorder %s59_s27, %s59_s27 }
  0x1d   :  { %p14095_p13 = scmp.lt.s32.totalorder %s14093_s24, %s14089_s23 }
  0x1f   :  { %p14096_p0 = por %p14095_p13, %p14094_p12 }
  0x21   :  { %p14097_p1 = pnand %p14096_p0, %p14090_p11 }
  0x23   :  { %14100 = shalt.err (!%p14097_p1)
}
  0x24   :  { %61 = dma.hbm_to_vmem [thread:$0]  %s14681_s4, 16, %s59_s27, [#allocation8]  }
  0x25   :  { %s14199_s26 = smov [#allocation2]   ;;  %s14101_s8 = scalar_lea.hbm %s14678_s1, 98304 }
  0x26   :  { %s23_s28 = sshll.u32 %s14199_s26, 4  ;;  %p14102_p2 = scmp.ne.s32.totalorder %s14678_s1, %s14101_s8  ;;  %s24_s28 = int_to_ptr.vmem [resolvable:$true] %s23_s28 }
  0x27   :  { %p14105_p3 = scmp.lt.u32.totalorder %s14101_s8, %s14678_s1 }
  0x29   :  { %p14107_p4 = pnand %p14105_p3, %p14102_p2 }
  0x2b   :  { %14110 = shalt.err (!%p14107_p4)
}
  0x2c   :  { %s14111_s13 = scalar_lea.vmem %s24_s28, 98304  ;;  %p14116_p6 = scmp.lt.s32.totalorder %s24_s28, %s24_s28 }
  0x2d   :  { %p14112_p5 = scmp.ne.s32.totalorder %s24_s28, %s14111_s13  ;;  %p14117_p7 = scmp.lt.s32.totalorder %s14111_s13, %s14111_s13 }
  0x2f   :  { %p14118_p8 = por %p14117_p7, %p14116_p6 }
  0x31   :  { %p14119_p9 = pnand %p14118_p8, %p14112_p5 }
  0x33   :  { %14122 = shalt.err (!%p14119_p9)
}
  0x34   :  { %s14200_s4 = smov 64   ;;  %s14201_s27 = smov 4  }
  0x35   :  { %29 = dma.hbm_to_vmem [thread:$0]  %s14678_s1, 98304, %s24_s28, [#allocation3], %s14200_s4, %s14200_s4, %s14201_s27  }
  0x36   :  { %s14202_s16 = smov [#allocation6]   ;;  %s14123_s20 = scalar_lea.hbm %s14680_s3, 2048 }
  0x37   :  { %s45_s17 = sshll.u32 %s14202_s16, 4  ;;  %p14124_p10 = scmp.ne.s32.totalorder %s14680_s3, %s14123_s20  ;;  %s46_s17 = int_to_ptr.vmem [resolvable:$true] %s45_s17 }
  0x38   :  { %p14127_p11 = scmp.lt.u32.totalorder %s14123_s20, %s14680_s3 }
  0x3a   :  { %p14129_p12 = pnand %p14127_p11, %p14124_p10 }
  0x3c   :  { %14132 = shalt.err (!%p14129_p12)
}
  0x3d   :  { %s14133_s2 = scalar_lea.vmem %s46_s17, 2048  ;;  %p14138_p0 = scmp.lt.s32.totalorder %s46_s17, %s46_s17 }
  0x3e   :  { %p14134_p13 = scmp.ne.s32.totalorder %s46_s17, %s14133_s2  ;;  %p14139_p1 = scmp.lt.s32.totalorder %s14133_s2, %s14133_s2 }
  0x40   :  { %p14140_p2 = por %p14139_p1, %p14138_p0 }
  0x42   :  { %p14141_p3 = pnand %p14140_p2, %p14134_p13 }
  0x44   :  { %14144 = shalt.err (!%p14141_p3)
}
  0x45   :  { %s14203_s1 = smov 128   ;;  %s14204_s25 = smov 8  }
  0x46   :  { %51 = dma.hbm_to_vmem [thread:$0]  %s14680_s3, 2048, %s46_s17, [#allocation5], %s14203_s1, %s14203_s1, %s14204_s25  }
  0x47   :  { %s14205_s29 = smov [#allocation9]   ;;  %s14206_s8 = smov [#allocation10]  }
  0x48   :  { %s67_s30 = sshll.u32 %s14205_s29, 4  ;;  %s80_s9 = sshll.u32 %s14206_s8, 4  ;;  %s68_s30 = int_to_ptr.vmem [resolvable:$true] %s67_s30  ;;  %s81_s9 = int_to_ptr.vmem [resolvable:$true] %s80_s9 }
  0x49   :  { %s14145_s12 = scalar_lea.hbm %s14682_s5, 2048 }
  0x4a   :  { %p14146_p4 = scmp.ne.s32.totalorder %s14682_s5, %s14145_s12  ;;  %p14149_p5 = scmp.lt.u32.totalorder %s14145_s12, %s14682_s5 }
  0x4c   :  { %p14151_p6 = pnand %p14149_p5, %p14146_p4 }
  0x4e   :  { %14154 = shalt.err (!%p14151_p6)
}
  0x4f   :  { %s14155_s3 = scalar_lea.vmem %s68_s30, 2048  ;;  %p14160_p8 = scmp.lt.s32.totalorder %s68_s30, %s68_s30 }
  0x50   :  { %p14156_p7 = scmp.ne.s32.totalorder %s68_s30, %s14155_s3  ;;  %p14161_p9 = scmp.lt.s32.totalorder %s14155_s3, %s14155_s3 }
  0x52   :  { %p14162_p10 = por %p14161_p9, %p14160_p8 }
  0x54   :  { %p14163_p11 = pnand %p14162_p10, %p14156_p7 }
  0x56   :  { %14166 = shalt.err (!%p14163_p11)
}
  0x57   :  { %73 = dma.hbm_to_vmem [thread:$0]  %s14682_s5, 2048, %s68_s30, [#allocation8], %s14203_s1, %s14203_s1, %s14204_s25  }
  0x58   :  { %s14167_s19 = scalar_lea.hbm %s14683_s6, 16 }
  0x59   :  { %p14168_p12 = scmp.ne.s32.totalorder %s14683_s6, %s14167_s19  ;;  %p14171_p13 = scmp.lt.u32.totalorder %s14167_s19, %s14683_s6 }
  0x5b   :  { %p14173_p0 = pnand %p14171_p13, %p14168_p12 }
  0x5d   :  { %14176 = shalt.err (!%p14173_p0)
}
  0x5e   :  { %s14177_s24 = scalar_lea.vmem %s81_s9, 16  ;;  %s14181_s2 = scalar_lea.vmem %s81_s9, 32 }
  0x5f   :  { %p14178_p1 = scmp.ne.s32.totalorder %s81_s9, %s14177_s24  ;;  %p14182_p2 = scmp.lt.s32.totalorder %s81_s9, %s81_s9 }
  0x60   :  { %p14183_p3 = scmp.lt.s32.totalorder %s14181_s2, %s14177_s24 }
  0x62   :  { %p14184_p4 = por %p14183_p3, %p14182_p2 }
  0x64   :  { %p14185_p5 = pnand %p14184_p4, %p14178_p1 }
  0x66   :  { %14188 = shalt.err (!%p14185_p5)
}
  0x67   :  { %83 = dma.hbm_to_vmem [thread:$0]  %s14683_s6, 16, %s81_s9, [#allocation11]  }
  0x68   :  { %14189 = dma.done.wait [#allocation3], 98304  }
  0x69   :  { %14190 = vsyncadd [#allocation3], 4294868992 }
  0x6a   :  { %14191 = dma.done.wait [#allocation5], 2064  }
  0x6b   :  { %14192 = vsyncadd [#allocation5], 4294965232 }
  0x6c   :  { %14193 = dma.done.wait [#allocation8], 2064  }
  0x6d   :  { %14194 = vsyncadd [#allocation8], 4294965232 }
  0x6e   :  { %14195 = dma.done.wait [#allocation11], 16  }
  0x6f   :  { %14196 = vsyncadd [#allocation11], 4294967280  ;;  %v9916_v0 = vld [vmem:[#allocation2 + $0x40] sm:$0xff]   ;;  %v9917_v4 = vld [vmem:[#allocation2 + $0x48] sm:$0xff]   ;;  %vm14208_vm0 = vmmov 0  }
  0x70   :  { %v6838_v1 = vld [vmem:[#allocation2] sm:$0xff]   ;;  %12461 = vmatprep.subr.bf16.mxu0 %v9916_v0  ;;  %v9933_v5 = vld [vmem:[#allocation2 + $0xc8] sm:$0xff]   ;;  %v9918_v8 = vld [vmem:[#allocation2 + $0x50] sm:$0xff]  }
  0x71   :  { %v9932_v2 = vld [vmem:[#allocation2 + $0xc0] sm:$0xff]   ;;  %12463 = vmatpush3.bf16.msra.mxu0 %v6838_v1  ;;  %v9909_v6 = vld [vmem:[#allocation2 + $0x8] sm:$0xff]   ;;  %v9934_v9 = vld [vmem:[#allocation2 + $0xd0] sm:$0xff]  }
  0x72   :  { %12493 = vmatprep.subr.bf16.mxu1 %v9932_v2  ;;  %v9924_v3 = vld [vmem:[#allocation2 + $0x80] sm:$0xff]   ;;  %12465 = vmatprep.subr.bf16.mxu0 %v9917_v4  ;;  %v9925_v7 = vld [vmem:[#allocation2 + $0x88] sm:$0xff]   ;;  %v9910_v10 = vld [vmem:[#allocation2 + $0x10] sm:$0xff]  }
  0x73   :  { %12495 = vmatpush3.bf16.msra.mxu1 %v9924_v3  ;;  %v9926_v11 = vld [vmem:[#allocation2 + $0x90] sm:$0xff]   ;;  %v9919_v12 = vld [vmem:[#allocation2 + $0x58] sm:$0xff]   ;;  %v3175_v14 = vld [vmem:[%s14677_s0 + $0x8] sm:$0xff] }
  0x74   :  { %12497 = vmatprep.subr.bf16.mxu1 %v9933_v5  ;;  %v9935_v13 = vld [vmem:[#allocation2 + $0xd8] sm:$0xff]   ;;  %v9920_v18 = vld [vmem:[#allocation2 + $0x60] sm:$0xff]   ;;  %3341 = vmatprep.mubr.f32.mxu0 %v3175_v14  ;;  %v9921_v22 = vld [vmem:[#allocation2 + $0x68] sm:$0xff]  }
  0x75   :  { %12467 = vmatpush3.bf16.msra.mxu0 %v9909_v6  ;;  %v9911_v15 = vld [vmem:[#allocation2 + $0x18] sm:$0xff]   ;;  %v9936_v19 = vld [vmem:[#allocation2 + $0xe0] sm:$0xff]   ;;  %v9937_v23 = vld [vmem:[#allocation2 + $0xe8] sm:$0xff]  }
  0x76   :  { %12469 = vmatprep.subr.bf16.mxu0 %v9918_v8  ;;  %v9927_v16 = vld [vmem:[#allocation2 + $0x98] sm:$0xff]   ;;  %v9912_v20 = vld [vmem:[#allocation2 + $0x20] sm:$0xff]   ;;  %v9913_v24 = vld [vmem:[#allocation2 + $0x28] sm:$0xff]  }
  0x77   :  { %12499 = vmatpush3.bf16.msra.mxu1 %v9925_v7  ;;  %v3177_v17 = vld [vmem:[%s14677_s0 + $0x18] sm:$0xff]  ;;  %v9928_v21 = vld [vmem:[#allocation2 + $0xa0] sm:$0xff]   ;;  %v9929_v25 = vld [vmem:[#allocation2 + $0xa8] sm:$0xff]  }
  0x78   :  { %12501 = vmatprep.subr.bf16.mxu1 %v9934_v9  ;;  %3411 = vmatprep.mubr.f32.mxu1 %v3177_v17  ;;  %v9922_v26 = vld [vmem:[#allocation2 + $0x70] sm:$0xff]   ;;  %v9923_v30 = vld [vmem:[#allocation2 + $0x78] sm:$0xff]   ;;  %v9948_v34 = vld [vmem:[#allocation2 + $0x140] sm:$0xff]  }
  0x79   :  { %12471 = vmatpush3.bf16.msra.mxu0 %v9910_v10  ;;  %v9938_v27 = vld [vmem:[#allocation2 + $0xf0] sm:$0xff]   ;;  %v9939_v31 = vld [vmem:[#allocation2 + $0xf8] sm:$0xff]   ;;  %v9964_v35 = vld [vmem:[#allocation2 + $0x1c0] sm:$0xff]  }
  0x7a   :  { %12473 = vmatprep.subr.bf16.mxu0 %v9919_v12  ;;  %v9914_v28 = vld [vmem:[#allocation2 + $0x30] sm:$0xff]   ;;  %v9915_v32 = vld [vmem:[#allocation2 + $0x38] sm:$0xff]   ;;  %v3174_v36 = vld [vmem:[%s14677_s0] sm:$0xff] }
  0x7b   :  { %12503 = vmatpush3.bf16.msra.mxu1 %v9926_v11  ;;  %v9930_v29 = vld [vmem:[#allocation2 + $0xb0] sm:$0xff]   ;;  %v9931_v33 = vld [vmem:[#allocation2 + $0xb8] sm:$0xff]   ;;  %v9940_v38 = vld [vmem:[#allocation2 + $0x100] sm:$0xff]  }
  0x7c   :  { %12505 = vmatprep.subr.bf16.mxu1 %v9935_v13  ;;  %v3176_v37 = vld [vmem:[%s14677_s0 + $0x10] sm:$0xff]  ;;  %v9956_v39 = vld [vmem:[#allocation2 + $0x180] sm:$0xff]   ;;  %v9949_v40 = vld [vmem:[#allocation2 + $0x148] sm:$0xff]  }
  0x7d   :  { %12475 = vmatpush3.bf16.msra.mxu0 %v9911_v15  ;;  %v9965_v41 = vld [vmem:[#allocation2 + $0x1c8] sm:$0xff]   ;;  %v3181_v43 = vld [vmem:[%s14677_s0 + $0x38] sm:$0xff]  ;;  %v9950_v46 = vld [vmem:[#allocation2 + $0x150] sm:$0xff]  }
  0x7e   :  { %12477 = vmatprep.subr.bf16.mxu0 %v9920_v18  ;;  %v3179_v42 = vld [vmem:[%s14677_s0 + $0x28] sm:$0xff]  ;;  %v9966_v47 = vld [vmem:[#allocation2 + $0x1d0] sm:$0xff]   ;;  %v9951_v50 = vld [vmem:[#allocation2 + $0x158] sm:$0xff]  }
  0x7f   :  { %12507 = vmatpush3.bf16.msra.mxu1 %v9927_v16  ;;  %v9941_v44 = vld [vmem:[#allocation2 + $0x108] sm:$0xff]   ;;  %v9942_v48 = vld [vmem:[#allocation2 + $0x110] sm:$0xff]   ;;  %v9967_v51 = vld [vmem:[#allocation2 + $0x1d8] sm:$0xff]  }
  0x80   :  { %12509 = vmatprep.subr.bf16.mxu1 %v9936_v19  ;;  %v9957_v45 = vld [vmem:[#allocation2 + $0x188] sm:$0xff]   ;;  %v9958_v49 = vld [vmem:[#allocation2 + $0x190] sm:$0xff]   ;;  %v9943_v52 = vld [vmem:[#allocation2 + $0x118] sm:$0xff]  }
  0x81   :  { %12479 = vmatpush3.bf16.msra.mxu0 %v9912_v20  ;;  %v9959_v53 = vld [vmem:[#allocation2 + $0x198] sm:$0xff]   ;;  %v9952_v54 = vld [vmem:[#allocation2 + $0x160] sm:$0xff]   ;;  %v9953_v58 = vld [vmem:[#allocation2 + $0x168] sm:$0xff]  }
  0x82   :  { %12481 = vmatprep.subr.bf16.mxu0 %v9921_v22  ;;  %v9968_v55 = vld [vmem:[#allocation2 + $0x1e0] sm:$0xff]   ;;  %v9969_v59 = vld [vmem:[#allocation2 + $0x1e8] sm:$0xff]   ;;  %v9954_v62 = vld [vmem:[#allocation2 + $0x170] sm:$0xff]  }
  0x83   :  { %12511 = vmatpush3.bf16.msra.mxu1 %v9928_v21  ;;  %v9944_v56 = vld [vmem:[#allocation2 + $0x120] sm:$0xff]   ;;  %v9945_v60 = vld [vmem:[#allocation2 + $0x128] sm:$0xff]   ;;  %v9970_v63 = vld [vmem:[#allocation2 + $0x1f0] sm:$0xff]  }
  0x84   :  { %12513 = vmatprep.subr.bf16.mxu1 %v9937_v23  ;;  %v9960_v57 = vld [vmem:[#allocation2 + $0x1a0] sm:$0xff]   ;;  %v9961_v61 = vld [vmem:[#allocation2 + $0x1a8] sm:$0xff]   ;;  %v9946_v0 = vld [vmem:[#allocation2 + $0x130] sm:$0xff]  }
  0x85   :  { %12483 = vmatpush3.bf16.msra.mxu0 %v9913_v24  ;;  %v9962_v1 = vld [vmem:[#allocation2 + $0x1b0] sm:$0xff]   ;;  %v9955_v2 = vld [vmem:[#allocation2 + $0x178] sm:$0xff]   ;;  %v9980_v6 = vld [vmem:[#allocation2 + $0x240] sm:$0xff]  }
  0x86   :  { %12485 = vmatprep.subr.bf16.mxu0 %v9922_v26  ;;  %v9971_v3 = vld [vmem:[#allocation2 + $0x1f8] sm:$0xff]   ;;  %v9996_v7 = vld [vmem:[#allocation2 + $0x2c0] sm:$0xff]   ;;  %v3180_v9 = vld [vmem:[%s14677_s0 + $0x30] sm:$0xff] }
  0x87   :  { %12515 = vmatpush3.bf16.msra.mxu1 %v9929_v25  ;;  %v9947_v4 = vld [vmem:[#allocation2 + $0x138] sm:$0xff]   ;;  %v3178_v8 = vld [vmem:[%s14677_s0 + $0x20] sm:$0xff]  ;;  %v9981_v12 = vld [vmem:[#allocation2 + $0x248] sm:$0xff]  }
  0x88   :  { %12517 = vmatprep.subr.bf16.mxu1 %v9938_v27  ;;  %v9963_v5 = vld [vmem:[#allocation2 + $0x1b8] sm:$0xff]   ;;  %v9972_v10 = vld [vmem:[#allocation2 + $0x200] sm:$0xff]   ;;  %v9997_v13 = vld [vmem:[#allocation2 + $0x2c8] sm:$0xff]  }
  0x89   :  { %12487 = vmatpush3.bf16.msra.mxu0 %v9914_v28  ;;  %v9988_v11 = vld [vmem:[#allocation2 + $0x280] sm:$0xff]   ;;  %v3183_v14 = vld [vmem:[%s14677_s0 + $0x48] sm:$0xff]  ;;  %v3185_v15 = vld [vmem:[%s14677_s0 + $0x58] sm:$0xff] }
  0x8a   :  { %12489 = vmatprep.subr.bf16.mxu0 %v9923_v30  ;;  %v9973_v16 = vld [vmem:[#allocation2 + $0x208] sm:$0xff]   ;;  %v9982_v18 = vld [vmem:[#allocation2 + $0x250] sm:$0xff]   ;;  %v9983_v22 = vld [vmem:[#allocation2 + $0x258] sm:$0xff]  }
  0x8b   :  { %12519 = vmatpush3.bf16.msra.mxu1 %v9930_v29  ;;  %v9989_v17 = vld [vmem:[#allocation2 + $0x288] sm:$0xff]   ;;  %v9998_v19 = vld [vmem:[#allocation2 + $0x2d0] sm:$0xff]   ;;  %v9999_v23 = vld [vmem:[#allocation2 + $0x2d8] sm:$0xff]  }
  0x8c   :  { %12521 = vmatprep.subr.bf16.mxu1 %v9939_v31  ;;  %v9974_v20 = vld [vmem:[#allocation2 + $0x210] sm:$0xff]   ;;  %v9975_v24 = vld [vmem:[#allocation2 + $0x218] sm:$0xff]   ;;  %v9984_v26 = vld [vmem:[#allocation2 + $0x260] sm:$0xff]  }
  0x8d   :  { %12491 = vmatpush3.bf16.msra.mxu0 %v9915_v32  ;;  %v9990_v21 = vld [vmem:[#allocation2 + $0x290] sm:$0xff]   ;;  %v9991_v25 = vld [vmem:[#allocation2 + $0x298] sm:$0xff]   ;;  %v10000_v27 = vld [vmem:[#allocation2 + $0x2e0] sm:$0xff]  }
  0x8e   :  { %12525 = vmatprep.subr.bf16.mxu0 %v9948_v34  ;;  %v9976_v28 = vld [vmem:[#allocation2 + $0x220] sm:$0xff]   ;;  %v9985_v30 = vld [vmem:[#allocation2 + $0x268] sm:$0xff]   ;;  %v9986_v34 = vld [vmem:[#allocation2 + $0x270] sm:$0xff]  }
  0x8f   :  { %12523 = vmatpush3.bf16.msra.mxu1 %v9931_v33  ;;  %v9992_v29 = vld [vmem:[#allocation2 + $0x2a0] sm:$0xff]   ;;  %v10001_v31 = vld [vmem:[#allocation2 + $0x2e8] sm:$0xff]  }
  0x90   :  { %12557 = vmatprep.subr.bf16.mxu1 %v9964_v35  ;;  %3342 = vmatmul.mubr.f32.vlgmr.msra.gmra.mrb[0].mxu0 %v3174_v36  ;;  %v9977_v32 = vld [vmem:[#allocation2 + $0x228] sm:$0xff]   ;;  %v10002_v35 = vld [vmem:[#allocation2 + $0x2f0] sm:$0xff]  }
  0x91   :  { %12527 = vmatpush3.bf16.msra.mxu0 %v9940_v38  ;;  %3481 = vmatprep.mubr.f32.mxu0 %v3179_v42  ;;  %v9993_v33 = vld [vmem:[#allocation2 + $0x2a8] sm:$0xff]   ;;  %v9978_v36 = vld [vmem:[#allocation2 + $0x230] sm:$0xff]   ;;  %v9987_v38 = vld [vmem:[#allocation2 + $0x278] sm:$0xff]  }
  0x92   :  { %3412 = vmatmul.mubr.f32.vlgmr.msra.gmra.mrb[0].mxu1 %v3176_v37  ;;  %12529 = vmatprep.subr.bf16.mxu0 %v9949_v40  ;;  %v9994_v37 = vld [vmem:[#allocation2 + $0x2b0] sm:$0xff]   ;;  %v9979_v40 = vld [vmem:[#allocation2 + $0x238] sm:$0xff]   ;;  %v10012_v42 = vld [vmem:[#allocation2 + $0x340] sm:$0xff]  }
  0x93   :  { %12559 = vmatpush3.bf16.msra.mxu1 %v9956_v39  ;;  %3551 = vmatprep.mubr.f32.mxu1 %v3181_v43  ;;  %v10003_v39 = vld [vmem:[#allocation2 + $0x2f8] sm:$0xff]   ;;  %v10028_v43 = vld [vmem:[#allocation2 + $0x3c0] sm:$0xff]  }
  0x94   :  { %12561 = vmatprep.subr.bf16.mxu1 %v9965_v41  ;;  %v9995_v41 = vld [vmem:[#allocation2 + $0x2b8] sm:$0xff]  }
  0x95   :  { %12531 = vmatpush3.bf16.msra.mxu0 %v9941_v44  ;;  %v3182_v44 = vld [vmem:[%s14677_s0 + $0x40] sm:$0xff] }
  0x96   :  { %12533 = vmatprep.subr.bf16.mxu0 %v9950_v46  ;;  %v10004_v46 = vld [vmem:[#allocation2 + $0x300] sm:$0xff]  }
  0x97   :  { %12563 = vmatpush3.bf16.msra.mxu1 %v9957_v45  ;;  %v3184_v45 = vld [vmem:[%s14677_s0 + $0x50] sm:$0xff] }
  0x98   :  { %12565 = vmatprep.subr.bf16.mxu1 %v9966_v47  ;;  %v10020_v47 = vld [vmem:[#allocation2 + $0x380] sm:$0xff]  }
  0x99   :  { %12535 = vmatpush3.bf16.msra.mxu0 %v9942_v48  ;;  %v10013_v48 = vld [vmem:[#allocation2 + $0x348] sm:$0xff]  }
  0x9a   :  { %12537 = vmatprep.subr.bf16.mxu0 %v9951_v50  ;;  %v3187_v50 = vld [vmem:[%s14677_s0 + $0x68] sm:$0xff] }
  0x9b   :  { %12567 = vmatpush3.bf16.msra.mxu1 %v9958_v49  ;;  %v10029_v49 = vld [vmem:[#allocation2 + $0x3c8] sm:$0xff]  }
  0x9c   :  { %12569 = vmatprep.subr.bf16.mxu1 %v9967_v51  ;;  %v3189_v51 = vld [vmem:[%s14677_s0 + $0x78] sm:$0xff] }
  0x9d   :  { %12539 = vmatpush3.bf16.msra.mxu0 %v9943_v52  ;;  %v10005_v52 = vld [vmem:[#allocation2 + $0x308] sm:$0xff]  }
  0x9e   :  { %12541 = vmatprep.subr.bf16.mxu0 %v9952_v54  ;;  %v10014_v54 = vld [vmem:[#allocation2 + $0x350] sm:$0xff]  }
  0x9f   :  { %12571 = vmatpush3.bf16.msra.mxu1 %v9959_v53  ;;  %v10021_v53 = vld [vmem:[#allocation2 + $0x388] sm:$0xff]  }
  0xa0   :  { %12573 = vmatprep.subr.bf16.mxu1 %v9968_v55  ;;  %v10030_v55 = vld [vmem:[#allocation2 + $0x3d0] sm:$0xff]  }
  0xa1   :  { %12543 = vmatpush3.bf16.msra.mxu0 %v9944_v56  ;;  %v10006_v56 = vld [vmem:[#allocation2 + $0x310] sm:$0xff]  }
  0xa2   :  { %12545 = vmatprep.subr.bf16.mxu0 %v9953_v58  ;;  %v10015_v58 = vld [vmem:[#allocation2 + $0x358] sm:$0xff]  }
  0xa3   :  { %12575 = vmatpush3.bf16.msra.mxu1 %v9960_v57  ;;  %v10022_v57 = vld [vmem:[#allocation2 + $0x390] sm:$0xff]  }
  0xa4   :  { %12577 = vmatprep.subr.bf16.mxu1 %v9969_v59  ;;  %v10031_v59 = vld [vmem:[#allocation2 + $0x3d8] sm:$0xff]  }
  0xa5   :  { %12547 = vmatpush3.bf16.msra.mxu0 %v9945_v60  ;;  %v10007_v60 = vld [vmem:[#allocation2 + $0x318] sm:$0xff]  }
  0xa6   :  { %12549 = vmatprep.subr.bf16.mxu0 %v9954_v62  ;;  %v10016_v62 = vld [vmem:[#allocation2 + $0x360] sm:$0xff]  }
  0xa7   :  { %12579 = vmatpush3.bf16.msra.mxu1 %v9961_v61  ;;  %v10023_v61 = vld [vmem:[#allocation2 + $0x398] sm:$0xff]  }
  0xa8   :  { %12581 = vmatprep.subr.bf16.mxu1 %v9970_v63  ;;  %v10032_v63 = vld [vmem:[#allocation2 + $0x3e0] sm:$0xff]  }
  0xa9   :  { %12551 = vmatpush3.bf16.msra.mxu0 %v9946_v0  ;;  %v10008_v0 = vld [vmem:[#allocation2 + $0x320] sm:$0xff]  }
  0xaa   :  { %12553 = vmatprep.subr.bf16.mxu0 %v9955_v2  ;;  %v10017_v2 = vld [vmem:[#allocation2 + $0x368] sm:$0xff]  }
  0xab   :  { %12583 = vmatpush3.bf16.msra.mxu1 %v9962_v1  ;;  %v10024_v1 = vld [vmem:[#allocation2 + $0x3a0] sm:$0xff]  }
  0xac   :  { %12585 = vmatprep.subr.bf16.mxu1 %v9971_v3  ;;  %v10033_v3 = vld [vmem:[#allocation2 + $0x3e8] sm:$0xff]  }
  0xad   :  { %12555 = vmatpush3.bf16.msra.mxu0 %v9947_v4  ;;  %v10009_v4 = vld [vmem:[#allocation2 + $0x328] sm:$0xff]  }
  0xae   :  { %12589 = vmatprep.subr.bf16.mxu0 %v9980_v6  ;;  %v10018_v6 = vld [vmem:[#allocation2 + $0x370] sm:$0xff]  }
  0xaf   :  { %12587 = vmatpush3.bf16.msra.mxu1 %v9963_v5  ;;  %v10025_v5 = vld [vmem:[#allocation2 + $0x3a8] sm:$0xff]  }
  0xb0   :  { %12621 = vmatprep.subr.bf16.mxu1 %v9996_v7  ;;  %3482 = vmatmul.mubr.f32.vlgmr.msra.gmra.mrb[2].mxu0 %v3178_v8  ;;  %v10034_v7 = vld [vmem:[#allocation2 + $0x3f0] sm:$0xff]  }
  0xb1   :  { %12591 = vmatpush3.bf16.msra.mxu0 %v9972_v10  ;;  %3621 = vmatprep.mubr.f32.mxu0 %v3183_v14  ;;  %v10010_v8 = vld [vmem:[#allocation2 + $0x330] sm:$0xff]   ;;  %v10019_v10 = vld [vmem:[#allocation2 + $0x378] sm:$0xff]   ;;  %v10044_v14 = vld [vmem:[#allocation2 + $0x440] sm:$0xff]  }
  0xb2   :  { %3552 = vmatmul.mubr.f32.vlgmr.msra.gmra.mrb[2].mxu1 %v3180_v9  ;;  %12593 = vmatprep.subr.bf16.mxu0 %v9981_v12  ;;  %v10026_v9 = vld [vmem:[#allocation2 + $0x3b0] sm:$0xff]   ;;  %v10011_v12 = vld [vmem:[#allocation2 + $0x338] sm:$0xff]  }
  0xb3   :  { %12623 = vmatpush3.bf16.msra.mxu1 %v9988_v11  ;;  %3691 = vmatprep.mubr.f32.mxu1 %v3185_v15  ;;  %v10035_v11 = vld [vmem:[#allocation2 + $0x3f8] sm:$0xff]   ;;  %v10060_v15 = vld [vmem:[#allocation2 + $0x4c0] sm:$0xff]  }
  0xb4   :  { %12625 = vmatprep.subr.bf16.mxu1 %v9997_v13  ;;  %v10027_v13 = vld [vmem:[#allocation2 + $0x3b8] sm:$0xff]  }
  0xb5   :  { %12595 = vmatpush3.bf16.msra.mxu0 %v9973_v16  ;;  %v3186_v16 = vld [vmem:[%s14677_s0 + $0x60] sm:$0xff] }
  0xb6   :  { %12597 = vmatprep.subr.bf16.mxu0 %v9982_v18  ;;  %v10036_v18 = vld [vmem:[#allocation2 + $0x400] sm:$0xff]  }
  0xb7   :  { %12627 = vmatpush3.bf16.msra.mxu1 %v9989_v17  ;;  %v3188_v17 = vld [vmem:[%s14677_s0 + $0x70] sm:$0xff] }
  0xb8   :  { %12629 = vmatprep.subr.bf16.mxu1 %v9998_v19  ;;  %v10052_v19 = vld [vmem:[#allocation2 + $0x480] sm:$0xff]  }
  0xb9   :  { %12599 = vmatpush3.bf16.msra.mxu0 %v9974_v20  ;;  %v10045_v20 = vld [vmem:[#allocation2 + $0x448] sm:$0xff]  }
  0xba   :  { %12601 = vmatprep.subr.bf16.mxu0 %v9983_v22  ;;  %v3191_v22 = vld [vmem:[%s14677_s0 + $0x88] sm:$0xff] }
  0xbb   :  { %12631 = vmatpush3.bf16.msra.mxu1 %v9990_v21  ;;  %v10061_v21 = vld [vmem:[#allocation2 + $0x4c8] sm:$0xff]  }
  0xbc   :  { %12633 = vmatprep.subr.bf16.mxu1 %v9999_v23  ;;  %v3193_v23 = vld [vmem:[%s14677_s0 + $0x98] sm:$0xff] }
  0xbd   :  { %12603 = vmatpush3.bf16.msra.mxu0 %v9975_v24  ;;  %v10037_v24 = vld [vmem:[#allocation2 + $0x408] sm:$0xff]  }
  0xbe   :  { %12605 = vmatprep.subr.bf16.mxu0 %v9984_v26  ;;  %v10046_v26 = vld [vmem:[#allocation2 + $0x450] sm:$0xff]  }
  0xbf   :  { %12635 = vmatpush3.bf16.msra.mxu1 %v9991_v25  ;;  %v10053_v25 = vld [vmem:[#allocation2 + $0x488] sm:$0xff]  }
  0xc0   :  { %12637 = vmatprep.subr.bf16.mxu1 %v10000_v27  ;;  %v10062_v27 = vld [vmem:[#allocation2 + $0x4d0] sm:$0xff]  }
  0xc1   :  { %12607 = vmatpush3.bf16.msra.mxu0 %v9976_v28  ;;  %v10038_v28 = vld [vmem:[#allocation2 + $0x410] sm:$0xff]  }
  0xc2   :  { %12609 = vmatprep.subr.bf16.mxu0 %v9985_v30  ;;  %v10047_v30 = vld [vmem:[#allocation2 + $0x458] sm:$0xff]  }
  0xc3   :  { %12639 = vmatpush3.bf16.msra.mxu1 %v9992_v29  ;;  %v10054_v29 = vld [vmem:[#allocation2 + $0x490] sm:$0xff]  }
  0xc4   :  { %12641 = vmatprep.subr.bf16.mxu1 %v10001_v31  ;;  %v10063_v31 = vld [vmem:[#allocation2 + $0x4d8] sm:$0xff]  }
  0xc5   :  { %12611 = vmatpush3.bf16.msra.mxu0 %v9977_v32  ;;  %v10039_v32 = vld [vmem:[#allocation2 + $0x418] sm:$0xff]  }
  0xc6   :  { %12613 = vmatprep.subr.bf16.mxu0 %v9986_v34  ;;  %v10048_v34 = vld [vmem:[#allocation2 + $0x460] sm:$0xff]  }
  0xc7   :  { %12643 = vmatpush3.bf16.msra.mxu1 %v9993_v33  ;;  %v10055_v33 = vld [vmem:[#allocation2 + $0x498] sm:$0xff]  }
  0xc8   :  { %12645 = vmatprep.subr.bf16.mxu1 %v10002_v35  ;;  %v10064_v35 = vld [vmem:[#allocation2 + $0x4e0] sm:$0xff]  }
  0xc9   :  { %12615 = vmatpush3.bf16.msra.mxu0 %v9978_v36  ;;  %v10040_v36 = vld [vmem:[#allocation2 + $0x420] sm:$0xff]  }
  0xca   :  { %12617 = vmatprep.subr.bf16.mxu0 %v9987_v38  ;;  %v10049_v38 = vld [vmem:[#allocation2 + $0x468] sm:$0xff]  }
  0xcb   :  { %12647 = vmatpush3.bf16.msra.mxu1 %v9994_v37  ;;  %v10056_v37 = vld [vmem:[#allocation2 + $0x4a0] sm:$0xff]  }
  0xcc   :  { %12649 = vmatprep.subr.bf16.mxu1 %v10003_v39  ;;  %v10065_v39 = vld [vmem:[#allocation2 + $0x4e8] sm:$0xff]  }
  0xcd   :  { %12619 = vmatpush3.bf16.msra.mxu0 %v9979_v40  ;;  %v10041_v40 = vld [vmem:[#allocation2 + $0x428] sm:$0xff]  }
  0xce   :  { %12653 = vmatprep.subr.bf16.mxu0 %v10012_v42  ;;  %v10050_v42 = vld [vmem:[#allocation2 + $0x470] sm:$0xff]  }
  0xcf   :  { %12651 = vmatpush3.bf16.msra.mxu1 %v9995_v41  ;;  %v10057_v41 = vld [vmem:[#allocation2 + $0x4a8] sm:$0xff]  }
  0xd0   :  { %12685 = vmatprep.subr.bf16.mxu1 %v10028_v43  ;;  %3622 = vmatmul.mubr.f32.vlgmr.msra.gmra.mrb[4].mxu0 %v3182_v44  ;;  %v10066_v43 = vld [vmem:[#allocation2 + $0x4f0] sm:$0xff]  }
  0xd1   :  { %12655 = vmatpush3.bf16.msra.mxu0 %v10004_v46  ;;  %3761 = vmatprep.mubr.f32.mxu0 %v3187_v50  ;;  %v10042_v44 = vld [vmem:[#allocation2 + $0x430] sm:$0xff]   ;;  %v10051_v46 = vld [vmem:[#allocation2 + $0x478] sm:$0xff]   ;;  %v10076_v50 = vld [vmem:[#allocation2 + $0x540] sm:$0xff]  }
  0xd2   :  { %3692 = vmatmul.mubr.f32.vlgmr.msra.gmra.mrb[4].mxu1 %v3184_v45  ;;  %12657 = vmatprep.subr.bf16.mxu0 %v10013_v48  ;;  %v10058_v45 = vld [vmem:[#allocation2 + $0x4b0] sm:$0xff]   ;;  %v10043_v48 = vld [vmem:[#allocation2 + $0x438] sm:$0xff]  }
  0xd3   :  { %12687 = vmatpush3.bf16.msra.mxu1 %v10020_v47  ;;  %3831 = vmatprep.mubr.f32.mxu1 %v3189_v51  ;;  %v10067_v47 = vld [vmem:[#allocation2 + $0x4f8] sm:$0xff]   ;;  %v10092_v51 = vld [vmem:[#allocation2 + $0x5c0] sm:$0xff]  }
  0xd4   :  { %12689 = vmatprep.subr.bf16.mxu1 %v10029_v49  ;;  %v10059_v49 = vld [vmem:[#allocation2 + $0x4b8] sm:$0xff]  }
  0xd5   :  { %12659 = vmatpush3.bf16.msra.mxu0 %v10005_v52  ;;  %v3190_v52 = vld [vmem:[%s14677_s0 + $0x80] sm:$0xff] }
  0xd6   :  { %12661 = vmatprep.subr.bf16.mxu0 %v10014_v54  ;;  %v10068_v54 = vld [vmem:[#allocation2 + $0x500] sm:$0xff]  }
  0xd7   :  { %12691 = vmatpush3.bf16.msra.mxu1 %v10021_v53  ;;  %v3192_v53 = vld [vmem:[%s14677_s0 + $0x90] sm:$0xff] }
  0xd8   :  { %12693 = vmatprep.subr.bf16.mxu1 %v10030_v55  ;;  %v10084_v55 = vld [vmem:[#allocation2 + $0x580] sm:$0xff]  }
  0xd9   :  { %12663 = vmatpush3.bf16.msra.mxu0 %v10006_v56  ;;  %v10077_v56 = vld [vmem:[#allocation2 + $0x548] sm:$0xff]  }
  0xda   :  { %12665 = vmatprep.subr.bf16.mxu0 %v10015_v58  ;;  %v3195_v58 = vld [vmem:[%s14677_s0 + $0xa8] sm:$0xff] }
  0xdb   :  { %12695 = vmatpush3.bf16.msra.mxu1 %v10022_v57  ;;  %v10093_v57 = vld [vmem:[#allocation2 + $0x5c8] sm:$0xff]  }
  0xdc   :  { %12697 = vmatprep.subr.bf16.mxu1 %v10031_v59  ;;  %v3197_v59 = vld [vmem:[%s14677_s0 + $0xb8] sm:$0xff] }
  0xdd   :  { %12667 = vmatpush3.bf16.msra.mxu0 %v10007_v60  ;;  %v10069_v60 = vld [vmem:[#allocation2 + $0x508] sm:$0xff]  }
  0xde   :  { %12669 = vmatprep.subr.bf16.mxu0 %v10016_v62  ;;  %v10078_v62 = vld [vmem:[#allocation2 + $0x550] sm:$0xff]  }
  0xdf   :  { %12699 = vmatpush3.bf16.msra.mxu1 %v10023_v61  ;;  %v10085_v61 = vld [vmem:[#allocation2 + $0x588] sm:$0xff]  }
  0xe0   :  { %12701 = vmatprep.subr.bf16.mxu1 %v10032_v63  ;;  %v10094_v63 = vld [vmem:[#allocation2 + $0x5d0] sm:$0xff]  }
  0xe1   :  { %12671 = vmatpush3.bf16.msra.mxu0 %v10008_v0  ;;  %v10070_v0 = vld [vmem:[#allocation2 + $0x510] sm:$0xff]  }
  0xe2   :  { %12673 = vmatprep.subr.bf16.mxu0 %v10017_v2  ;;  %v10079_v2 = vld [vmem:[#allocation2 + $0x558] sm:$0xff]  }
  0xe3   :  { %12703 = vmatpush3.bf16.msra.mxu1 %v10024_v1  ;;  %v10086_v1 = vld [vmem:[#allocation2 + $0x590] sm:$0xff]  }
  0xe4   :  { %12705 = vmatprep.subr.bf16.mxu1 %v10033_v3  ;;  %v10095_v3 = vld [vmem:[#allocation2 + $0x5d8] sm:$0xff]  }
  0xe5   :  { %12675 = vmatpush3.bf16.msra.mxu0 %v10009_v4  ;;  %v10071_v4 = vld [vmem:[#allocation2 + $0x518] sm:$0xff]  }
  0xe6   :  { %12677 = vmatprep.subr.bf16.mxu0 %v10018_v6  ;;  %v10080_v6 = vld [vmem:[#allocation2 + $0x560] sm:$0xff]  }
  0xe7   :  { %12707 = vmatpush3.bf16.msra.mxu1 %v10025_v5  ;;  %v10087_v5 = vld [vmem:[#allocation2 + $0x598] sm:$0xff]  }
  0xe8   :  { %12709 = vmatprep.subr.bf16.mxu1 %v10034_v7  ;;  %v10096_v7 = vld [vmem:[#allocation2 + $0x5e0] sm:$0xff]  }
  0xe9   :  { %12679 = vmatpush3.bf16.msra.mxu0 %v10010_v8  ;;  %v10072_v8 = vld [vmem:[#allocation2 + $0x520] sm:$0xff]  }
  0xea   :  { %12681 = vmatprep.subr.bf16.mxu0 %v10019_v10  ;;  %v10081_v10 = vld [vmem:[#allocation2 + $0x568] sm:$0xff]  }
  0xeb   :  { %12711 = vmatpush3.bf16.msra.mxu1 %v10026_v9  ;;  %v10088_v9 = vld [vmem:[#allocation2 + $0x5a0] sm:$0xff]  }
  0xec   :  { %12713 = vmatprep.subr.bf16.mxu1 %v10035_v11  ;;  %v10097_v11 = vld [vmem:[#allocation2 + $0x5e8] sm:$0xff]  }
  0xed   :  { %12683 = vmatpush3.bf16.msra.mxu0 %v10011_v12  ;;  %v10073_v12 = vld [vmem:[#allocation2 + $0x528] sm:$0xff]  }
  0xee   :  { %12717 = vmatprep.subr.bf16.mxu0 %v10044_v14  ;;  %v10082_v14 = vld [vmem:[#allocation2 + $0x570] sm:$0xff]  }
  0xef   :  { %12715 = vmatpush3.bf16.msra.mxu1 %v10027_v13  ;;  %v10089_v13 = vld [vmem:[#allocation2 + $0x5a8] sm:$0xff]  }
  0xf0   :  { %12749 = vmatprep.subr.bf16.mxu1 %v10060_v15  ;;  %3762 = vmatmul.mubr.f32.vlgmr.msra.gmra.mrb[6].mxu0 %v3186_v16  ;;  %v10098_v15 = vld [vmem:[#allocation2 + $0x5f0] sm:$0xff]  }
  0xf1   :  { %12719 = vmatpush3.bf16.msra.mxu0 %v10036_v18  ;;  %3901 = vmatprep.mubr.f32.mxu0 %v3191_v22  ;;  %v10074_v16 = vld [vmem:[#allocation2 + $0x530] sm:$0xff]   ;;  %v10083_v18 = vld [vmem:[#allocation2 + $0x578] sm:$0xff]   ;;  %v10108_v22 = vld [vmem:[#allocation2 + $0x640] sm:$0xff]  }
  0xf2   :  { %3832 = vmatmul.mubr.f32.vlgmr.msra.gmra.mrb[6].mxu1 %v3188_v17  ;;  %12721 = vmatprep.subr.bf16.mxu0 %v10045_v20  ;;  %v10090_v17 = vld [vmem:[#allocation2 + $0x5b0] sm:$0xff]   ;;  %v10075_v20 = vld [vmem:[#allocation2 + $0x538] sm:$0xff]  }
  0xf3   :  { %12751 = vmatpush3.bf16.msra.mxu1 %v10052_v19  ;;  %3971 = vmatprep.mubr.f32.mxu1 %v3193_v23  ;;  %v10099_v19 = vld [vmem:[#allocation2 + $0x5f8] sm:$0xff]   ;;  %v10124_v23 = vld [vmem:[#allocation2 + $0x6c0] sm:$0xff]  }
  0xf4   :  { %12753 = vmatprep.subr.bf16.mxu1 %v10061_v21  ;;  %v10091_v21 = vld [vmem:[#allocation2 + $0x5b8] sm:$0xff]  }
  0xf5   :  { %12723 = vmatpush3.bf16.msra.mxu0 %v10037_v24  ;;  %v3194_v24 = vld [vmem:[%s14677_s0 + $0xa0] sm:$0xff] }
  0xf6   :  { %12725 = vmatprep.subr.bf16.mxu0 %v10046_v26  ;;  %v10100_v26 = vld [vmem:[#allocation2 + $0x600] sm:$0xff]  }
  0xf7   :  { %12755 = vmatpush3.bf16.msra.mxu1 %v10053_v25  ;;  %v3196_v25 = vld [vmem:[%s14677_s0 + $0xb0] sm:$0xff] }
  0xf8   :  { %12757 = vmatprep.subr.bf16.mxu1 %v10062_v27  ;;  %v10116_v27 = vld [vmem:[#allocation2 + $0x680] sm:$0xff]  }
  0xf9   :  { %12727 = vmatpush3.bf16.msra.mxu0 %v10038_v28  ;;  %v10109_v28 = vld [vmem:[#allocation2 + $0x648] sm:$0xff]  }
  0xfa   :  { %12729 = vmatprep.subr.bf16.mxu0 %v10047_v30  ;;  %v3199_v30 = vld [vmem:[%s14677_s0 + $0xc8] sm:$0xff] }
  0xfb   :  { %12759 = vmatpush3.bf16.msra.mxu1 %v10054_v29  ;;  %v10125_v29 = vld [vmem:[#allocation2 + $0x6c8] sm:$0xff]  }
  0xfc   :  { %12761 = vmatprep.subr.bf16.mxu1 %v10063_v31  ;;  %v3201_v31 = vld [vmem:[%s14677_s0 + $0xd8] sm:$0xff] }
  0xfd   :  { %12731 = vmatpush3.bf16.msra.mxu0 %v10039_v32  ;;  %v10101_v32 = vld [vmem:[#allocation2 + $0x608] sm:$0xff]  }
  0xfe   :  { %12733 = vmatprep.subr.bf16.mxu0 %v10048_v34  ;;  %v10110_v34 = vld [vmem:[#allocation2 + $0x650] sm:$0xff]  }
  0xff   :  { %12763 = vmatpush3.bf16.msra.mxu1 %v10055_v33  ;;  %v10117_v33 = vld [vmem:[#allocation2 + $0x688] sm:$0xff]  }
 0x100   :  { %12765 = vmatprep.subr.bf16.mxu1 %v10064_v35  ;;  %v10126_v35 = vld [vmem:[#allocation2 + $0x6d0] sm:$0xff]  }
 0x101   :  { %12735 = vmatpush3.bf16.msra.mxu0 %v10040_v36  ;;  %v10102_v36 = vld [vmem:[#allocation2 + $0x610] sm:$0xff]  }
 0x102   :  { %12737 = vmatprep.subr.bf16.mxu0 %v10049_v38  ;;  %v10111_v38 = vld [vmem:[#allocation2 + $0x658] sm:$0xff]  }
 0x103   :  { %12767 = vmatpush3.bf16.msra.mxu1 %v10056_v37  ;;  %v10118_v37 = vld [vmem:[#allocation2 + $0x690] sm:$0xff]  }
 0x104   :  { %12769 = vmatprep.subr.bf16.mxu1 %v10065_v39  ;;  %v10127_v39 = vld [vmem:[#allocation2 + $0x6d8] sm:$0xff]  }
 0x105   :  { %12739 = vmatpush3.bf16.msra.mxu0 %v10041_v40  ;;  %v10103_v40 = vld [vmem:[#allocation2 + $0x618] sm:$0xff]  }
 0x106   :  { %12741 = vmatprep.subr.bf16.mxu0 %v10050_v42  ;;  %v10112_v42 = vld [vmem:[#allocation2 + $0x660] sm:$0xff]  }
 0x107   :  { %12771 = vmatpush3.bf16.msra.mxu1 %v10057_v41  ;;  %v10119_v41 = vld [vmem:[#allocation2 + $0x698] sm:$0xff]  }
 0x108   :  { %12773 = vmatprep.subr.bf16.mxu1 %v10066_v43  ;;  %v10128_v43 = vld [vmem:[#allocation2 + $0x6e0] sm:$0xff]  }
 0x109   :  { %12743 = vmatpush3.bf16.msra.mxu0 %v10042_v44  ;;  %v10104_v44 = vld [vmem:[#allocation2 + $0x620] sm:$0xff]  }
 0x10a   :  { %12745 = vmatprep.subr.bf16.mxu0 %v10051_v46  ;;  %v10113_v46 = vld [vmem:[#allocation2 + $0x668] sm:$0xff]  }
 0x10b   :  { %12775 = vmatpush3.bf16.msra.mxu1 %v10058_v45  ;;  %v10120_v45 = vld [vmem:[#allocation2 + $0x6a0] sm:$0xff]  }
 0x10c   :  { %12777 = vmatprep.subr.bf16.mxu1 %v10067_v47  ;;  %v10129_v47 = vld [vmem:[#allocation2 + $0x6e8] sm:$0xff]  }
 0x10d   :  { %12747 = vmatpush3.bf16.msra.mxu0 %v10043_v48  ;;  %v10105_v48 = vld [vmem:[#allocation2 + $0x628] sm:$0xff]  }
 0x10e   :  { %12781 = vmatprep.subr.bf16.mxu0 %v10076_v50  ;;  %v10114_v50 = vld [vmem:[#allocation2 + $0x670] sm:$0xff]  }
 0x10f   :  { %12779 = vmatpush3.bf16.msra.mxu1 %v10059_v49  ;;  %v10121_v49 = vld [vmem:[#allocation2 + $0x6a8] sm:$0xff]  }
 0x110   :  { %12813 = vmatprep.subr.bf16.mxu1 %v10092_v51  ;;  %3902 = vmatmul.mubr.f32.vlgmr.msra.gmra.mrb[8].mxu0 %v3190_v52  ;;  %v10130_v51 = vld [vmem:[#allocation2 + $0x6f0] sm:$0xff]  }
 0x111   :  { %12783 = vmatpush3.bf16.msra.mxu0 %v10068_v54  ;;  %4041 = vmatprep.mubr.f32.mxu0 %v3195_v58  ;;  %v10106_v52 = vld [vmem:[#allocation2 + $0x630] sm:$0xff]   ;;  %v10115_v54 = vld [vmem:[#allocation2 + $0x678] sm:$0xff]   ;;  %v10140_v58 = vld [vmem:[#allocation2 + $0x740] sm:$0xff]  }
 0x112   :  { %3972 = vmatmul.mubr.f32.vlgmr.msra.gmra.mrb[8].mxu1 %v3192_v53  ;;  %12785 = vmatprep.subr.bf16.mxu0 %v10077_v56  ;;  %v10122_v53 = vld [vmem:[#allocation2 + $0x6b0] sm:$0xff]   ;;  %v10107_v56 = vld [vmem:[#allocation2 + $0x638] sm:$0xff]  }
 0x113   :  { %12815 = vmatpush3.bf16.msra.mxu1 %v10084_v55  ;;  %4111 = vmatprep.mubr.f32.mxu1 %v3197_v59  ;;  %v10131_v55 = vld [vmem:[#allocation2 + $0x6f8] sm:$0xff]   ;;  %v10156_v59 = vld [vmem:[#allocation2 + $0x7c0] sm:$0xff]  }
 0x114   :  { %12817 = vmatprep.subr.bf16.mxu1 %v10093_v57  ;;  %v10123_v57 = vld [vmem:[#allocation2 + $0x6b8] sm:$0xff]  }
 0x115   :  { %12787 = vmatpush3.bf16.msra.mxu0 %v10069_v60  ;;  %v3198_v60 = vld [vmem:[%s14677_s0 + $0xc0] sm:$0xff] }
 0x116   :  { %12789 = vmatprep.subr.bf16.mxu0 %v10078_v62  ;;  %v10132_v62 = vld [vmem:[#allocation2 + $0x700] sm:$0xff]  }
 0x117   :  { %12819 = vmatpush3.bf16.msra.mxu1 %v10085_v61  ;;  %v3200_v61 = vld [vmem:[%s14677_s0 + $0xd0] sm:$0xff] }
 0x118   :  { %12821 = vmatprep.subr.bf16.mxu1 %v10094_v63  ;;  %v10148_v63 = vld [vmem:[#allocation2 + $0x780] sm:$0xff]  }
 0x119   :  { %12791 = vmatpush3.bf16.msra.mxu0 %v10070_v0  ;;  %v10141_v0 = vld [vmem:[#allocation2 + $0x748] sm:$0xff]  }
 0x11a   :  { %12793 = vmatprep.subr.bf16.mxu0 %v10079_v2  ;;  %v3203_v2 = vld [vmem:[%s14677_s0 + $0xe8] sm:$0xff] }
 0x11b   :  { %12823 = vmatpush3.bf16.msra.mxu1 %v10086_v1  ;;  %v10157_v1 = vld [vmem:[#allocation2 + $0x7c8] sm:$0xff]  }
 0x11c   :  { %12825 = vmatprep.subr.bf16.mxu1 %v10095_v3  ;;  %v3205_v3 = vld [vmem:[%s14677_s0 + $0xf8] sm:$0xff] }
 0x11d   :  { %12795 = vmatpush3.bf16.msra.mxu0 %v10071_v4  ;;  %v10133_v4 = vld [vmem:[#allocation2 + $0x708] sm:$0xff]  }
 0x11e   :  { %12797 = vmatprep.subr.bf16.mxu0 %v10080_v6  ;;  %v10142_v6 = vld [vmem:[#allocation2 + $0x750] sm:$0xff]  }
 0x11f   :  { %12827 = vmatpush3.bf16.msra.mxu1 %v10087_v5  ;;  %v10149_v5 = vld [vmem:[#allocation2 + $0x788] sm:$0xff]  }
 0x120   :  { %12829 = vmatprep.subr.bf16.mxu1 %v10096_v7  ;;  %v10158_v7 = vld [vmem:[#allocation2 + $0x7d0] sm:$0xff]  }
 0x121   :  { %12799 = vmatpush3.bf16.msra.mxu0 %v10072_v8  ;;  %v10134_v8 = vld [vmem:[#allocation2 + $0x710] sm:$0xff]  }
 0x122   :  { %12801 = vmatprep.subr.bf16.mxu0 %v10081_v10  ;;  %v10143_v10 = vld [vmem:[#allocation2 + $0x758] sm:$0xff]  }
 0x123   :  { %12831 = vmatpush3.bf16.msra.mxu1 %v10088_v9  ;;  %v10150_v9 = vld [vmem:[#allocation2 + $0x790] sm:$0xff]  }
 0x124   :  { %12833 = vmatprep.subr.bf16.mxu1 %v10097_v11  ;;  %v10159_v11 = vld [vmem:[#allocation2 + $0x7d8] sm:$0xff]  }
 0x125   :  { %12803 = vmatpush3.bf16.msra.mxu0 %v10073_v12  ;;  %v10135_v12 = vld [vmem:[#allocation2 + $0x718] sm:$0xff]  }
 0x126   :  { %12805 = vmatprep.subr.bf16.mxu0 %v10082_v14  ;;  %v10144_v14 = vld [vmem:[#allocation2 + $0x760] sm:$0xff]  }
 0x127   :  { %12835 = vmatpush3.bf16.msra.mxu1 %v10089_v13  ;;  %v10151_v13 = vld [vmem:[#allocation2 + $0x798] sm:$0xff]  }
 0x128   :  { %12837 = vmatprep.subr.bf16.mxu1 %v10098_v15  ;;  %v10160_v15 = vld [vmem:[#allocation2 + $0x7e0] sm:$0xff]  }
 0x129   :  { %12807 = vmatpush3.bf16.msra.mxu0 %v10074_v16  ;;  %v10136_v16 = vld [vmem:[#allocation2 + $0x720] sm:$0xff]  }
 0x12a   :  { %12809 = vmatprep.subr.bf16.mxu0 %v10083_v18  ;;  %v10145_v18 = vld [vmem:[#allocation2 + $0x768] sm:$0xff]  }
 0x12b   :  { %12839 = vmatpush3.bf16.msra.mxu1 %v10090_v17  ;;  %v10152_v17 = vld [vmem:[#allocation2 + $0x7a0] sm:$0xff]  }
 0x12c   :  { %12841 = vmatprep.subr.bf16.mxu1 %v10099_v19  ;;  %v10161_v19 = vld [vmem:[#allocation2 + $0x7e8] sm:$0xff]  }
 0x12d   :  { %12811 = vmatpush3.bf16.msra.mxu0 %v10075_v20  ;;  %v10137_v20 = vld [vmem:[#allocation2 + $0x728] sm:$0xff]  }
 0x12e   :  { %12845 = vmatprep.subr.bf16.mxu0 %v10108_v22 }
 0x12f   :  { %12843 = vmatpush3.bf16.msra.mxu1 %v10091_v21  ;;  %v10153_v21 = vld [vmem:[#allocation2 + $0x7a8] sm:$0xff]  }
 0x130   :  { %12877 = vmatprep.subr.bf16.mxu1 %v10124_v23  ;;  %4042 = vmatmul.mubr.f32.vlgmr.msra.gmra.mrb[10].mxu0 %v3194_v24  ;;  %v10146_v24 = vld [vmem:[#allocation2 + $0x770] sm:$0xff]  }
 0x131   :  { %12847 = vmatpush3.bf16.msra.mxu0 %v10100_v26  ;;  %4181 = vmatprep.mubr.f32.mxu0 %v3199_v30  ;;  %v6834_v26 = vld [vmem:[#allocation4] ss:$0 sm:$0xff] }
 0x132   :  { %4112 = vmatmul.mubr.f32.vlgmr.msra.gmra.mrb[10].mxu1 %v3196_v25  ;;  %12849 = vmatprep.subr.bf16.mxu0 %v10109_v28  ;;  %v10162_v25 = vld [vmem:[#allocation2 + $0x7f0] sm:$0xff]  }
 0x133   :  { %12879 = vmatpush3.bf16.msra.mxu1 %v10116_v27  ;;  %4251 = vmatprep.mubr.f32.mxu1 %v3201_v31  ;;  %v10138_v31 = vld [vmem:[#allocation2 + $0x730] sm:$0xff]  }
 0x134   :  { %12881 = vmatprep.subr.bf16.mxu1 %v10125_v29 }
 0x135   :  { %12851 = vmatpush3.bf16.msra.mxu0 %v10101_v32  ;;  %v10154_v32 = vld [vmem:[#allocation2 + $0x7b0] sm:$0xff]  }
 0x136   :  { %12853 = vmatprep.subr.bf16.mxu0 %v10110_v34  ;;  %v10147_v34 = vld [vmem:[#allocation2 + $0x778] sm:$0xff]  }
 0x137   :  { %12883 = vmatpush3.bf16.msra.mxu1 %v10117_v33 }
 0x138   :  { %12885 = vmatprep.subr.bf16.mxu1 %v10126_v35  ;;  %v10163_v35 = vld [vmem:[#allocation2 + $0x7f8] sm:$0xff]  }
 0x139   :  { %12855 = vmatpush3.bf16.msra.mxu0 %v10102_v36 }
 0x13a   :  { %12857 = vmatprep.subr.bf16.mxu0 %v10111_v38  ;;  %v10155_v38 = vld [vmem:[#allocation2 + $0x7b8] sm:$0xff]  }
 0x13b   :  { %12887 = vmatpush3.bf16.msra.mxu1 %v10118_v37  ;;  %v10139_v37 = vld [vmem:[#allocation2 + $0x738] sm:$0xff]  }
 0x13c   :  { %12889 = vmatprep.subr.bf16.mxu1 %v10127_v39  ;;  %v10172_v39 = vld [vmem:[#allocation2 + $0x840] sm:$0xff]  }
 0x13d   :  { %12859 = vmatpush3.bf16.msra.mxu0 %v10103_v40  ;;  %v10188_v40 = vld [vmem:[#allocation2 + $0x8c0] sm:$0xff]  }
 0x13e   :  { %12861 = vmatprep.subr.bf16.mxu0 %v10112_v42  ;;  %v3204_v42 = vld [vmem:[%s14677_s0 + $0xf0] sm:$0xff] }
 0x13f   :  { %12891 = vmatpush3.bf16.msra.mxu1 %v10119_v41  ;;  %v3202_v41 = vld [vmem:[%s14677_s0 + $0xe0] sm:$0xff] }
 0x140   :  { %12893 = vmatprep.subr.bf16.mxu1 %v10128_v43  ;;  %v10164_v43 = vld [vmem:[#allocation2 + $0x800] sm:$0xff]  }
 0x141   :  { %12863 = vmatpush3.bf16.msra.mxu0 %v10104_v44  ;;  %v10180_v44 = vld [vmem:[#allocation2 + $0x880] sm:$0xff]  }
 0x142   :  { %12865 = vmatprep.subr.bf16.mxu0 %v10113_v46  ;;  %v10189_v46 = vld [vmem:[#allocation2 + $0x8c8] sm:$0xff]  }
 0x143   :  { %12895 = vmatpush3.bf16.msra.mxu1 %v10120_v45  ;;  %v10173_v45 = vld [vmem:[#allocation2 + $0x848] sm:$0xff]  }
 0x144   :  { %12897 = vmatprep.subr.bf16.mxu1 %v10129_v47  ;;  %v3207_v47 = vld [vmem:[%s14677_s0 + $0x108] sm:$0xff] }
 0x145   :  { %12867 = vmatpush3.bf16.msra.mxu0 %v10105_v48  ;;  %v3209_v48 = vld [vmem:[%s14677_s0 + $0x118] sm:$0xff] }
 0x146   :  { %12869 = vmatprep.subr.bf16.mxu0 %v10114_v50  ;;  %v10181_v50 = vld [vmem:[#allocation2 + $0x888] sm:$0xff]  }
 0x147   :  { %12899 = vmatpush3.bf16.msra.mxu1 %v10121_v49  ;;  %v10165_v49 = vld [vmem:[#allocation2 + $0x808] sm:$0xff]  }
 0x148   :  { %12901 = vmatprep.subr.bf16.mxu1 %v10130_v51  ;;  %v10174_v51 = vld [vmem:[#allocation2 + $0x850] sm:$0xff]  }
 0x149   :  { %12871 = vmatpush3.bf16.msra.mxu0 %v10106_v52  ;;  %v10190_v52 = vld [vmem:[#allocation2 + $0x8d0] sm:$0xff]  }
 0x14a   :  { %12873 = vmatprep.subr.bf16.mxu0 %v10115_v54  ;;  %v10182_v54 = vld [vmem:[#allocation2 + $0x890] sm:$0xff]  }
 0x14b   :  { %12903 = vmatpush3.bf16.msra.mxu1 %v10122_v53  ;;  %v10166_v53 = vld [vmem:[#allocation2 + $0x810] sm:$0xff]  }
 0x14c   :  { %12905 = vmatprep.subr.bf16.mxu1 %v10131_v55  ;;  %v10175_v55 = vld [vmem:[#allocation2 + $0x858] sm:$0xff]  }
 0x14d   :  { %12875 = vmatpush3.bf16.msra.mxu0 %v10107_v56  ;;  %v10191_v56 = vld [vmem:[#allocation2 + $0x8d8] sm:$0xff]  }
 0x14e   :  { %12909 = vmatprep.subr.bf16.mxu0 %v10140_v58  ;;  %v10183_v58 = vld [vmem:[#allocation2 + $0x898] sm:$0xff]  }
 0x14f   :  { %12907 = vmatpush3.bf16.msra.mxu1 %v10123_v57  ;;  %v10167_v57 = vld [vmem:[#allocation2 + $0x818] sm:$0xff]  }
 0x150   :  { %12941 = vmatprep.subr.bf16.mxu1 %v10156_v59  ;;  %4182 = vmatmul.mubr.f32.vlgmr.msra.gmra.mrb[12].mxu0 %v3198_v60  ;;  %v10176_v59 = vld [vmem:[#allocation2 + $0x860] sm:$0xff]  }
 0x151   :  { %12911 = vmatpush3.bf16.msra.mxu0 %v10132_v62  ;;  %4321 = vmatprep.mubr.f32.mxu0 %v3203_v2  ;;  %v10192_v60 = vld [vmem:[#allocation2 + $0x8e0] sm:$0xff]   ;;  %v10185_v2 = vld [vmem:[#allocation2 + $0x8a8] sm:$0xff]  }
 0x152   :  { %4252 = vmatmul.mubr.f32.vlgmr.msra.gmra.mrb[12].mxu1 %v3200_v61  ;;  %12913 = vmatprep.subr.bf16.mxu0 %v10141_v0  ;;  %v10168_v61 = vld [vmem:[#allocation2 + $0x820] sm:$0xff]   ;;  %v10193_v0 = vld [vmem:[#allocation2 + $0x8e8] sm:$0xff]  }
 0x153   :  { %12943 = vmatpush3.bf16.msra.mxu1 %v10148_v63  ;;  %4391 = vmatprep.mubr.f32.mxu1 %v3205_v3  ;;  %v10184_v62 = vld [vmem:[#allocation2 + $0x8a0] sm:$0xff]   ;;  %v10177_v63 = vld [vmem:[#allocation2 + $0x868] sm:$0xff]  }
 0x154   :  { %12945 = vmatprep.subr.bf16.mxu1 %v10157_v1  ;;  %v10169_v1 = vld [vmem:[#allocation2 + $0x828] sm:$0xff]  }
 0x155   :  { %12915 = vmatpush3.bf16.msra.mxu0 %v10133_v4 }
 0x156   :  { %12917 = vmatprep.subr.bf16.mxu0 %v10142_v6  ;;  %v10194_v6 = vld [vmem:[#allocation2 + $0x8f0] sm:$0xff]  }
 0x157   :  { %12947 = vmatpush3.bf16.msra.mxu1 %v10149_v5  ;;  %v10178_v5 = vld [vmem:[#allocation2 + $0x870] sm:$0xff]  }
 0x158   :  { %12949 = vmatprep.subr.bf16.mxu1 %v10158_v7 }
 0x159   :  { %12919 = vmatpush3.bf16.msra.mxu0 %v10134_v8 }
 0x15a   :  { %12921 = vmatprep.subr.bf16.mxu0 %v10143_v10 }
 0x15b   :  { %12951 = vmatpush3.bf16.msra.mxu1 %v10150_v9 }
 0x15c   :  { %12953 = vmatprep.subr.bf16.mxu1 %v10159_v11  ;;  %v10170_v11 = vld [vmem:[#allocation2 + $0x830] sm:$0xff]  }
 0x15d   :  { %12923 = vmatpush3.bf16.msra.mxu0 %v10135_v12  ;;  %v10186_v12 = vld [vmem:[#allocation2 + $0x8b0] sm:$0xff]  }
 0x15e   :  { %12925 = vmatprep.subr.bf16.mxu0 %v10144_v14  ;;  %v10179_v14 = vld [vmem:[#allocation2 + $0x878] sm:$0xff]  }
 0x15f   :  { %12955 = vmatpush3.bf16.msra.mxu1 %v10151_v13 }
 0x160   :  { %12957 = vmatprep.subr.bf16.mxu1 %v10160_v15  ;;  %v10195_v15 = vld [vmem:[#allocation2 + $0x8f8] sm:$0xff]  }
 0x161   :  { %12927 = vmatpush3.bf16.msra.mxu0 %v10136_v16 }
 0x162   :  { %12929 = vmatprep.subr.bf16.mxu0 %v10145_v18  ;;  %v10187_v18 = vld [vmem:[#allocation2 + $0x8b8] sm:$0xff]  }
 0x163   :  { %12959 = vmatpush3.bf16.msra.mxu1 %v10152_v17  ;;  %v10708_v22 = vpop.f32.mrb[0].mxu0  ;;  %v10171_v17 = vld [vmem:[#allocation2 + $0x838] sm:$0xff]  }
 0x164   :  { %12961 = vmatprep.subr.bf16.mxu1 %v10161_v19  ;;  %v10709_v27 = vpop.f32.mrb[1].mxu0  ;;  %v10204_v19 = vld [vmem:[#allocation2 + $0x940] sm:$0xff]  }
 0x165   :  { %v10743_v23 = vpop.f32.mrb[0].mxu1  ;;  %v10710_v29 = vadd.f32 %v10709_v27, %v10708_v22  ;;  %12931 = vmatpush3.bf16.msra.mxu0 %v10137_v20  ;;  %v10220_v20 = vld [vmem:[#allocation2 + $0x9c0] sm:$0xff]   ;;  %v3208_v22 = vld [vmem:[%s14677_s0 + $0x110] sm:$0xff]  ;;  %v3211_v27 = vld [vmem:[%s14677_s0 + $0x128] sm:$0xff] }
 0x166   :  { %v10744_v28 = vpop.f32.mrb[1].mxu1  ;;  %12933 = vmatprep.subr.bf16.mxu0 %v10146_v24  ;;  %v10212_v24 = vld [vmem:[#allocation2 + $0x980] sm:$0xff]  }
 0x167   :  { %v10745_v30 = vadd.f32 %v10744_v28, %v10743_v23  ;;  %12963 = vmatpush3.bf16.msra.mxu1 %v10153_v21  ;;  %v3344_v33 = vadd.f32 %v10710_v29, %v6834_v26  ;;  %v3206_v21 = vld [vmem:[%s14677_s0 + $0x100] sm:$0xff]  ;;  %v10221_v26 = vld [vmem:[#allocation2 + $0x9c8] sm:$0xff]   ;;  %v3213_v28 = vld [vmem:[%s14677_s0 + $0x138] sm:$0xff] }
 0x168   :  { %12965 = vmatprep.subr.bf16.mxu1 %v10162_v25  ;;  %v10196_v23 = vld [vmem:[#allocation2 + $0x900] sm:$0xff]   ;;  %v10205_v25 = vld [vmem:[#allocation2 + $0x948] sm:$0xff]  }
 0x169   :  { %v14412_v36 = vadd.f32 %v10745_v30, %v3344_v33  ;;  %12935 = vmatpush3.bf16.msra.mxu0 %v10138_v31  ;;  %v10197_v29 = vld [vmem:[#allocation2 + $0x908] sm:$0xff]   ;;  %v10206_v31 = vld [vmem:[#allocation2 + $0x950] sm:$0xff]  }
 0x16a   :  { %12937 = vmatprep.subr.bf16.mxu0 %v10147_v34  ;;  %v10213_v30 = vld [vmem:[#allocation2 + $0x988] sm:$0xff]   ;;  %v10198_v33 = vld [vmem:[#allocation2 + $0x910] sm:$0xff]  }
 0x16b   :  { %12967 = vmatpush3.bf16.msra.mxu1 %v10154_v32  ;;  %v10222_v32 = vld [vmem:[#allocation2 + $0x9d0] sm:$0xff]  }
 0x16c   :  { %12969 = vmatprep.subr.bf16.mxu1 %v10163_v35  ;;  %v10214_v34 = vld [vmem:[#allocation2 + $0x990] sm:$0xff]   ;;  %v10207_v35 = vld [vmem:[#allocation2 + $0x958] sm:$0xff]  }
 0x16d   :  { %12939 = vmatpush3.bf16.msra.mxu0 %v10139_v37  ;;  %v10199_v37 = vld [vmem:[#allocation2 + $0x918] sm:$0xff]  }
 0x16e   :  { %12973 = vmatprep.subr.bf16.mxu0 %v10172_v39  ;;  %v10208_v39 = vld [vmem:[#allocation2 + $0x960] sm:$0xff]  }
 0x16f   :  { %12971 = vmatpush3.bf16.msra.mxu1 %v10155_v38  ;;  %v10215_v38 = vld [vmem:[#allocation2 + $0x998] sm:$0xff]  }
 0x170   :  { %13005 = vmatprep.subr.bf16.mxu1 %v10188_v40  ;;  %4322 = vmatmul.mubr.f32.vlgmr.msra.gmra.mrb[14].mxu0 %v3202_v41  ;;  %v10224_v40 = vld [vmem:[#allocation2 + $0x9e0] sm:$0xff]  }
 0x171   :  { %12975 = vmatpush3.bf16.msra.mxu0 %v10164_v43  ;;  %4461 = vmatprep.mubr.f32.mxu0 %v3207_v47  ;;  %v10200_v41 = vld [vmem:[#allocation2 + $0x920] sm:$0xff]   ;;  %v10209_v43 = vld [vmem:[#allocation2 + $0x968] sm:$0xff]  }
 0x172   :  { %4392 = vmatmul.mubr.f32.vlgmr.msra.gmra.mrb[14].mxu1 %v3204_v42  ;;  %12977 = vmatprep.subr.bf16.mxu0 %v10173_v45  ;;  %v10216_v42 = vld [vmem:[#allocation2 + $0x9a0] sm:$0xff]   ;;  %v10201_v45 = vld [vmem:[#allocation2 + $0x928] sm:$0xff]  }
 0x173   :  { %13007 = vmatpush3.bf16.msra.mxu1 %v10180_v44  ;;  %4531 = vmatprep.mubr.f32.mxu1 %v3209_v48  ;;  %v10225_v44 = vld [vmem:[#allocation2 + $0x9e8] sm:$0xff]  }
 0x174   :  { %13009 = vmatprep.subr.bf16.mxu1 %v10189_v46  ;;  %v10217_v46 = vld [vmem:[#allocation2 + $0x9a8] sm:$0xff]  }
 0x175   :  { %12979 = vmatpush3.bf16.msra.mxu0 %v10165_v49  ;;  %v10210_v49 = vld [vmem:[#allocation2 + $0x970] sm:$0xff]  }
 0x176   :  { %12981 = vmatprep.subr.bf16.mxu0 %v10174_v51 }
 0x177   :  { %13011 = vmatpush3.bf16.msra.mxu1 %v10181_v50  ;;  %v10226_v50 = vld [vmem:[#allocation2 + $0x9f0] sm:$0xff]  }
 0x178   :  { %13013 = vmatprep.subr.bf16.mxu1 %v10190_v52 }
 0x179   :  { %12983 = vmatpush3.bf16.msra.mxu0 %v10166_v53 }
 0x17a   :  { %12985 = vmatprep.subr.bf16.mxu0 %v10175_v55  ;;  %v10202_v55 = vld [vmem:[#allocation2 + $0x930] sm:$0xff]  }
 0x17b   :  { %13015 = vmatpush3.bf16.msra.mxu1 %v10182_v54 }
 0x17c   :  { %13017 = vmatprep.subr.bf16.mxu1 %v10191_v56  ;;  %v10218_v56 = vld [vmem:[#allocation2 + $0x9b0] sm:$0xff]  }
 0x17d   :  { %12987 = vmatpush3.bf16.msra.mxu0 %v10167_v57 }
 0x17e   :  { %12989 = vmatprep.subr.bf16.mxu0 %v10176_v59  ;;  %v10227_v59 = vld [vmem:[#allocation2 + $0x9f8] sm:$0xff]  }
 0x17f   :  { %13019 = vmatpush3.bf16.msra.mxu1 %v10183_v58  ;;  %v10211_v58 = vld [vmem:[#allocation2 + $0x978] sm:$0xff]  }
 0x180   :  { %13021 = vmatprep.subr.bf16.mxu1 %v10192_v60 }
 0x181   :  { %12991 = vmatpush3.bf16.msra.mxu0 %v10168_v61  ;;  %v10203_v61 = vld [vmem:[#allocation2 + $0x938] sm:$0xff]  }
 0x182   :  { %12993 = vmatprep.subr.bf16.mxu0 %v10177_v63  ;;  %v10236_v63 = vld [vmem:[#allocation2 + $0xa40] sm:$0xff]  }
 0x183   :  { %13023 = vmatpush3.bf16.msra.mxu1 %v10184_v62  ;;  %v10778_v3 = vpop.f32.mrb[2].mxu0  ;;  %v10219_v62 = vld [vmem:[#allocation2 + $0x9b8] sm:$0xff]  }
 0x184   :  { %13025 = vmatprep.subr.bf16.mxu1 %v10193_v0  ;;  %v10779_v7 = vpop.f32.mrb[3].mxu0  ;;  %v10252_v0 = vld [vmem:[#allocation2 + $0xac0] sm:$0xff]  }
 0x185   :  { %v10813_v4 = vpop.f32.mrb[2].mxu1  ;;  %v10780_v9 = vadd.f32 %v10779_v7, %v10778_v3  ;;  %12995 = vmatpush3.bf16.msra.mxu0 %v10169_v1  ;;  %v3210_v1 = vld [vmem:[%s14677_s0 + $0x120] sm:$0xff]  ;;  %v3215_v7 = vld [vmem:[%s14677_s0 + $0x148] sm:$0xff] }
 0x186   :  { %v10814_v8 = vpop.f32.mrb[3].mxu1  ;;  %12997 = vmatprep.subr.bf16.mxu0 %v10178_v5  ;;  %v10228_v3 = vld [vmem:[#allocation2 + $0xa00] sm:$0xff]   ;;  %v10237_v5 = vld [vmem:[#allocation2 + $0xa48] sm:$0xff]  }
 0x187   :  { %v10815_v10 = vadd.f32 %v10814_v8, %v10813_v4  ;;  %13027 = vmatpush3.bf16.msra.mxu1 %v10185_v2  ;;  %v3484_v13 = vadd.f32 %v10780_v9, %v14412_v36  ;;  %v10223_v36 = vld [vmem:[#allocation2 + $0x9d8] sm:$0xff]   ;;  %v3212_v2 = vld [vmem:[%s14677_s0 + $0x130] sm:$0xff]  ;;  %v10244_v4 = vld [vmem:[#allocation2 + $0xa80] sm:$0xff]  }
 0x188   :  { %13029 = vmatprep.subr.bf16.mxu1 %v10194_v6  ;;  %v10253_v6 = vld [vmem:[#allocation2 + $0xac8] sm:$0xff]   ;;  %v3217_v8 = vld [vmem:[%s14677_s0 + $0x158] sm:$0xff] }
 0x189   :  { %v14427_v16 = vadd.f32 %v10815_v10, %v3484_v13  ;;  %12999 = vmatpush3.bf16.msra.mxu0 %v10170_v11  ;;  %v10229_v9 = vld [vmem:[#allocation2 + $0xa08] sm:$0xff]   ;;  %v10238_v11 = vld [vmem:[#allocation2 + $0xa50] sm:$0xff]  }
 0x18a   :  { %13001 = vmatprep.subr.bf16.mxu0 %v10179_v14  ;;  %v10245_v10 = vld [vmem:[#allocation2 + $0xa88] sm:$0xff]   ;;  %v10230_v13 = vld [vmem:[#allocation2 + $0xa10] sm:$0xff]  }
 0x18b   :  { %13031 = vmatpush3.bf16.msra.mxu1 %v10186_v12  ;;  %v10254_v12 = vld [vmem:[#allocation2 + $0xad0] sm:$0xff]  }
 0x18c   :  { %13033 = vmatprep.subr.bf16.mxu1 %v10195_v15  ;;  %v10246_v14 = vld [vmem:[#allocation2 + $0xa90] sm:$0xff]   ;;  %v10239_v15 = vld [vmem:[#allocation2 + $0xa58] sm:$0xff]  }
 0x18d   :  { %13003 = vmatpush3.bf16.msra.mxu0 %v10171_v17  ;;  %v10231_v17 = vld [vmem:[#allocation2 + $0xa18] sm:$0xff]  }
 0x18e   :  { %13037 = vmatprep.subr.bf16.mxu0 %v10204_v19  ;;  %v10240_v19 = vld [vmem:[#allocation2 + $0xa60] sm:$0xff]  }
 0x18f   :  { %13035 = vmatpush3.bf16.msra.mxu1 %v10187_v18  ;;  %v10247_v18 = vld [vmem:[#allocation2 + $0xa98] sm:$0xff]  }
 0x190   :  { %13069 = vmatprep.subr.bf16.mxu1 %v10220_v20  ;;  %4462 = vmatmul.mubr.f32.vlgmr.msra.gmra.mrb[16].mxu0 %v3206_v21  ;;  %v10256_v20 = vld [vmem:[#allocation2 + $0xae0] sm:$0xff]  }
 0x191   :  { %13039 = vmatpush3.bf16.msra.mxu0 %v10196_v23  ;;  %4601 = vmatprep.mubr.f32.mxu0 %v3211_v27  ;;  %v10232_v21 = vld [vmem:[#allocation2 + $0xa20] sm:$0xff]   ;;  %v10241_v23 = vld [vmem:[#allocation2 + $0xa68] sm:$0xff]  }
 0x192   :  { %4532 = vmatmul.mubr.f32.vlgmr.msra.gmra.mrb[16].mxu1 %v3208_v22  ;;  %13041 = vmatprep.subr.bf16.mxu0 %v10205_v25  ;;  %v10248_v22 = vld [vmem:[#allocation2 + $0xaa0] sm:$0xff]   ;;  %v10233_v25 = vld [vmem:[#allocation2 + $0xa28] sm:$0xff]  }
 0x193   :  { %13071 = vmatpush3.bf16.msra.mxu1 %v10212_v24  ;;  %4671 = vmatprep.mubr.f32.mxu1 %v3213_v28  ;;  %v10257_v24 = vld [vmem:[#allocation2 + $0xae8] sm:$0xff]  }
 0x194   :  { %13073 = vmatprep.subr.bf16.mxu1 %v10221_v26  ;;  %v10249_v26 = vld [vmem:[#allocation2 + $0xaa8] sm:$0xff]  }
 0x195   :  { %13043 = vmatpush3.bf16.msra.mxu0 %v10197_v29  ;;  %v10242_v29 = vld [vmem:[#allocation2 + $0xa70] sm:$0xff]  }
 0x196   :  { %13045 = vmatprep.subr.bf16.mxu0 %v10206_v31 }
 0x197   :  { %13075 = vmatpush3.bf16.msra.mxu1 %v10213_v30  ;;  %v10258_v30 = vld [vmem:[#allocation2 + $0xaf0] sm:$0xff]  }
 0x198   :  { %13077 = vmatprep.subr.bf16.mxu1 %v10222_v32 }
 0x199   :  { %13047 = vmatpush3.bf16.msra.mxu0 %v10198_v33 }
 0x19a   :  { %13049 = vmatprep.subr.bf16.mxu0 %v10207_v35  ;;  %v10234_v35 = vld [vmem:[#allocation2 + $0xa30] sm:$0xff]  }
 0x19b   :  { %13079 = vmatpush3.bf16.msra.mxu1 %v10214_v34 }
 0x19c   :  { %13081 = vmatprep.subr.bf16.mxu1 %v10223_v36  ;;  %v10250_v36 = vld [vmem:[#allocation2 + $0xab0] sm:$0xff]  }
 0x19d   :  { %13051 = vmatpush3.bf16.msra.mxu0 %v10199_v37 }
 0x19e   :  { %13053 = vmatprep.subr.bf16.mxu0 %v10208_v39  ;;  %v10259_v39 = vld [vmem:[#allocation2 + $0xaf8] sm:$0xff]  }
 0x19f   :  { %13083 = vmatpush3.bf16.msra.mxu1 %v10215_v38  ;;  %v10243_v38 = vld [vmem:[#allocation2 + $0xa78] sm:$0xff]  }
 0x1a0   :  { %13085 = vmatprep.subr.bf16.mxu1 %v10224_v40 }
 0x1a1   :  { %13055 = vmatpush3.bf16.msra.mxu0 %v10200_v41  ;;  %v10235_v41 = vld [vmem:[#allocation2 + $0xa38] sm:$0xff]  }
 0x1a2   :  { %13057 = vmatprep.subr.bf16.mxu0 %v10209_v43  ;;  %v10268_v43 = vld [vmem:[#allocation2 + $0xb40] sm:$0xff]  }
 0x1a3   :  { %13087 = vmatpush3.bf16.msra.mxu1 %v10216_v42  ;;  %v10848_v47 = vpop.f32.mrb[4].mxu0  ;;  %v10251_v42 = vld [vmem:[#allocation2 + $0xab8] sm:$0xff]  }
 0x1a4   :  { %13089 = vmatprep.subr.bf16.mxu1 %v10225_v44  ;;  %v10849_v51 = vpop.f32.mrb[5].mxu0  ;;  %v10284_v44 = vld [vmem:[#allocation2 + $0xbc0] sm:$0xff]  }
 0x1a5   :  { %v10883_v48 = vpop.f32.mrb[4].mxu1  ;;  %v10850_v53 = vadd.f32 %v10849_v51, %v10848_v47  ;;  %13059 = vmatpush3.bf16.msra.mxu0 %v10201_v45  ;;  %v3214_v45 = vld [vmem:[%s14677_s0 + $0x140] sm:$0xff]  ;;  %v3219_v51 = vld [vmem:[%s14677_s0 + $0x168] sm:$0xff] }
 0x1a6   :  { %v10884_v52 = vpop.f32.mrb[5].mxu1  ;;  %13061 = vmatprep.subr.bf16.mxu0 %v10210_v49  ;;  %v10260_v47 = vld [vmem:[#allocation2 + $0xb00] sm:$0xff]   ;;  %v10269_v49 = vld [vmem:[#allocation2 + $0xb48] sm:$0xff]  }
 0x1a7   :  { %v10885_v54 = vadd.f32 %v10884_v52, %v10883_v48  ;;  %13091 = vmatpush3.bf16.msra.mxu1 %v10217_v46  ;;  %v3624_v57 = vadd.f32 %v10850_v53, %v14427_v16  ;;  %v10255_v16 = vld [vmem:[#allocation2 + $0xad8] sm:$0xff]   ;;  %v3216_v46 = vld [vmem:[%s14677_s0 + $0x150] sm:$0xff]  ;;  %v10276_v48 = vld [vmem:[#allocation2 + $0xb80] sm:$0xff]  }
 0x1a8   :  { %13093 = vmatprep.subr.bf16.mxu1 %v10226_v50  ;;  %v10285_v50 = vld [vmem:[#allocation2 + $0xbc8] sm:$0xff]   ;;  %v3221_v52 = vld [vmem:[%s14677_s0 + $0x178] sm:$0xff] }
 0x1a9   :  { %v14442_v60 = vadd.f32 %v10885_v54, %v3624_v57  ;;  %13063 = vmatpush3.bf16.msra.mxu0 %v10202_v55  ;;  %v10261_v53 = vld [vmem:[#allocation2 + $0xb08] sm:$0xff]   ;;  %v10270_v55 = vld [vmem:[#allocation2 + $0xb50] sm:$0xff]  }
 0x1aa   :  { %13065 = vmatprep.subr.bf16.mxu0 %v10211_v58  ;;  %v10277_v54 = vld [vmem:[#allocation2 + $0xb88] sm:$0xff]   ;;  %v10262_v57 = vld [vmem:[#allocation2 + $0xb10] sm:$0xff]  }
 0x1ab   :  { %13095 = vmatpush3.bf16.msra.mxu1 %v10218_v56  ;;  %v10286_v56 = vld [vmem:[#allocation2 + $0xbd0] sm:$0xff]  }
 0x1ac   :  { %13097 = vmatprep.subr.bf16.mxu1 %v10227_v59  ;;  %v10278_v58 = vld [vmem:[#allocation2 + $0xb90] sm:$0xff]   ;;  %v10271_v59 = vld [vmem:[#allocation2 + $0xb58] sm:$0xff]  }
 0x1ad   :  { %13067 = vmatpush3.bf16.msra.mxu0 %v10203_v61  ;;  %v10263_v61 = vld [vmem:[#allocation2 + $0xb18] sm:$0xff]  }
 0x1ae   :  { %13101 = vmatprep.subr.bf16.mxu0 %v10236_v63  ;;  %v10272_v63 = vld [vmem:[#allocation2 + $0xb60] sm:$0xff]  }
 0x1af   :  { %13099 = vmatpush3.bf16.msra.mxu1 %v10219_v62  ;;  %v10279_v62 = vld [vmem:[#allocation2 + $0xb98] sm:$0xff]  }
 0x1b0   :  { %13133 = vmatprep.subr.bf16.mxu1 %v10252_v0  ;;  %4602 = vmatmul.mubr.f32.vlgmr.msra.gmra.mrb[18].mxu0 %v3210_v1  ;;  %v10288_v0 = vld [vmem:[#allocation2 + $0xbe0] sm:$0xff]  }
 0x1b1   :  { %13103 = vmatpush3.bf16.msra.mxu0 %v10228_v3  ;;  %4741 = vmatprep.mubr.f32.mxu0 %v3215_v7  ;;  %v10264_v1 = vld [vmem:[#allocation2 + $0xb20] sm:$0xff]   ;;  %v10273_v3 = vld [vmem:[#allocation2 + $0xb68] sm:$0xff]  }
 0x1b2   :  { %4672 = vmatmul.mubr.f32.vlgmr.msra.gmra.mrb[18].mxu1 %v3212_v2  ;;  %13105 = vmatprep.subr.bf16.mxu0 %v10237_v5  ;;  %v10280_v2 = vld [vmem:[#allocation2 + $0xba0] sm:$0xff]   ;;  %v10265_v5 = vld [vmem:[#allocation2 + $0xb28] sm:$0xff]  }
 0x1b3   :  { %13135 = vmatpush3.bf16.msra.mxu1 %v10244_v4  ;;  %4811 = vmatprep.mubr.f32.mxu1 %v3217_v8  ;;  %v10289_v4 = vld [vmem:[#allocation2 + $0xbe8] sm:$0xff]  }
 0x1b4   :  { %13137 = vmatprep.subr.bf16.mxu1 %v10253_v6  ;;  %v10281_v6 = vld [vmem:[#allocation2 + $0xba8] sm:$0xff]  }
 0x1b5   :  { %13107 = vmatpush3.bf16.msra.mxu0 %v10229_v9  ;;  %v10274_v9 = vld [vmem:[#allocation2 + $0xb70] sm:$0xff]  }
 0x1b6   :  { %13109 = vmatprep.subr.bf16.mxu0 %v10238_v11 }
 0x1b7   :  { %13139 = vmatpush3.bf16.msra.mxu1 %v10245_v10  ;;  %v10290_v10 = vld [vmem:[#allocation2 + $0xbf0] sm:$0xff]  }
 0x1b8   :  { %13141 = vmatprep.subr.bf16.mxu1 %v10254_v12 }
 0x1b9   :  { %13111 = vmatpush3.bf16.msra.mxu0 %v10230_v13 }
 0x1ba   :  { %13113 = vmatprep.subr.bf16.mxu0 %v10239_v15  ;;  %v10266_v15 = vld [vmem:[#allocation2 + $0xb30] sm:$0xff]  }
 0x1bb   :  { %13143 = vmatpush3.bf16.msra.mxu1 %v10246_v14 }
 0x1bc   :  { %13145 = vmatprep.subr.bf16.mxu1 %v10255_v16  ;;  %v10282_v16 = vld [vmem:[#allocation2 + $0xbb0] sm:$0xff]  }
 0x1bd   :  { %13115 = vmatpush3.bf16.msra.mxu0 %v10231_v17 }
 0x1be   :  { %13117 = vmatprep.subr.bf16.mxu0 %v10240_v19  ;;  %v10291_v19 = vld [vmem:[#allocation2 + $0xbf8] sm:$0xff]  }
 0x1bf   :  { %13147 = vmatpush3.bf16.msra.mxu1 %v10247_v18  ;;  %v10275_v18 = vld [vmem:[#allocation2 + $0xb78] sm:$0xff]  }
 0x1c0   :  { %13149 = vmatprep.subr.bf16.mxu1 %v10256_v20 }
 0x1c1   :  { %13119 = vmatpush3.bf16.msra.mxu0 %v10232_v21  ;;  %v10267_v21 = vld [vmem:[#allocation2 + $0xb38] sm:$0xff]  }
 0x1c2   :  { %13121 = vmatprep.subr.bf16.mxu0 %v10241_v23  ;;  %v10300_v23 = vld [vmem:[#allocation2 + $0xc40] sm:$0xff]  }
 0x1c3   :  { %13151 = vmatpush3.bf16.msra.mxu1 %v10248_v22  ;;  %v10918_v27 = vpop.f32.mrb[6].mxu0  ;;  %v10283_v22 = vld [vmem:[#allocation2 + $0xbb8] sm:$0xff]  }
 0x1c4   :  { %13153 = vmatprep.subr.bf16.mxu1 %v10257_v24  ;;  %v10919_v31 = vpop.f32.mrb[7].mxu0  ;;  %v10316_v24 = vld [vmem:[#allocation2 + $0xcc0] sm:$0xff]  }
 0x1c5   :  { %v10953_v28 = vpop.f32.mrb[6].mxu1  ;;  %v10920_v33 = vadd.f32 %v10919_v31, %v10918_v27  ;;  %13123 = vmatpush3.bf16.msra.mxu0 %v10233_v25  ;;  %v3218_v25 = vld [vmem:[%s14677_s0 + $0x160] sm:$0xff]  ;;  %v3223_v31 = vld [vmem:[%s14677_s0 + $0x188] sm:$0xff] }
 0x1c6   :  { %v10954_v32 = vpop.f32.mrb[7].mxu1  ;;  %13125 = vmatprep.subr.bf16.mxu0 %v10242_v29  ;;  %v10292_v27 = vld [vmem:[#allocation2 + $0xc00] sm:$0xff]   ;;  %v10301_v29 = vld [vmem:[#allocation2 + $0xc48] sm:$0xff]  }
 0x1c7   :  { %v10955_v34 = vadd.f32 %v10954_v32, %v10953_v28  ;;  %13155 = vmatpush3.bf16.msra.mxu1 %v10249_v26  ;;  %v3764_v37 = vadd.f32 %v10920_v33, %v14442_v60  ;;  %v10287_v60 = vld [vmem:[#allocation2 + $0xbd8] sm:$0xff]   ;;  %v3220_v26 = vld [vmem:[%s14677_s0 + $0x170] sm:$0xff]  ;;  %v10308_v28 = vld [vmem:[#allocation2 + $0xc80] sm:$0xff]  }
 0x1c8   :  { %13157 = vmatprep.subr.bf16.mxu1 %v10258_v30  ;;  %v10317_v30 = vld [vmem:[#allocation2 + $0xcc8] sm:$0xff]   ;;  %v3225_v32 = vld [vmem:[%s14677_s0 + $0x198] sm:$0xff] }
 0x1c9   :  { %v14457_v40 = vadd.f32 %v10955_v34, %v3764_v37  ;;  %13127 = vmatpush3.bf16.msra.mxu0 %v10234_v35  ;;  %v10293_v33 = vld [vmem:[#allocation2 + $0xc08] sm:$0xff]   ;;  %v10302_v35 = vld [vmem:[#allocation2 + $0xc50] sm:$0xff]  }
 0x1ca   :  { %13129 = vmatprep.subr.bf16.mxu0 %v10243_v38  ;;  %v10309_v34 = vld [vmem:[#allocation2 + $0xc88] sm:$0xff]   ;;  %v10294_v37 = vld [vmem:[#allocation2 + $0xc10] sm:$0xff]  }
 0x1cb   :  { %13159 = vmatpush3.bf16.msra.mxu1 %v10250_v36  ;;  %v10318_v36 = vld [vmem:[#allocation2 + $0xcd0] sm:$0xff]  }
 0x1cc   :  { %13161 = vmatprep.subr.bf16.mxu1 %v10259_v39  ;;  %v10310_v38 = vld [vmem:[#allocation2 + $0xc90] sm:$0xff]   ;;  %v10303_v39 = vld [vmem:[#allocation2 + $0xc58] sm:$0xff]  }
 0x1cd   :  { %13131 = vmatpush3.bf16.msra.mxu0 %v10235_v41  ;;  %v10295_v41 = vld [vmem:[#allocation2 + $0xc18] sm:$0xff]  }
 0x1ce   :  { %13165 = vmatprep.subr.bf16.mxu0 %v10268_v43  ;;  %v10304_v43 = vld [vmem:[#allocation2 + $0xc60] sm:$0xff]  }
 0x1cf   :  { %13163 = vmatpush3.bf16.msra.mxu1 %v10251_v42  ;;  %v10311_v42 = vld [vmem:[#allocation2 + $0xc98] sm:$0xff]  }
 0x1d0   :  { %13197 = vmatprep.subr.bf16.mxu1 %v10284_v44  ;;  %4742 = vmatmul.mubr.f32.vlgmr.msra.gmra.mrb[20].mxu0 %v3214_v45  ;;  %v10320_v44 = vld [vmem:[#allocation2 + $0xce0] sm:$0xff]  }
 0x1d1   :  { %13167 = vmatpush3.bf16.msra.mxu0 %v10260_v47  ;;  %4881 = vmatprep.mubr.f32.mxu0 %v3219_v51  ;;  %v10296_v45 = vld [vmem:[#allocation2 + $0xc20] sm:$0xff]   ;;  %v10305_v47 = vld [vmem:[#allocation2 + $0xc68] sm:$0xff]  }
 0x1d2   :  { %4812 = vmatmul.mubr.f32.vlgmr.msra.gmra.mrb[20].mxu1 %v3216_v46  ;;  %13169 = vmatprep.subr.bf16.mxu0 %v10269_v49  ;;  %v10312_v46 = vld [vmem:[#allocation2 + $0xca0] sm:$0xff]   ;;  %v10297_v49 = vld [vmem:[#allocation2 + $0xc28] sm:$0xff]  }
 0x1d3   :  { %13199 = vmatpush3.bf16.msra.mxu1 %v10276_v48  ;;  %4951 = vmatprep.mubr.f32.mxu1 %v3221_v52  ;;  %v10321_v48 = vld [vmem:[#allocation2 + $0xce8] sm:$0xff]  }
 0x1d4   :  { %13201 = vmatprep.subr.bf16.mxu1 %v10285_v50  ;;  %v10313_v50 = vld [vmem:[#allocation2 + $0xca8] sm:$0xff]  }
 0x1d5   :  { %13171 = vmatpush3.bf16.msra.mxu0 %v10261_v53  ;;  %v10306_v53 = vld [vmem:[#allocation2 + $0xc70] sm:$0xff]  }
 0x1d6   :  { %13173 = vmatprep.subr.bf16.mxu0 %v10270_v55 }
 0x1d7   :  { %13203 = vmatpush3.bf16.msra.mxu1 %v10277_v54  ;;  %v10322_v54 = vld [vmem:[#allocation2 + $0xcf0] sm:$0xff]  }
 0x1d8   :  { %13205 = vmatprep.subr.bf16.mxu1 %v10286_v56 }
 0x1d9   :  { %13175 = vmatpush3.bf16.msra.mxu0 %v10262_v57 }
 0x1da   :  { %13177 = vmatprep.subr.bf16.mxu0 %v10271_v59  ;;  %v10298_v59 = vld [vmem:[#allocation2 + $0xc30] sm:$0xff]  }
 0x1db   :  { %13207 = vmatpush3.bf16.msra.mxu1 %v10278_v58 }
 0x1dc   :  { %13209 = vmatprep.subr.bf16.mxu1 %v10287_v60  ;;  %v10314_v60 = vld [vmem:[#allocation2 + $0xcb0] sm:$0xff]  }
 0x1dd   :  { %13179 = vmatpush3.bf16.msra.mxu0 %v10263_v61 }
 0x1de   :  { %13181 = vmatprep.subr.bf16.mxu0 %v10272_v63  ;;  %v10323_v63 = vld [vmem:[#allocation2 + $0xcf8] sm:$0xff]  }
 0x1df   :  { %13211 = vmatpush3.bf16.msra.mxu1 %v10279_v62  ;;  %v10307_v62 = vld [vmem:[#allocation2 + $0xc78] sm:$0xff]  }
 0x1e0   :  { %13213 = vmatprep.subr.bf16.mxu1 %v10288_v0 }
 0x1e1   :  { %13183 = vmatpush3.bf16.msra.mxu0 %v10264_v1  ;;  %v10299_v1 = vld [vmem:[#allocation2 + $0xc38] sm:$0xff]  }
 0x1e2   :  { %13185 = vmatprep.subr.bf16.mxu0 %v10273_v3  ;;  %v10332_v3 = vld [vmem:[#allocation2 + $0xd40] sm:$0xff]  }
 0x1e3   :  { %13215 = vmatpush3.bf16.msra.mxu1 %v10280_v2  ;;  %v10988_v7 = vpop.f32.mrb[8].mxu0  ;;  %v10315_v2 = vld [vmem:[#allocation2 + $0xcb8] sm:$0xff]  }
 0x1e4   :  { %13217 = vmatprep.subr.bf16.mxu1 %v10289_v4  ;;  %v10989_v11 = vpop.f32.mrb[9].mxu0  ;;  %v10348_v4 = vld [vmem:[#allocation2 + $0xdc0] sm:$0xff]  }
 0x1e5   :  { %v11023_v8 = vpop.f32.mrb[8].mxu1  ;;  %v10990_v13 = vadd.f32 %v10989_v11, %v10988_v7  ;;  %13187 = vmatpush3.bf16.msra.mxu0 %v10265_v5  ;;  %v3222_v5 = vld [vmem:[%s14677_s0 + $0x180] sm:$0xff]  ;;  %v3227_v11 = vld [vmem:[%s14677_s0 + $0x1a8] sm:$0xff] }
 0x1e6   :  { %v11024_v12 = vpop.f32.mrb[9].mxu1  ;;  %13189 = vmatprep.subr.bf16.mxu0 %v10274_v9  ;;  %v10324_v7 = vld [vmem:[#allocation2 + $0xd00] sm:$0xff]   ;;  %v10333_v9 = vld [vmem:[#allocation2 + $0xd48] sm:$0xff]  }
 0x1e7   :  { %v11025_v14 = vadd.f32 %v11024_v12, %v11023_v8  ;;  %13219 = vmatpush3.bf16.msra.mxu1 %v10281_v6  ;;  %v3904_v17 = vadd.f32 %v10990_v13, %v14457_v40  ;;  %v10319_v40 = vld [vmem:[#allocation2 + $0xcd8] sm:$0xff]   ;;  %v3224_v6 = vld [vmem:[%s14677_s0 + $0x190] sm:$0xff]  ;;  %v10340_v8 = vld [vmem:[#allocation2 + $0xd80] sm:$0xff]  }
 0x1e8   :  { %13221 = vmatprep.subr.bf16.mxu1 %v10290_v10  ;;  %v10349_v10 = vld [vmem:[#allocation2 + $0xdc8] sm:$0xff]   ;;  %v3229_v12 = vld [vmem:[%s14677_s0 + $0x1b8] sm:$0xff] }
 0x1e9   :  { %v14472_v20 = vadd.f32 %v11025_v14, %v3904_v17  ;;  %13191 = vmatpush3.bf16.msra.mxu0 %v10266_v15  ;;  %v10325_v13 = vld [vmem:[#allocation2 + $0xd08] sm:$0xff]   ;;  %v10334_v15 = vld [vmem:[#allocation2 + $0xd50] sm:$0xff]  }
 0x1ea   :  { %13193 = vmatprep.subr.bf16.mxu0 %v10275_v18  ;;  %v10341_v14 = vld [vmem:[#allocation2 + $0xd88] sm:$0xff]   ;;  %v10326_v17 = vld [vmem:[#allocation2 + $0xd10] sm:$0xff]  }
 0x1eb   :  { %13223 = vmatpush3.bf16.msra.mxu1 %v10282_v16  ;;  %v10350_v16 = vld [vmem:[#allocation2 + $0xdd0] sm:$0xff]  }
 0x1ec   :  { %13225 = vmatprep.subr.bf16.mxu1 %v10291_v19  ;;  %v10342_v18 = vld [vmem:[#allocation2 + $0xd90] sm:$0xff]   ;;  %v10335_v19 = vld [vmem:[#allocation2 + $0xd58] sm:$0xff]  }
 0x1ed   :  { %13195 = vmatpush3.bf16.msra.mxu0 %v10267_v21  ;;  %v10327_v21 = vld [vmem:[#allocation2 + $0xd18] sm:$0xff]  }
 0x1ee   :  { %13229 = vmatprep.subr.bf16.mxu0 %v10300_v23  ;;  %v10336_v23 = vld [vmem:[#allocation2 + $0xd60] sm:$0xff]  }
 0x1ef   :  { %13227 = vmatpush3.bf16.msra.mxu1 %v10283_v22  ;;  %v10343_v22 = vld [vmem:[#allocation2 + $0xd98] sm:$0xff]  }
 0x1f0   :  { %13261 = vmatprep.subr.bf16.mxu1 %v10316_v24  ;;  %4882 = vmatmul.mubr.f32.vlgmr.msra.gmra.mrb[22].mxu0 %v3218_v25  ;;  %v10352_v24 = vld [vmem:[#allocation2 + $0xde0] sm:$0xff]  }
 0x1f1   :  { %13231 = vmatpush3.bf16.msra.mxu0 %v10292_v27  ;;  %5021 = vmatprep.mubr.f32.mxu0 %v3223_v31  ;;  %v10328_v25 = vld [vmem:[#allocation2 + $0xd20] sm:$0xff]   ;;  %v10337_v27 = vld [vmem:[#allocation2 + $0xd68] sm:$0xff]  }
 0x1f2   :  { %4952 = vmatmul.mubr.f32.vlgmr.msra.gmra.mrb[22].mxu1 %v3220_v26  ;;  %13233 = vmatprep.subr.bf16.mxu0 %v10301_v29  ;;  %v10344_v26 = vld [vmem:[#allocation2 + $0xda0] sm:$0xff]   ;;  %v10329_v29 = vld [vmem:[#allocation2 + $0xd28] sm:$0xff]  }
 0x1f3   :  { %13263 = vmatpush3.bf16.msra.mxu1 %v10308_v28  ;;  %5091 = vmatprep.mubr.f32.mxu1 %v3225_v32  ;;  %v10353_v28 = vld [vmem:[#allocation2 + $0xde8] sm:$0xff]  }
 0x1f4   :  { %13265 = vmatprep.subr.bf16.mxu1 %v10317_v30  ;;  %v10345_v30 = vld [vmem:[#allocation2 + $0xda8] sm:$0xff]  }
 0x1f5   :  { %13235 = vmatpush3.bf16.msra.mxu0 %v10293_v33  ;;  %v10338_v33 = vld [vmem:[#allocation2 + $0xd70] sm:$0xff]  }
 0x1f6   :  { %13237 = vmatprep.subr.bf16.mxu0 %v10302_v35 }
 0x1f7   :  { %13267 = vmatpush3.bf16.msra.mxu1 %v10309_v34  ;;  %v10354_v34 = vld [vmem:[#allocation2 + $0xdf0] sm:$0xff]  }
 0x1f8   :  { %13269 = vmatprep.subr.bf16.mxu1 %v10318_v36 }
 0x1f9   :  { %13239 = vmatpush3.bf16.msra.mxu0 %v10294_v37 }
 0x1fa   :  { %13241 = vmatprep.subr.bf16.mxu0 %v10303_v39  ;;  %v10330_v39 = vld [vmem:[#allocation2 + $0xd30] sm:$0xff]  }
 0x1fb   :  { %13271 = vmatpush3.bf16.msra.mxu1 %v10310_v38 }
 0x1fc   :  { %13273 = vmatprep.subr.bf16.mxu1 %v10319_v40  ;;  %v10346_v40 = vld [vmem:[#allocation2 + $0xdb0] sm:$0xff]  }
 0x1fd   :  { %13243 = vmatpush3.bf16.msra.mxu0 %v10295_v41 }
 0x1fe   :  { %13245 = vmatprep.subr.bf16.mxu0 %v10304_v43  ;;  %v10355_v43 = vld [vmem:[#allocation2 + $0xdf8] sm:$0xff]  }
 0x1ff   :  { %13275 = vmatpush3.bf16.msra.mxu1 %v10311_v42  ;;  %v10339_v42 = vld [vmem:[#allocation2 + $0xd78] sm:$0xff]  }
 0x200   :  { %13277 = vmatprep.subr.bf16.mxu1 %v10320_v44 }
 0x201   :  { %13247 = vmatpush3.bf16.msra.mxu0 %v10296_v45  ;;  %v10331_v45 = vld [vmem:[#allocation2 + $0xd38] sm:$0xff]  }
 0x202   :  { %13249 = vmatprep.subr.bf16.mxu0 %v10305_v47  ;;  %v10364_v47 = vld [vmem:[#allocation2 + $0xe40] sm:$0xff]  }
 0x203   :  { %13279 = vmatpush3.bf16.msra.mxu1 %v10312_v46  ;;  %v11058_v51 = vpop.f32.mrb[10].mxu0  ;;  %v10347_v46 = vld [vmem:[#allocation2 + $0xdb8] sm:$0xff]  }
 0x204   :  { %13281 = vmatprep.subr.bf16.mxu1 %v10321_v48  ;;  %v11059_v55 = vpop.f32.mrb[11].mxu0  ;;  %v10380_v48 = vld [vmem:[#allocation2 + $0xec0] sm:$0xff]  }
 0x205   :  { %v11093_v52 = vpop.f32.mrb[10].mxu1  ;;  %v11060_v57 = vadd.f32 %v11059_v55, %v11058_v51  ;;  %13251 = vmatpush3.bf16.msra.mxu0 %v10297_v49  ;;  %v3226_v49 = vld [vmem:[%s14677_s0 + $0x1a0] sm:$0xff]  ;;  %v3231_v55 = vld [vmem:[%s14677_s0 + $0x1c8] sm:$0xff] }
 0x206   :  { %v11094_v56 = vpop.f32.mrb[11].mxu1  ;;  %13253 = vmatprep.subr.bf16.mxu0 %v10306_v53  ;;  %v10356_v51 = vld [vmem:[#allocation2 + $0xe00] sm:$0xff]   ;;  %v10365_v53 = vld [vmem:[#allocation2 + $0xe48] sm:$0xff]  }
 0x207   :  { %v11095_v58 = vadd.f32 %v11094_v56, %v11093_v52  ;;  %13283 = vmatpush3.bf16.msra.mxu1 %v10313_v50  ;;  %v4044_v61 = vadd.f32 %v11060_v57, %v14472_v20  ;;  %v10351_v20 = vld [vmem:[#allocation2 + $0xdd8] sm:$0xff]   ;;  %v3228_v50 = vld [vmem:[%s14677_s0 + $0x1b0] sm:$0xff]  ;;  %v10372_v52 = vld [vmem:[#allocation2 + $0xe80] sm:$0xff]  }
 0x208   :  { %13285 = vmatprep.subr.bf16.mxu1 %v10322_v54  ;;  %v10381_v54 = vld [vmem:[#allocation2 + $0xec8] sm:$0xff]   ;;  %v3233_v56 = vld [vmem:[%s14677_s0 + $0x1d8] sm:$0xff] }
 0x209   :  { %v14487_v0 = vadd.f32 %v11095_v58, %v4044_v61  ;;  %13255 = vmatpush3.bf16.msra.mxu0 %v10298_v59  ;;  %v10357_v57 = vld [vmem:[#allocation2 + $0xe08] sm:$0xff]   ;;  %v10366_v59 = vld [vmem:[#allocation2 + $0xe50] sm:$0xff]  }
 0x20a   :  { %13257 = vmatprep.subr.bf16.mxu0 %v10307_v62  ;;  %v10373_v58 = vld [vmem:[#allocation2 + $0xe88] sm:$0xff]   ;;  %v10358_v61 = vld [vmem:[#allocation2 + $0xe10] sm:$0xff]  }
 0x20b   :  { %13287 = vmatpush3.bf16.msra.mxu1 %v10314_v60  ;;  %v10382_v60 = vld [vmem:[#allocation2 + $0xed0] sm:$0xff]  }
 0x20c   :  { %13289 = vmatprep.subr.bf16.mxu1 %v10323_v63  ;;  %v10374_v62 = vld [vmem:[#allocation2 + $0xe90] sm:$0xff]   ;;  %v10367_v63 = vld [vmem:[#allocation2 + $0xe58] sm:$0xff]  }
 0x20d   :  { %13259 = vmatpush3.bf16.msra.mxu0 %v10299_v1  ;;  %v10359_v1 = vld [vmem:[#allocation2 + $0xe18] sm:$0xff]  }
 0x20e   :  { %13293 = vmatprep.subr.bf16.mxu0 %v10332_v3  ;;  %v10368_v3 = vld [vmem:[#allocation2 + $0xe60] sm:$0xff]  }
 0x20f   :  { %13291 = vmatpush3.bf16.msra.mxu1 %v10315_v2  ;;  %v10375_v2 = vld [vmem:[#allocation2 + $0xe98] sm:$0xff]  }
 0x210   :  { %13325 = vmatprep.subr.bf16.mxu1 %v10348_v4  ;;  %5022 = vmatmul.mubr.f32.vlgmr.msra.gmra.mrb[24].mxu0 %v3222_v5  ;;  %v10384_v4 = vld [vmem:[#allocation2 + $0xee0] sm:$0xff]  }
 0x211   :  { %13295 = vmatpush3.bf16.msra.mxu0 %v10324_v7  ;;  %5161 = vmatprep.mubr.f32.mxu0 %v3227_v11  ;;  %v10360_v5 = vld [vmem:[#allocation2 + $0xe20] sm:$0xff]   ;;  %v10369_v7 = vld [vmem:[#allocation2 + $0xe68] sm:$0xff]  }
 0x212   :  { %5092 = vmatmul.mubr.f32.vlgmr.msra.gmra.mrb[24].mxu1 %v3224_v6  ;;  %13297 = vmatprep.subr.bf16.mxu0 %v10333_v9  ;;  %v10376_v6 = vld [vmem:[#allocation2 + $0xea0] sm:$0xff]   ;;  %v10361_v9 = vld [vmem:[#allocation2 + $0xe28] sm:$0xff]  }
 0x213   :  { %13327 = vmatpush3.bf16.msra.mxu1 %v10340_v8  ;;  %5231 = vmatprep.mubr.f32.mxu1 %v3229_v12  ;;  %v10385_v8 = vld [vmem:[#allocation2 + $0xee8] sm:$0xff]  }
 0x214   :  { %13329 = vmatprep.subr.bf16.mxu1 %v10349_v10  ;;  %v10377_v10 = vld [vmem:[#allocation2 + $0xea8] sm:$0xff]  }
 0x215   :  { %13299 = vmatpush3.bf16.msra.mxu0 %v10325_v13  ;;  %v10370_v13 = vld [vmem:[#allocation2 + $0xe70] sm:$0xff]  }
 0x216   :  { %13301 = vmatprep.subr.bf16.mxu0 %v10334_v15 }
 0x217   :  { %13331 = vmatpush3.bf16.msra.mxu1 %v10341_v14  ;;  %v10386_v14 = vld [vmem:[#allocation2 + $0xef0] sm:$0xff]  }
 0x218   :  { %13333 = vmatprep.subr.bf16.mxu1 %v10350_v16 }
 0x219   :  { %13303 = vmatpush3.bf16.msra.mxu0 %v10326_v17 }
 0x21a   :  { %13305 = vmatprep.subr.bf16.mxu0 %v10335_v19  ;;  %v10362_v19 = vld [vmem:[#allocation2 + $0xe30] sm:$0xff]  }
 0x21b   :  { %13335 = vmatpush3.bf16.msra.mxu1 %v10342_v18 }
 0x21c   :  { %13337 = vmatprep.subr.bf16.mxu1 %v10351_v20  ;;  %v10378_v20 = vld [vmem:[#allocation2 + $0xeb0] sm:$0xff]  }
 0x21d   :  { %13307 = vmatpush3.bf16.msra.mxu0 %v10327_v21 }
 0x21e   :  { %13309 = vmatprep.subr.bf16.mxu0 %v10336_v23  ;;  %v10387_v23 = vld [vmem:[#allocation2 + $0xef8] sm:$0xff]  }
 0x21f   :  { %13339 = vmatpush3.bf16.msra.mxu1 %v10343_v22  ;;  %v10371_v22 = vld [vmem:[#allocation2 + $0xe78] sm:$0xff]  }
 0x220   :  { %13341 = vmatprep.subr.bf16.mxu1 %v10352_v24 }
 0x221   :  { %13311 = vmatpush3.bf16.msra.mxu0 %v10328_v25  ;;  %v10363_v25 = vld [vmem:[#allocation2 + $0xe38] sm:$0xff]  }
 0x222   :  { %13313 = vmatprep.subr.bf16.mxu0 %v10337_v27  ;;  %v10396_v27 = vld [vmem:[#allocation2 + $0xf40] sm:$0xff]  }
 0x223   :  { %13343 = vmatpush3.bf16.msra.mxu1 %v10344_v26  ;;  %v11128_v31 = vpop.f32.mrb[12].mxu0  ;;  %v10379_v26 = vld [vmem:[#allocation2 + $0xeb8] sm:$0xff]  }
 0x224   :  { %13345 = vmatprep.subr.bf16.mxu1 %v10353_v28  ;;  %v11129_v35 = vpop.f32.mrb[13].mxu0  ;;  %v10412_v28 = vld [vmem:[#allocation2 + $0xfc0] sm:$0xff]  }
 0x225   :  { %v11163_v32 = vpop.f32.mrb[12].mxu1  ;;  %v11130_v37 = vadd.f32 %v11129_v35, %v11128_v31  ;;  %13315 = vmatpush3.bf16.msra.mxu0 %v10329_v29  ;;  %v3230_v29 = vld [vmem:[%s14677_s0 + $0x1c0] sm:$0xff]  ;;  %v3235_v35 = vld [vmem:[%s14677_s0 + $0x1e8] sm:$0xff] }
 0x226   :  { %v11164_v36 = vpop.f32.mrb[13].mxu1  ;;  %13317 = vmatprep.subr.bf16.mxu0 %v10338_v33  ;;  %v10388_v31 = vld [vmem:[#allocation2 + $0xf00] sm:$0xff]   ;;  %v10397_v33 = vld [vmem:[#allocation2 + $0xf48] sm:$0xff]  }
 0x227   :  { %v11165_v38 = vadd.f32 %v11164_v36, %v11163_v32  ;;  %13347 = vmatpush3.bf16.msra.mxu1 %v10345_v30  ;;  %v4184_v41 = vadd.f32 %v11130_v37, %v14487_v0  ;;  %v10383_v0 = vld [vmem:[#allocation2 + $0xed8] sm:$0xff]   ;;  %v3232_v30 = vld [vmem:[%s14677_s0 + $0x1d0] sm:$0xff]  ;;  %v10404_v32 = vld [vmem:[#allocation2 + $0xf80] sm:$0xff]  }
 0x228   :  { %13349 = vmatprep.subr.bf16.mxu1 %v10354_v34  ;;  %v10413_v34 = vld [vmem:[#allocation2 + $0xfc8] sm:$0xff]   ;;  %v3237_v36 = vld [vmem:[%s14677_s0 + $0x1f8] sm:$0xff] }
 0x229   :  { %v14502_v44 = vadd.f32 %v11165_v38, %v4184_v41  ;;  %13319 = vmatpush3.bf16.msra.mxu0 %v10330_v39  ;;  %v10389_v37 = vld [vmem:[#allocation2 + $0xf08] sm:$0xff]   ;;  %v10398_v39 = vld [vmem:[#allocation2 + $0xf50] sm:$0xff]  }
 0x22a   :  { %13321 = vmatprep.subr.bf16.mxu0 %v10339_v42  ;;  %v10405_v38 = vld [vmem:[#allocation2 + $0xf88] sm:$0xff]   ;;  %v10390_v41 = vld [vmem:[#allocation2 + $0xf10] sm:$0xff]  }
 0x22b   :  { %13351 = vmatpush3.bf16.msra.mxu1 %v10346_v40  ;;  %v10414_v40 = vld [vmem:[#allocation2 + $0xfd0] sm:$0xff]  }
 0x22c   :  { %13353 = vmatprep.subr.bf16.mxu1 %v10355_v43  ;;  %v10406_v42 = vld [vmem:[#allocation2 + $0xf90] sm:$0xff]   ;;  %v10399_v43 = vld [vmem:[#allocation2 + $0xf58] sm:$0xff]  }
 0x22d   :  { %13323 = vmatpush3.bf16.msra.mxu0 %v10331_v45  ;;  %v10391_v45 = vld [vmem:[#allocation2 + $0xf18] sm:$0xff]  }
 0x22e   :  { %13357 = vmatprep.subr.bf16.mxu0 %v10364_v47  ;;  %v10400_v47 = vld [vmem:[#allocation2 + $0xf60] sm:$0xff]  }
 0x22f   :  { %13355 = vmatpush3.bf16.msra.mxu1 %v10347_v46  ;;  %v10407_v46 = vld [vmem:[#allocation2 + $0xf98] sm:$0xff]  }
 0x230   :  { %13389 = vmatprep.subr.bf16.mxu1 %v10380_v48  ;;  %5162 = vmatmul.mubr.f32.vlgmr.msra.gmra.mrb[26].mxu0 %v3226_v49  ;;  %v10416_v48 = vld [vmem:[#allocation2 + $0xfe0] sm:$0xff]  }
 0x231   :  { %13359 = vmatpush3.bf16.msra.mxu0 %v10356_v51  ;;  %5301 = vmatprep.mubr.f32.mxu0 %v3231_v55  ;;  %v10392_v49 = vld [vmem:[#allocation2 + $0xf20] sm:$0xff]   ;;  %v10401_v51 = vld [vmem:[#allocation2 + $0xf68] sm:$0xff]  }
 0x232   :  { %5232 = vmatmul.mubr.f32.vlgmr.msra.gmra.mrb[26].mxu1 %v3228_v50  ;;  %13361 = vmatprep.subr.bf16.mxu0 %v10365_v53  ;;  %v10408_v50 = vld [vmem:[#allocation2 + $0xfa0] sm:$0xff]   ;;  %v10393_v53 = vld [vmem:[#allocation2 + $0xf28] sm:$0xff]  }
 0x233   :  { %13391 = vmatpush3.bf16.msra.mxu1 %v10372_v52  ;;  %5371 = vmatprep.mubr.f32.mxu1 %v3233_v56  ;;  %v10417_v52 = vld [vmem:[#allocation2 + $0xfe8] sm:$0xff]  }
 0x234   :  { %13393 = vmatprep.subr.bf16.mxu1 %v10381_v54  ;;  %v10409_v54 = vld [vmem:[#allocation2 + $0xfa8] sm:$0xff]  }
 0x235   :  { %13363 = vmatpush3.bf16.msra.mxu0 %v10357_v57  ;;  %v10402_v57 = vld [vmem:[#allocation2 + $0xf70] sm:$0xff]  }
 0x236   :  { %13365 = vmatprep.subr.bf16.mxu0 %v10366_v59 }
 0x237   :  { %13395 = vmatpush3.bf16.msra.mxu1 %v10373_v58  ;;  %v10418_v58 = vld [vmem:[#allocation2 + $0xff0] sm:$0xff]  }
 0x238   :  { %13397 = vmatprep.subr.bf16.mxu1 %v10382_v60 }
 0x239   :  { %13367 = vmatpush3.bf16.msra.mxu0 %v10358_v61 }
 0x23a   :  { %13369 = vmatprep.subr.bf16.mxu0 %v10367_v63  ;;  %v10394_v63 = vld [vmem:[#allocation2 + $0xf30] sm:$0xff]  }
 0x23b   :  { %13399 = vmatpush3.bf16.msra.mxu1 %v10374_v62 }
 0x23c   :  { %13401 = vmatprep.subr.bf16.mxu1 %v10383_v0  ;;  %v10410_v0 = vld [vmem:[#allocation2 + $0xfb0] sm:$0xff]  }
 0x23d   :  { %13371 = vmatpush3.bf16.msra.mxu0 %v10359_v1 }
 0x23e   :  { %13373 = vmatprep.subr.bf16.mxu0 %v10368_v3  ;;  %v10419_v3 = vld [vmem:[#allocation2 + $0xff8] sm:$0xff]  }
 0x23f   :  { %13403 = vmatpush3.bf16.msra.mxu1 %v10375_v2  ;;  %v10403_v2 = vld [vmem:[#allocation2 + $0xf78] sm:$0xff]  }
 0x240   :  { %13405 = vmatprep.subr.bf16.mxu1 %v10384_v4 }
 0x241   :  { %13375 = vmatpush3.bf16.msra.mxu0 %v10360_v5  ;;  %v10395_v5 = vld [vmem:[#allocation2 + $0xf38] sm:$0xff]  }
 0x242   :  { %13377 = vmatprep.subr.bf16.mxu0 %v10369_v7  ;;  %v10428_v7 = vld [vmem:[#allocation2 + $0x1040] sm:$0xff]  }
 0x243   :  { %13407 = vmatpush3.bf16.msra.mxu1 %v10376_v6  ;;  %v11198_v11 = vpop.f32.mrb[14].mxu0  ;;  %v10411_v6 = vld [vmem:[#allocation2 + $0xfb8] sm:$0xff]  }
 0x244   :  { %13409 = vmatprep.subr.bf16.mxu1 %v10385_v8  ;;  %v11199_v15 = vpop.f32.mrb[15].mxu0  ;;  %v10444_v8 = vld [vmem:[#allocation2 + $0x10c0] sm:$0xff]  }
 0x245   :  { %v11233_v12 = vpop.f32.mrb[14].mxu1  ;;  %v11200_v17 = vadd.f32 %v11199_v15, %v11198_v11  ;;  %13379 = vmatpush3.bf16.msra.mxu0 %v10361_v9  ;;  %v3234_v9 = vld [vmem:[%s14677_s0 + $0x1e0] sm:$0xff]  ;;  %v3239_v15 = vld [vmem:[%s14677_s0 + $0x208] sm:$0xff] }
 0x246   :  { %v11234_v16 = vpop.f32.mrb[15].mxu1  ;;  %13381 = vmatprep.subr.bf16.mxu0 %v10370_v13  ;;  %v10420_v11 = vld [vmem:[#allocation2 + $0x1000] sm:$0xff]   ;;  %v10429_v13 = vld [vmem:[#allocation2 + $0x1048] sm:$0xff]  }
 0x247   :  { %v11235_v18 = vadd.f32 %v11234_v16, %v11233_v12  ;;  %13411 = vmatpush3.bf16.msra.mxu1 %v10377_v10  ;;  %v4324_v21 = vadd.f32 %v11200_v17, %v14502_v44  ;;  %v10415_v44 = vld [vmem:[#allocation2 + $0xfd8] sm:$0xff]   ;;  %v3236_v10 = vld [vmem:[%s14677_s0 + $0x1f0] sm:$0xff]  ;;  %v10436_v12 = vld [vmem:[#allocation2 + $0x1080] sm:$0xff]  }
 0x248   :  { %13413 = vmatprep.subr.bf16.mxu1 %v10386_v14  ;;  %v10445_v14 = vld [vmem:[#allocation2 + $0x10c8] sm:$0xff]   ;;  %v3241_v16 = vld [vmem:[%s14677_s0 + $0x218] sm:$0xff] }
 0x249   :  { %v14517_v24 = vadd.f32 %v11235_v18, %v4324_v21  ;;  %13383 = vmatpush3.bf16.msra.mxu0 %v10362_v19  ;;  %v10421_v17 = vld [vmem:[#allocation2 + $0x1008] sm:$0xff]   ;;  %v10430_v19 = vld [vmem:[#allocation2 + $0x1050] sm:$0xff]  }
 0x24a   :  { %13385 = vmatprep.subr.bf16.mxu0 %v10371_v22  ;;  %v10437_v18 = vld [vmem:[#allocation2 + $0x1088] sm:$0xff]   ;;  %v10422_v21 = vld [vmem:[#allocation2 + $0x1010] sm:$0xff]  }
 0x24b   :  { %13415 = vmatpush3.bf16.msra.mxu1 %v10378_v20  ;;  %v10446_v20 = vld [vmem:[#allocation2 + $0x10d0] sm:$0xff]  }
 0x24c   :  { %13417 = vmatprep.subr.bf16.mxu1 %v10387_v23  ;;  %v10438_v22 = vld [vmem:[#allocation2 + $0x1090] sm:$0xff]   ;;  %v10431_v23 = vld [vmem:[#allocation2 + $0x1058] sm:$0xff]  }
 0x24d   :  { %13387 = vmatpush3.bf16.msra.mxu0 %v10363_v25  ;;  %v10423_v25 = vld [vmem:[#allocation2 + $0x1018] sm:$0xff]  }
 0x24e   :  { %13421 = vmatprep.subr.bf16.mxu0 %v10396_v27  ;;  %v10432_v27 = vld [vmem:[#allocation2 + $0x1060] sm:$0xff]  }
 0x24f   :  { %13419 = vmatpush3.bf16.msra.mxu1 %v10379_v26  ;;  %v10439_v26 = vld [vmem:[#allocation2 + $0x1098] sm:$0xff]  }
 0x250   :  { %13453 = vmatprep.subr.bf16.mxu1 %v10412_v28  ;;  %5302 = vmatmul.mubr.f32.vlgmr.msra.gmra.mrb[28].mxu0 %v3230_v29  ;;  %v10448_v28 = vld [vmem:[#allocation2 + $0x10e0] sm:$0xff]  }
 0x251   :  { %13423 = vmatpush3.bf16.msra.mxu0 %v10388_v31  ;;  %5441 = vmatprep.mubr.f32.mxu0 %v3235_v35  ;;  %v10424_v29 = vld [vmem:[#allocation2 + $0x1020] sm:$0xff]   ;;  %v10433_v31 = vld [vmem:[#allocation2 + $0x1068] sm:$0xff]  }
 0x252   :  { %5372 = vmatmul.mubr.f32.vlgmr.msra.gmra.mrb[28].mxu1 %v3232_v30  ;;  %13425 = vmatprep.subr.bf16.mxu0 %v10397_v33  ;;  %v10440_v30 = vld [vmem:[#allocation2 + $0x10a0] sm:$0xff]   ;;  %v10425_v33 = vld [vmem:[#allocation2 + $0x1028] sm:$0xff]  }
 0x253   :  { %13455 = vmatpush3.bf16.msra.mxu1 %v10404_v32  ;;  %5511 = vmatprep.mubr.f32.mxu1 %v3237_v36  ;;  %v10449_v32 = vld [vmem:[#allocation2 + $0x10e8] sm:$0xff]  }
 0x254   :  { %13457 = vmatprep.subr.bf16.mxu1 %v10413_v34  ;;  %v10441_v34 = vld [vmem:[#allocation2 + $0x10a8] sm:$0xff]  }
 0x255   :  { %13427 = vmatpush3.bf16.msra.mxu0 %v10389_v37  ;;  %v10434_v37 = vld [vmem:[#allocation2 + $0x1070] sm:$0xff]  }
 0x256   :  { %13429 = vmatprep.subr.bf16.mxu0 %v10398_v39 }
 0x257   :  { %13459 = vmatpush3.bf16.msra.mxu1 %v10405_v38  ;;  %v10450_v38 = vld [vmem:[#allocation2 + $0x10f0] sm:$0xff]  }
 0x258   :  { %13461 = vmatprep.subr.bf16.mxu1 %v10414_v40 }
 0x259   :  { %13431 = vmatpush3.bf16.msra.mxu0 %v10390_v41 }
 0x25a   :  { %13433 = vmatprep.subr.bf16.mxu0 %v10399_v43  ;;  %v10426_v43 = vld [vmem:[#allocation2 + $0x1030] sm:$0xff]  }
 0x25b   :  { %13463 = vmatpush3.bf16.msra.mxu1 %v10406_v42 }
 0x25c   :  { %13465 = vmatprep.subr.bf16.mxu1 %v10415_v44  ;;  %v10442_v44 = vld [vmem:[#allocation2 + $0x10b0] sm:$0xff]  }
 0x25d   :  { %13435 = vmatpush3.bf16.msra.mxu0 %v10391_v45 }
 0x25e   :  { %13437 = vmatprep.subr.bf16.mxu0 %v10400_v47  ;;  %v10451_v47 = vld [vmem:[#allocation2 + $0x10f8] sm:$0xff]  }
 0x25f   :  { %13467 = vmatpush3.bf16.msra.mxu1 %v10407_v46  ;;  %v10435_v46 = vld [vmem:[#allocation2 + $0x1078] sm:$0xff]  }
 0x260   :  { %13469 = vmatprep.subr.bf16.mxu1 %v10416_v48 }
 0x261   :  { %13439 = vmatpush3.bf16.msra.mxu0 %v10392_v49  ;;  %v10427_v49 = vld [vmem:[#allocation2 + $0x1038] sm:$0xff]  }
 0x262   :  { %13441 = vmatprep.subr.bf16.mxu0 %v10401_v51  ;;  %v10460_v51 = vld [vmem:[#allocation2 + $0x1140] sm:$0xff]  }
 0x263   :  { %13471 = vmatpush3.bf16.msra.mxu1 %v10408_v50  ;;  %v11268_v55 = vpop.f32.mrb[16].mxu0  ;;  %v10443_v50 = vld [vmem:[#allocation2 + $0x10b8] sm:$0xff]  }
 0x264   :  { %13473 = vmatprep.subr.bf16.mxu1 %v10417_v52  ;;  %v11269_v59 = vpop.f32.mrb[17].mxu0  ;;  %v10476_v52 = vld [vmem:[#allocation2 + $0x11c0] sm:$0xff]  }
 0x265   :  { %v11303_v56 = vpop.f32.mrb[16].mxu1  ;;  %v11270_v61 = vadd.f32 %v11269_v59, %v11268_v55  ;;  %13443 = vmatpush3.bf16.msra.mxu0 %v10393_v53  ;;  %v3238_v53 = vld [vmem:[%s14677_s0 + $0x200] sm:$0xff]  ;;  %v3243_v59 = vld [vmem:[%s14677_s0 + $0x228] sm:$0xff] }
 0x266   :  { %v11304_v60 = vpop.f32.mrb[17].mxu1  ;;  %13445 = vmatprep.subr.bf16.mxu0 %v10402_v57  ;;  %v10452_v55 = vld [vmem:[#allocation2 + $0x1100] sm:$0xff]   ;;  %v10461_v57 = vld [vmem:[#allocation2 + $0x1148] sm:$0xff]  }
 0x267   :  { %v11305_v62 = vadd.f32 %v11304_v60, %v11303_v56  ;;  %13475 = vmatpush3.bf16.msra.mxu1 %v10409_v54  ;;  %v4464_v1 = vadd.f32 %v11270_v61, %v14517_v24  ;;  %v10447_v24 = vld [vmem:[#allocation2 + $0x10d8] sm:$0xff]   ;;  %v3240_v54 = vld [vmem:[%s14677_s0 + $0x210] sm:$0xff]  ;;  %v10468_v56 = vld [vmem:[#allocation2 + $0x1180] sm:$0xff]  }
 0x268   :  { %13477 = vmatprep.subr.bf16.mxu1 %v10418_v58  ;;  %v10477_v58 = vld [vmem:[#allocation2 + $0x11c8] sm:$0xff]   ;;  %v3245_v60 = vld [vmem:[%s14677_s0 + $0x238] sm:$0xff] }
 0x269   :  { %v14532_v4 = vadd.f32 %v11305_v62, %v4464_v1  ;;  %13447 = vmatpush3.bf16.msra.mxu0 %v10394_v63  ;;  %v10453_v61 = vld [vmem:[#allocation2 + $0x1108] sm:$0xff]   ;;  %v10462_v63 = vld [vmem:[#allocation2 + $0x1150] sm:$0xff]  }
 0x26a   :  { %13449 = vmatprep.subr.bf16.mxu0 %v10403_v2  ;;  %v10469_v62 = vld [vmem:[#allocation2 + $0x1188] sm:$0xff]   ;;  %v10454_v1 = vld [vmem:[#allocation2 + $0x1110] sm:$0xff]  }
 0x26b   :  { %13479 = vmatpush3.bf16.msra.mxu1 %v10410_v0  ;;  %v10478_v0 = vld [vmem:[#allocation2 + $0x11d0] sm:$0xff]  }
 0x26c   :  { %13481 = vmatprep.subr.bf16.mxu1 %v10419_v3  ;;  %v10470_v2 = vld [vmem:[#allocation2 + $0x1190] sm:$0xff]   ;;  %v10463_v3 = vld [vmem:[#allocation2 + $0x1158] sm:$0xff]  }
 0x26d   :  { %13451 = vmatpush3.bf16.msra.mxu0 %v10395_v5  ;;  %v10455_v5 = vld [vmem:[#allocation2 + $0x1118] sm:$0xff]  }
 0x26e   :  { %13485 = vmatprep.subr.bf16.mxu0 %v10428_v7  ;;  %v10464_v7 = vld [vmem:[#allocation2 + $0x1160] sm:$0xff]  }
 0x26f   :  { %13483 = vmatpush3.bf16.msra.mxu1 %v10411_v6  ;;  %v10471_v6 = vld [vmem:[#allocation2 + $0x1198] sm:$0xff]  }
 0x270   :  { %13517 = vmatprep.subr.bf16.mxu1 %v10444_v8  ;;  %5442 = vmatmul.mubr.f32.vlgmr.msra.gmra.mrb[30].mxu0 %v3234_v9  ;;  %v10480_v8 = vld [vmem:[#allocation2 + $0x11e0] sm:$0xff]  }
 0x271   :  { %13487 = vmatpush3.bf16.msra.mxu0 %v10420_v11  ;;  %5581 = vmatprep.mubr.f32.mxu0 %v3239_v15  ;;  %v10456_v9 = vld [vmem:[#allocation2 + $0x1120] sm:$0xff]   ;;  %v10465_v11 = vld [vmem:[#allocation2 + $0x1168] sm:$0xff]  }
 0x272   :  { %5512 = vmatmul.mubr.f32.vlgmr.msra.gmra.mrb[30].mxu1 %v3236_v10  ;;  %13489 = vmatprep.subr.bf16.mxu0 %v10429_v13  ;;  %v10472_v10 = vld [vmem:[#allocation2 + $0x11a0] sm:$0xff]   ;;  %v10457_v13 = vld [vmem:[#allocation2 + $0x1128] sm:$0xff]  }
 0x273   :  { %13519 = vmatpush3.bf16.msra.mxu1 %v10436_v12  ;;  %5651 = vmatprep.mubr.f32.mxu1 %v3241_v16  ;;  %v10481_v12 = vld [vmem:[#allocation2 + $0x11e8] sm:$0xff]  }
 0x274   :  { %13521 = vmatprep.subr.bf16.mxu1 %v10445_v14  ;;  %v10473_v14 = vld [vmem:[#allocation2 + $0x11a8] sm:$0xff]  }
 0x275   :  { %13491 = vmatpush3.bf16.msra.mxu0 %v10421_v17  ;;  %v10466_v17 = vld [vmem:[#allocation2 + $0x1170] sm:$0xff]  }
 0x276   :  { %13493 = vmatprep.subr.bf16.mxu0 %v10430_v19 }
 0x277   :  { %13523 = vmatpush3.bf16.msra.mxu1 %v10437_v18  ;;  %v10482_v18 = vld [vmem:[#allocation2 + $0x11f0] sm:$0xff]  }
 0x278   :  { %13525 = vmatprep.subr.bf16.mxu1 %v10446_v20 }
 0x279   :  { %13495 = vmatpush3.bf16.msra.mxu0 %v10422_v21 }
 0x27a   :  { %13497 = vmatprep.subr.bf16.mxu0 %v10431_v23  ;;  %v10458_v23 = vld [vmem:[#allocation2 + $0x1130] sm:$0xff]  }
 0x27b   :  { %13527 = vmatpush3.bf16.msra.mxu1 %v10438_v22 }
 0x27c   :  { %13529 = vmatprep.subr.bf16.mxu1 %v10447_v24  ;;  %v10474_v24 = vld [vmem:[#allocation2 + $0x11b0] sm:$0xff]  }
 0x27d   :  { %13499 = vmatpush3.bf16.msra.mxu0 %v10423_v25 }
 0x27e   :  { %13501 = vmatprep.subr.bf16.mxu0 %v10432_v27  ;;  %v10483_v27 = vld [vmem:[#allocation2 + $0x11f8] sm:$0xff]  }
 0x27f   :  { %13531 = vmatpush3.bf16.msra.mxu1 %v10439_v26  ;;  %v10467_v26 = vld [vmem:[#allocation2 + $0x1178] sm:$0xff]  }
 0x280   :  { %13533 = vmatprep.subr.bf16.mxu1 %v10448_v28 }
 0x281   :  { %13503 = vmatpush3.bf16.msra.mxu0 %v10424_v29  ;;  %v10459_v29 = vld [vmem:[#allocation2 + $0x1138] sm:$0xff]  }
 0x282   :  { %13505 = vmatprep.subr.bf16.mxu0 %v10433_v31  ;;  %v10492_v31 = vld [vmem:[#allocation2 + $0x1240] sm:$0xff]  }
 0x283   :  { %13535 = vmatpush3.bf16.msra.mxu1 %v10440_v30  ;;  %v11338_v35 = vpop.f32.mrb[18].mxu0  ;;  %v10475_v30 = vld [vmem:[#allocation2 + $0x11b8] sm:$0xff]  }
 0x284   :  { %13537 = vmatprep.subr.bf16.mxu1 %v10449_v32  ;;  %v11339_v39 = vpop.f32.mrb[19].mxu0  ;;  %v10508_v32 = vld [vmem:[#allocation2 + $0x12c0] sm:$0xff]  }
 0x285   :  { %v11373_v36 = vpop.f32.mrb[18].mxu1  ;;  %v11340_v41 = vadd.f32 %v11339_v39, %v11338_v35  ;;  %13507 = vmatpush3.bf16.msra.mxu0 %v10425_v33  ;;  %v3242_v33 = vld [vmem:[%s14677_s0 + $0x220] sm:$0xff]  ;;  %v3247_v39 = vld [vmem:[%s14677_s0 + $0x248] sm:$0xff] }
 0x286   :  { %v11374_v40 = vpop.f32.mrb[19].mxu1  ;;  %13509 = vmatprep.subr.bf16.mxu0 %v10434_v37  ;;  %v10484_v35 = vld [vmem:[#allocation2 + $0x1200] sm:$0xff]   ;;  %v10493_v37 = vld [vmem:[#allocation2 + $0x1248] sm:$0xff]  }
 0x287   :  { %v11375_v42 = vadd.f32 %v11374_v40, %v11373_v36  ;;  %13539 = vmatpush3.bf16.msra.mxu1 %v10441_v34  ;;  %v4604_v45 = vadd.f32 %v11340_v41, %v14532_v4  ;;  %v10479_v4 = vld [vmem:[#allocation2 + $0x11d8] sm:$0xff]   ;;  %v3244_v34 = vld [vmem:[%s14677_s0 + $0x230] sm:$0xff]  ;;  %v10500_v36 = vld [vmem:[#allocation2 + $0x1280] sm:$0xff]  }
 0x288   :  { %13541 = vmatprep.subr.bf16.mxu1 %v10450_v38  ;;  %v10509_v38 = vld [vmem:[#allocation2 + $0x12c8] sm:$0xff]   ;;  %v3249_v40 = vld [vmem:[%s14677_s0 + $0x258] sm:$0xff] }
 0x289   :  { %v14547_v48 = vadd.f32 %v11375_v42, %v4604_v45  ;;  %13511 = vmatpush3.bf16.msra.mxu0 %v10426_v43  ;;  %v10485_v41 = vld [vmem:[#allocation2 + $0x1208] sm:$0xff]   ;;  %v10494_v43 = vld [vmem:[#allocation2 + $0x1250] sm:$0xff]  }
 0x28a   :  { %13513 = vmatprep.subr.bf16.mxu0 %v10435_v46  ;;  %v10501_v42 = vld [vmem:[#allocation2 + $0x1288] sm:$0xff]   ;;  %v10486_v45 = vld [vmem:[#allocation2 + $0x1210] sm:$0xff]  }
 0x28b   :  { %13543 = vmatpush3.bf16.msra.mxu1 %v10442_v44  ;;  %v10510_v44 = vld [vmem:[#allocation2 + $0x12d0] sm:$0xff]  }
 0x28c   :  { %13545 = vmatprep.subr.bf16.mxu1 %v10451_v47  ;;  %v10502_v46 = vld [vmem:[#allocation2 + $0x1290] sm:$0xff]   ;;  %v10495_v47 = vld [vmem:[#allocation2 + $0x1258] sm:$0xff]  }
 0x28d   :  { %13515 = vmatpush3.bf16.msra.mxu0 %v10427_v49  ;;  %v10487_v49 = vld [vmem:[#allocation2 + $0x1218] sm:$0xff]  }
 0x28e   :  { %13549 = vmatprep.subr.bf16.mxu0 %v10460_v51  ;;  %v10496_v51 = vld [vmem:[#allocation2 + $0x1260] sm:$0xff]  }
 0x28f   :  { %13547 = vmatpush3.bf16.msra.mxu1 %v10443_v50  ;;  %v10503_v50 = vld [vmem:[#allocation2 + $0x1298] sm:$0xff]  }
 0x290   :  { %13581 = vmatprep.subr.bf16.mxu1 %v10476_v52  ;;  %5582 = vmatmul.mubr.f32.vlgmr.msra.gmra.mrb[32].mxu0 %v3238_v53  ;;  %v10512_v52 = vld [vmem:[#allocation2 + $0x12e0] sm:$0xff]  }
 0x291   :  { %13551 = vmatpush3.bf16.msra.mxu0 %v10452_v55  ;;  %5721 = vmatprep.mubr.f32.mxu0 %v3243_v59  ;;  %v10488_v53 = vld [vmem:[#allocation2 + $0x1220] sm:$0xff]   ;;  %v10497_v55 = vld [vmem:[#allocation2 + $0x1268] sm:$0xff]  }
 0x292   :  { %5652 = vmatmul.mubr.f32.vlgmr.msra.gmra.mrb[32].mxu1 %v3240_v54  ;;  %13553 = vmatprep.subr.bf16.mxu0 %v10461_v57  ;;  %v10504_v54 = vld [vmem:[#allocation2 + $0x12a0] sm:$0xff]   ;;  %v10489_v57 = vld [vmem:[#allocation2 + $0x1228] sm:$0xff]  }
 0x293   :  { %13583 = vmatpush3.bf16.msra.mxu1 %v10468_v56  ;;  %5791 = vmatprep.mubr.f32.mxu1 %v3245_v60  ;;  %v10513_v56 = vld [vmem:[#allocation2 + $0x12e8] sm:$0xff]  }
 0x294   :  { %13585 = vmatprep.subr.bf16.mxu1 %v10477_v58  ;;  %v10505_v58 = vld [vmem:[#allocation2 + $0x12a8] sm:$0xff]  }
 0x295   :  { %13555 = vmatpush3.bf16.msra.mxu0 %v10453_v61  ;;  %v10498_v61 = vld [vmem:[#allocation2 + $0x1270] sm:$0xff]  }
 0x296   :  { %13557 = vmatprep.subr.bf16.mxu0 %v10462_v63 }
 0x297   :  { %13587 = vmatpush3.bf16.msra.mxu1 %v10469_v62  ;;  %v10514_v62 = vld [vmem:[#allocation2 + $0x12f0] sm:$0xff]  }
 0x298   :  { %13589 = vmatprep.subr.bf16.mxu1 %v10478_v0 }
 0x299   :  { %13559 = vmatpush3.bf16.msra.mxu0 %v10454_v1 }
 0x29a   :  { %13561 = vmatprep.subr.bf16.mxu0 %v10463_v3  ;;  %v10490_v3 = vld [vmem:[#allocation2 + $0x1230] sm:$0xff]  }
 0x29b   :  { %13591 = vmatpush3.bf16.msra.mxu1 %v10470_v2 }
 0x29c   :  { %13593 = vmatprep.subr.bf16.mxu1 %v10479_v4  ;;  %v10506_v4 = vld [vmem:[#allocation2 + $0x12b0] sm:$0xff]  }
 0x29d   :  { %13563 = vmatpush3.bf16.msra.mxu0 %v10455_v5 }
 0x29e   :  { %13565 = vmatprep.subr.bf16.mxu0 %v10464_v7  ;;  %v10515_v7 = vld [vmem:[#allocation2 + $0x12f8] sm:$0xff]  }
 0x29f   :  { %13595 = vmatpush3.bf16.msra.mxu1 %v10471_v6  ;;  %v10499_v6 = vld [vmem:[#allocation2 + $0x1278] sm:$0xff]  }
 0x2a0   :  { %13597 = vmatprep.subr.bf16.mxu1 %v10480_v8 }
 0x2a1   :  { %13567 = vmatpush3.bf16.msra.mxu0 %v10456_v9  ;;  %v10491_v9 = vld [vmem:[#allocation2 + $0x1238] sm:$0xff]  }
 0x2a2   :  { %13569 = vmatprep.subr.bf16.mxu0 %v10465_v11  ;;  %v10524_v11 = vld [vmem:[#allocation2 + $0x1340] sm:$0xff]  }
 0x2a3   :  { %13599 = vmatpush3.bf16.msra.mxu1 %v10472_v10  ;;  %v11408_v15 = vpop.f32.mrb[20].mxu0  ;;  %v10507_v10 = vld [vmem:[#allocation2 + $0x12b8] sm:$0xff]  }
 0x2a4   :  { %13601 = vmatprep.subr.bf16.mxu1 %v10481_v12  ;;  %v11409_v19 = vpop.f32.mrb[21].mxu0  ;;  %v10540_v12 = vld [vmem:[#allocation2 + $0x13c0] sm:$0xff]  }
 0x2a5   :  { %v11443_v16 = vpop.f32.mrb[20].mxu1  ;;  %v11410_v21 = vadd.f32 %v11409_v19, %v11408_v15  ;;  %13571 = vmatpush3.bf16.msra.mxu0 %v10457_v13  ;;  %v3246_v13 = vld [vmem:[%s14677_s0 + $0x240] sm:$0xff]  ;;  %v3251_v19 = vld [vmem:[%s14677_s0 + $0x268] sm:$0xff] }
 0x2a6   :  { %v11444_v20 = vpop.f32.mrb[21].mxu1  ;;  %13573 = vmatprep.subr.bf16.mxu0 %v10466_v17  ;;  %v10516_v15 = vld [vmem:[#allocation2 + $0x1300] sm:$0xff]   ;;  %v10525_v17 = vld [vmem:[#allocation2 + $0x1348] sm:$0xff]  }
 0x2a7   :  { %v11445_v22 = vadd.f32 %v11444_v20, %v11443_v16  ;;  %13603 = vmatpush3.bf16.msra.mxu1 %v10473_v14  ;;  %v4744_v25 = vadd.f32 %v11410_v21, %v14547_v48  ;;  %v10511_v48 = vld [vmem:[#allocation2 + $0x12d8] sm:$0xff]   ;;  %v3248_v14 = vld [vmem:[%s14677_s0 + $0x250] sm:$0xff]  ;;  %v10532_v16 = vld [vmem:[#allocation2 + $0x1380] sm:$0xff]  }
 0x2a8   :  { %13605 = vmatprep.subr.bf16.mxu1 %v10482_v18  ;;  %v10541_v18 = vld [vmem:[#allocation2 + $0x13c8] sm:$0xff]   ;;  %v3253_v20 = vld [vmem:[%s14677_s0 + $0x278] sm:$0xff] }
 0x2a9   :  { %v14562_v28 = vadd.f32 %v11445_v22, %v4744_v25  ;;  %13575 = vmatpush3.bf16.msra.mxu0 %v10458_v23  ;;  %v10517_v21 = vld [vmem:[#allocation2 + $0x1308] sm:$0xff]   ;;  %v10526_v23 = vld [vmem:[#allocation2 + $0x1350] sm:$0xff]  }
 0x2aa   :  { %13577 = vmatprep.subr.bf16.mxu0 %v10467_v26  ;;  %v10533_v22 = vld [vmem:[#allocation2 + $0x1388] sm:$0xff]   ;;  %v10518_v25 = vld [vmem:[#allocation2 + $0x1310] sm:$0xff]  }
 0x2ab   :  { %13607 = vmatpush3.bf16.msra.mxu1 %v10474_v24  ;;  %v10542_v24 = vld [vmem:[#allocation2 + $0x13d0] sm:$0xff]  }
 0x2ac   :  { %13609 = vmatprep.subr.bf16.mxu1 %v10483_v27  ;;  %v10534_v26 = vld [vmem:[#allocation2 + $0x1390] sm:$0xff]   ;;  %v10527_v27 = vld [vmem:[#allocation2 + $0x1358] sm:$0xff]  }
 0x2ad   :  { %13579 = vmatpush3.bf16.msra.mxu0 %v10459_v29  ;;  %v10519_v29 = vld [vmem:[#allocation2 + $0x1318] sm:$0xff]  }
 0x2ae   :  { %13613 = vmatprep.subr.bf16.mxu0 %v10492_v31  ;;  %v10528_v31 = vld [vmem:[#allocation2 + $0x1360] sm:$0xff]  }
 0x2af   :  { %13611 = vmatpush3.bf16.msra.mxu1 %v10475_v30  ;;  %v10535_v30 = vld [vmem:[#allocation2 + $0x1398] sm:$0xff]  }
 0x2b0   :  { %13645 = vmatprep.subr.bf16.mxu1 %v10508_v32  ;;  %5722 = vmatmul.mubr.f32.vlgmr.msra.gmra.mrb[34].mxu0 %v3242_v33  ;;  %v10544_v32 = vld [vmem:[#allocation2 + $0x13e0] sm:$0xff]  }
 0x2b1   :  { %13615 = vmatpush3.bf16.msra.mxu0 %v10484_v35  ;;  %5861 = vmatprep.mubr.f32.mxu0 %v3247_v39  ;;  %v10520_v33 = vld [vmem:[#allocation2 + $0x1320] sm:$0xff]   ;;  %v10529_v35 = vld [vmem:[#allocation2 + $0x1368] sm:$0xff]  }
 0x2b2   :  { %5792 = vmatmul.mubr.f32.vlgmr.msra.gmra.mrb[34].mxu1 %v3244_v34  ;;  %13617 = vmatprep.subr.bf16.mxu0 %v10493_v37  ;;  %v10536_v34 = vld [vmem:[#allocation2 + $0x13a0] sm:$0xff]   ;;  %v10521_v37 = vld [vmem:[#allocation2 + $0x1328] sm:$0xff]  }
 0x2b3   :  { %13647 = vmatpush3.bf16.msra.mxu1 %v10500_v36  ;;  %5931 = vmatprep.mubr.f32.mxu1 %v3249_v40  ;;  %v10545_v36 = vld [vmem:[#allocation2 + $0x13e8] sm:$0xff]  }
 0x2b4   :  { %13649 = vmatprep.subr.bf16.mxu1 %v10509_v38  ;;  %v10537_v38 = vld [vmem:[#allocation2 + $0x13a8] sm:$0xff]  }
 0x2b5   :  { %13619 = vmatpush3.bf16.msra.mxu0 %v10485_v41  ;;  %v10530_v41 = vld [vmem:[#allocation2 + $0x1370] sm:$0xff]  }
 0x2b6   :  { %13621 = vmatprep.subr.bf16.mxu0 %v10494_v43 }
 0x2b7   :  { %13651 = vmatpush3.bf16.msra.mxu1 %v10501_v42  ;;  %v10546_v42 = vld [vmem:[#allocation2 + $0x13f0] sm:$0xff]  }
 0x2b8   :  { %13653 = vmatprep.subr.bf16.mxu1 %v10510_v44 }
 0x2b9   :  { %13623 = vmatpush3.bf16.msra.mxu0 %v10486_v45 }
 0x2ba   :  { %13625 = vmatprep.subr.bf16.mxu0 %v10495_v47  ;;  %v10522_v47 = vld [vmem:[#allocation2 + $0x1330] sm:$0xff]  }
 0x2bb   :  { %13655 = vmatpush3.bf16.msra.mxu1 %v10502_v46 }
 0x2bc   :  { %13657 = vmatprep.subr.bf16.mxu1 %v10511_v48  ;;  %v10538_v48 = vld [vmem:[#allocation2 + $0x13b0] sm:$0xff]  }
 0x2bd   :  { %13627 = vmatpush3.bf16.msra.mxu0 %v10487_v49 }
 0x2be   :  { %13629 = vmatprep.subr.bf16.mxu0 %v10496_v51  ;;  %v10547_v51 = vld [vmem:[#allocation2 + $0x13f8] sm:$0xff]  }
 0x2bf   :  { %13659 = vmatpush3.bf16.msra.mxu1 %v10503_v50  ;;  %v10531_v50 = vld [vmem:[#allocation2 + $0x1378] sm:$0xff]  }
 0x2c0   :  { %13661 = vmatprep.subr.bf16.mxu1 %v10512_v52 }
 0x2c1   :  { %13631 = vmatpush3.bf16.msra.mxu0 %v10488_v53  ;;  %v10523_v53 = vld [vmem:[#allocation2 + $0x1338] sm:$0xff]  }
 0x2c2   :  { %13633 = vmatprep.subr.bf16.mxu0 %v10497_v55  ;;  %v10556_v55 = vld [vmem:[#allocation2 + $0x1440] sm:$0xff]  }
 0x2c3   :  { %13663 = vmatpush3.bf16.msra.mxu1 %v10504_v54  ;;  %v11478_v59 = vpop.f32.mrb[22].mxu0  ;;  %v10539_v54 = vld [vmem:[#allocation2 + $0x13b8] sm:$0xff]  }
 0x2c4   :  { %13665 = vmatprep.subr.bf16.mxu1 %v10513_v56  ;;  %v11479_v63 = vpop.f32.mrb[23].mxu0  ;;  %v10572_v56 = vld [vmem:[#allocation2 + $0x14c0] sm:$0xff]  }
 0x2c5   :  { %v11513_v60 = vpop.f32.mrb[22].mxu1  ;;  %v11480_v1 = vadd.f32 %v11479_v63, %v11478_v59  ;;  %13635 = vmatpush3.bf16.msra.mxu0 %v10489_v57  ;;  %v3250_v57 = vld [vmem:[%s14677_s0 + $0x260] sm:$0xff]  ;;  %v3255_v63 = vld [vmem:[%s14677_s0 + $0x288] sm:$0xff] }
 0x2c6   :  { %v11514_v0 = vpop.f32.mrb[23].mxu1  ;;  %13637 = vmatprep.subr.bf16.mxu0 %v10498_v61  ;;  %v10548_v59 = vld [vmem:[#allocation2 + $0x1400] sm:$0xff]   ;;  %v10557_v61 = vld [vmem:[#allocation2 + $0x1448] sm:$0xff]  }
 0x2c7   :  { %v11515_v2 = vadd.f32 %v11514_v0, %v11513_v60  ;;  %13667 = vmatpush3.bf16.msra.mxu1 %v10505_v58  ;;  %v4884_v5 = vadd.f32 %v11480_v1, %v14562_v28  ;;  %v10543_v28 = vld [vmem:[#allocation2 + $0x13d8] sm:$0xff]   ;;  %v3252_v58 = vld [vmem:[%s14677_s0 + $0x270] sm:$0xff]  ;;  %v10564_v60 = vld [vmem:[#allocation2 + $0x1480] sm:$0xff]  }
 0x2c8   :  { %13669 = vmatprep.subr.bf16.mxu1 %v10514_v62  ;;  %v10573_v62 = vld [vmem:[#allocation2 + $0x14c8] sm:$0xff]   ;;  %v3257_v0 = vld [vmem:[%s14677_s0 + $0x298] sm:$0xff] }
 0x2c9   :  { %v14577_v8 = vadd.f32 %v11515_v2, %v4884_v5  ;;  %13639 = vmatpush3.bf16.msra.mxu0 %v10490_v3  ;;  %v10549_v1 = vld [vmem:[#allocation2 + $0x1408] sm:$0xff]   ;;  %v10558_v3 = vld [vmem:[#allocation2 + $0x1450] sm:$0xff]  }
 0x2ca   :  { %13641 = vmatprep.subr.bf16.mxu0 %v10499_v6  ;;  %v10565_v2 = vld [vmem:[#allocation2 + $0x1488] sm:$0xff]   ;;  %v10550_v5 = vld [vmem:[#allocation2 + $0x1410] sm:$0xff]  }
 0x2cb   :  { %13671 = vmatpush3.bf16.msra.mxu1 %v10506_v4  ;;  %v10574_v4 = vld [vmem:[#allocation2 + $0x14d0] sm:$0xff]  }
 0x2cc   :  { %13673 = vmatprep.subr.bf16.mxu1 %v10515_v7  ;;  %v10566_v6 = vld [vmem:[#allocation2 + $0x1490] sm:$0xff]   ;;  %v10559_v7 = vld [vmem:[#allocation2 + $0x1458] sm:$0xff]  }
 0x2cd   :  { %13643 = vmatpush3.bf16.msra.mxu0 %v10491_v9  ;;  %v10551_v9 = vld [vmem:[#allocation2 + $0x1418] sm:$0xff]  }
 0x2ce   :  { %13677 = vmatprep.subr.bf16.mxu0 %v10524_v11  ;;  %v10560_v11 = vld [vmem:[#allocation2 + $0x1460] sm:$0xff]  }
 0x2cf   :  { %13675 = vmatpush3.bf16.msra.mxu1 %v10507_v10  ;;  %v10567_v10 = vld [vmem:[#allocation2 + $0x1498] sm:$0xff]  }
 0x2d0   :  { %13709 = vmatprep.subr.bf16.mxu1 %v10540_v12  ;;  %5862 = vmatmul.mubr.f32.vlgmr.msra.gmra.mrb[36].mxu0 %v3246_v13  ;;  %v10576_v12 = vld [vmem:[#allocation2 + $0x14e0] sm:$0xff]  }
 0x2d1   :  { %13679 = vmatpush3.bf16.msra.mxu0 %v10516_v15  ;;  %6001 = vmatprep.mubr.f32.mxu0 %v3251_v19  ;;  %v10552_v13 = vld [vmem:[#allocation2 + $0x1420] sm:$0xff]   ;;  %v10561_v15 = vld [vmem:[#allocation2 + $0x1468] sm:$0xff]  }
 0x2d2   :  { %5932 = vmatmul.mubr.f32.vlgmr.msra.gmra.mrb[36].mxu1 %v3248_v14  ;;  %13681 = vmatprep.subr.bf16.mxu0 %v10525_v17  ;;  %v10568_v14 = vld [vmem:[#allocation2 + $0x14a0] sm:$0xff]   ;;  %v10553_v17 = vld [vmem:[#allocation2 + $0x1428] sm:$0xff]  }
 0x2d3   :  { %13711 = vmatpush3.bf16.msra.mxu1 %v10532_v16  ;;  %6071 = vmatprep.mubr.f32.mxu1 %v3253_v20  ;;  %v10577_v16 = vld [vmem:[#allocation2 + $0x14e8] sm:$0xff]  }
 0x2d4   :  { %13713 = vmatprep.subr.bf16.mxu1 %v10541_v18  ;;  %v10569_v18 = vld [vmem:[#allocation2 + $0x14a8] sm:$0xff]  }
 0x2d5   :  { %13683 = vmatpush3.bf16.msra.mxu0 %v10517_v21  ;;  %v10562_v21 = vld [vmem:[#allocation2 + $0x1470] sm:$0xff]  }
 0x2d6   :  { %13685 = vmatprep.subr.bf16.mxu0 %v10526_v23 }
 0x2d7   :  { %13715 = vmatpush3.bf16.msra.mxu1 %v10533_v22  ;;  %v10578_v22 = vld [vmem:[#allocation2 + $0x14f0] sm:$0xff]  }
 0x2d8   :  { %13717 = vmatprep.subr.bf16.mxu1 %v10542_v24 }
 0x2d9   :  { %13687 = vmatpush3.bf16.msra.mxu0 %v10518_v25 }
 0x2da   :  { %13689 = vmatprep.subr.bf16.mxu0 %v10527_v27  ;;  %v10554_v27 = vld [vmem:[#allocation2 + $0x1430] sm:$0xff]  }
 0x2db   :  { %13719 = vmatpush3.bf16.msra.mxu1 %v10534_v26 }
 0x2dc   :  { %13721 = vmatprep.subr.bf16.mxu1 %v10543_v28  ;;  %v10570_v28 = vld [vmem:[#allocation2 + $0x14b0] sm:$0xff]  }
 0x2dd   :  { %13691 = vmatpush3.bf16.msra.mxu0 %v10519_v29 }
 0x2de   :  { %13693 = vmatprep.subr.bf16.mxu0 %v10528_v31  ;;  %v10579_v31 = vld [vmem:[#allocation2 + $0x14f8] sm:$0xff]  }
 0x2df   :  { %13723 = vmatpush3.bf16.msra.mxu1 %v10535_v30  ;;  %v10563_v30 = vld [vmem:[#allocation2 + $0x1478] sm:$0xff]  }
 0x2e0   :  { %13725 = vmatprep.subr.bf16.mxu1 %v10544_v32 }
 0x2e1   :  { %13695 = vmatpush3.bf16.msra.mxu0 %v10520_v33  ;;  %v10555_v33 = vld [vmem:[#allocation2 + $0x1438] sm:$0xff]  }
 0x2e2   :  { %13697 = vmatprep.subr.bf16.mxu0 %v10529_v35  ;;  %v10588_v35 = vld [vmem:[#allocation2 + $0x1540] sm:$0xff]  }
 0x2e3   :  { %13727 = vmatpush3.bf16.msra.mxu1 %v10536_v34  ;;  %v11548_v39 = vpop.f32.mrb[24].mxu0  ;;  %v10571_v34 = vld [vmem:[#allocation2 + $0x14b8] sm:$0xff]  }
 0x2e4   :  { %13729 = vmatprep.subr.bf16.mxu1 %v10545_v36  ;;  %v11549_v43 = vpop.f32.mrb[25].mxu0  ;;  %v10604_v36 = vld [vmem:[#allocation2 + $0x15c0] sm:$0xff]  }
 0x2e5   :  { %v11583_v40 = vpop.f32.mrb[24].mxu1  ;;  %v11550_v45 = vadd.f32 %v11549_v43, %v11548_v39  ;;  %13699 = vmatpush3.bf16.msra.mxu0 %v10521_v37  ;;  %v3254_v37 = vld [vmem:[%s14677_s0 + $0x280] sm:$0xff]  ;;  %v3259_v43 = vld [vmem:[%s14677_s0 + $0x2a8] sm:$0xff] }
 0x2e6   :  { %v11584_v44 = vpop.f32.mrb[25].mxu1  ;;  %13701 = vmatprep.subr.bf16.mxu0 %v10530_v41  ;;  %v10580_v39 = vld [vmem:[#allocation2 + $0x1500] sm:$0xff]   ;;  %v10589_v41 = vld [vmem:[#allocation2 + $0x1548] sm:$0xff]  }
 0x2e7   :  { %v11585_v46 = vadd.f32 %v11584_v44, %v11583_v40  ;;  %13731 = vmatpush3.bf16.msra.mxu1 %v10537_v38  ;;  %v5024_v49 = vadd.f32 %v11550_v45, %v14577_v8  ;;  %v10575_v8 = vld [vmem:[#allocation2 + $0x14d8] sm:$0xff]   ;;  %v3256_v38 = vld [vmem:[%s14677_s0 + $0x290] sm:$0xff]  ;;  %v10596_v40 = vld [vmem:[#allocation2 + $0x1580] sm:$0xff]  }
 0x2e8   :  { %13733 = vmatprep.subr.bf16.mxu1 %v10546_v42  ;;  %v10605_v42 = vld [vmem:[#allocation2 + $0x15c8] sm:$0xff]   ;;  %v3261_v44 = vld [vmem:[%s14677_s0 + $0x2b8] sm:$0xff] }
 0x2e9   :  { %v14592_v52 = vadd.f32 %v11585_v46, %v5024_v49  ;;  %13703 = vmatpush3.bf16.msra.mxu0 %v10522_v47  ;;  %v10581_v45 = vld [vmem:[#allocation2 + $0x1508] sm:$0xff]   ;;  %v10590_v47 = vld [vmem:[#allocation2 + $0x1550] sm:$0xff]  }
 0x2ea   :  { %13705 = vmatprep.subr.bf16.mxu0 %v10531_v50  ;;  %v10597_v46 = vld [vmem:[#allocation2 + $0x1588] sm:$0xff]   ;;  %v10582_v49 = vld [vmem:[#allocation2 + $0x1510] sm:$0xff]  }
 0x2eb   :  { %13735 = vmatpush3.bf16.msra.mxu1 %v10538_v48  ;;  %v10606_v48 = vld [vmem:[#allocation2 + $0x15d0] sm:$0xff]  }
 0x2ec   :  { %13737 = vmatprep.subr.bf16.mxu1 %v10547_v51  ;;  %v10598_v50 = vld [vmem:[#allocation2 + $0x1590] sm:$0xff]   ;;  %v10591_v51 = vld [vmem:[#allocation2 + $0x1558] sm:$0xff]  }
 0x2ed   :  { %13707 = vmatpush3.bf16.msra.mxu0 %v10523_v53  ;;  %v10583_v53 = vld [vmem:[#allocation2 + $0x1518] sm:$0xff]  }
 0x2ee   :  { %13741 = vmatprep.subr.bf16.mxu0 %v10556_v55  ;;  %v10592_v55 = vld [vmem:[#allocation2 + $0x1560] sm:$0xff]  }
 0x2ef   :  { %13739 = vmatpush3.bf16.msra.mxu1 %v10539_v54  ;;  %v10599_v54 = vld [vmem:[#allocation2 + $0x1598] sm:$0xff]  }
 0x2f0   :  { %13773 = vmatprep.subr.bf16.mxu1 %v10572_v56  ;;  %6002 = vmatmul.mubr.f32.vlgmr.msra.gmra.mrb[38].mxu0 %v3250_v57  ;;  %v10608_v56 = vld [vmem:[#allocation2 + $0x15e0] sm:$0xff]  }
 0x2f1   :  { %13743 = vmatpush3.bf16.msra.mxu0 %v10548_v59  ;;  %6141 = vmatprep.mubr.f32.mxu0 %v3255_v63  ;;  %v10584_v57 = vld [vmem:[#allocation2 + $0x1520] sm:$0xff]   ;;  %v10593_v59 = vld [vmem:[#allocation2 + $0x1568] sm:$0xff]  }
 0x2f2   :  { %6072 = vmatmul.mubr.f32.vlgmr.msra.gmra.mrb[38].mxu1 %v3252_v58  ;;  %13745 = vmatprep.subr.bf16.mxu0 %v10557_v61  ;;  %v10600_v58 = vld [vmem:[#allocation2 + $0x15a0] sm:$0xff]   ;;  %v10585_v61 = vld [vmem:[#allocation2 + $0x1528] sm:$0xff]  }
 0x2f3   :  { %13775 = vmatpush3.bf16.msra.mxu1 %v10564_v60  ;;  %6211 = vmatprep.mubr.f32.mxu1 %v3257_v0  ;;  %v10609_v60 = vld [vmem:[#allocation2 + $0x15e8] sm:$0xff]  }
 0x2f4   :  { %13777 = vmatprep.subr.bf16.mxu1 %v10573_v62  ;;  %v10601_v62 = vld [vmem:[#allocation2 + $0x15a8] sm:$0xff]  }
 0x2f5   :  { %13747 = vmatpush3.bf16.msra.mxu0 %v10549_v1  ;;  %v10594_v1 = vld [vmem:[#allocation2 + $0x1570] sm:$0xff]  }
 0x2f6   :  { %13749 = vmatprep.subr.bf16.mxu0 %v10558_v3 }
 0x2f7   :  { %13779 = vmatpush3.bf16.msra.mxu1 %v10565_v2  ;;  %v10610_v2 = vld [vmem:[#allocation2 + $0x15f0] sm:$0xff]  }
 0x2f8   :  { %13781 = vmatprep.subr.bf16.mxu1 %v10574_v4 }
 0x2f9   :  { %13751 = vmatpush3.bf16.msra.mxu0 %v10550_v5 }
 0x2fa   :  { %13753 = vmatprep.subr.bf16.mxu0 %v10559_v7  ;;  %v10586_v7 = vld [vmem:[#allocation2 + $0x1530] sm:$0xff]  }
 0x2fb   :  { %13783 = vmatpush3.bf16.msra.mxu1 %v10566_v6 }
 0x2fc   :  { %13785 = vmatprep.subr.bf16.mxu1 %v10575_v8  ;;  %v10602_v8 = vld [vmem:[#allocation2 + $0x15b0] sm:$0xff]  }
 0x2fd   :  { %13755 = vmatpush3.bf16.msra.mxu0 %v10551_v9 }
 0x2fe   :  { %13757 = vmatprep.subr.bf16.mxu0 %v10560_v11  ;;  %v10611_v11 = vld [vmem:[#allocation2 + $0x15f8] sm:$0xff]  }
 0x2ff   :  { %13787 = vmatpush3.bf16.msra.mxu1 %v10567_v10  ;;  %v10595_v10 = vld [vmem:[#allocation2 + $0x1578] sm:$0xff]  }
 0x300   :  { %13789 = vmatprep.subr.bf16.mxu1 %v10576_v12 }
 0x301   :  { %13759 = vmatpush3.bf16.msra.mxu0 %v10552_v13  ;;  %v10587_v13 = vld [vmem:[#allocation2 + $0x1538] sm:$0xff]  }
 0x302   :  { %13761 = vmatprep.subr.bf16.mxu0 %v10561_v15  ;;  %v10620_v15 = vld [vmem:[#allocation2 + $0x1640] sm:$0xff]  }
 0x303   :  { %13791 = vmatpush3.bf16.msra.mxu1 %v10568_v14  ;;  %v11618_v19 = vpop.f32.mrb[26].mxu0  ;;  %v10603_v14 = vld [vmem:[#allocation2 + $0x15b8] sm:$0xff]  }
 0x304   :  { %13793 = vmatprep.subr.bf16.mxu1 %v10577_v16  ;;  %v11619_v23 = vpop.f32.mrb[27].mxu0  ;;  %v10636_v16 = vld [vmem:[#allocation2 + $0x16c0] sm:$0xff]  }
 0x305   :  { %v11653_v20 = vpop.f32.mrb[26].mxu1  ;;  %v11620_v25 = vadd.f32 %v11619_v23, %v11618_v19  ;;  %13763 = vmatpush3.bf16.msra.mxu0 %v10553_v17  ;;  %v3258_v17 = vld [vmem:[%s14677_s0 + $0x2a0] sm:$0xff]  ;;  %v3263_v23 = vld [vmem:[%s14677_s0 + $0x2c8] sm:$0xff] }
 0x306   :  { %v11654_v24 = vpop.f32.mrb[27].mxu1  ;;  %13765 = vmatprep.subr.bf16.mxu0 %v10562_v21  ;;  %v10612_v19 = vld [vmem:[#allocation2 + $0x1600] sm:$0xff]   ;;  %v10621_v21 = vld [vmem:[#allocation2 + $0x1648] sm:$0xff]  }
 0x307   :  { %v11655_v26 = vadd.f32 %v11654_v24, %v11653_v20  ;;  %13795 = vmatpush3.bf16.msra.mxu1 %v10569_v18  ;;  %v5164_v29 = vadd.f32 %v11620_v25, %v14592_v52  ;;  %v10607_v52 = vld [vmem:[#allocation2 + $0x15d8] sm:$0xff]   ;;  %v3260_v18 = vld [vmem:[%s14677_s0 + $0x2b0] sm:$0xff]  ;;  %v10628_v20 = vld [vmem:[#allocation2 + $0x1680] sm:$0xff]  }
 0x308   :  { %13797 = vmatprep.subr.bf16.mxu1 %v10578_v22  ;;  %v10637_v22 = vld [vmem:[#allocation2 + $0x16c8] sm:$0xff]   ;;  %v3265_v24 = vld [vmem:[%s14677_s0 + $0x2d8] sm:$0xff] }
 0x309   :  { %v14607_v32 = vadd.f32 %v11655_v26, %v5164_v29  ;;  %13767 = vmatpush3.bf16.msra.mxu0 %v10554_v27  ;;  %v10613_v25 = vld [vmem:[#allocation2 + $0x1608] sm:$0xff]   ;;  %v10622_v27 = vld [vmem:[#allocation2 + $0x1650] sm:$0xff]  }
 0x30a   :  { %13769 = vmatprep.subr.bf16.mxu0 %v10563_v30  ;;  %v10629_v26 = vld [vmem:[#allocation2 + $0x1688] sm:$0xff]   ;;  %v10614_v29 = vld [vmem:[#allocation2 + $0x1610] sm:$0xff]  }
 0x30b   :  { %13799 = vmatpush3.bf16.msra.mxu1 %v10570_v28  ;;  %v10638_v28 = vld [vmem:[#allocation2 + $0x16d0] sm:$0xff]  }
 0x30c   :  { %13801 = vmatprep.subr.bf16.mxu1 %v10579_v31  ;;  %v10630_v30 = vld [vmem:[#allocation2 + $0x1690] sm:$0xff]   ;;  %v10623_v31 = vld [vmem:[#allocation2 + $0x1658] sm:$0xff]  }
 0x30d   :  { %13771 = vmatpush3.bf16.msra.mxu0 %v10555_v33  ;;  %v10615_v33 = vld [vmem:[#allocation2 + $0x1618] sm:$0xff]  }
 0x30e   :  { %13805 = vmatprep.subr.bf16.mxu0 %v10588_v35  ;;  %v10624_v35 = vld [vmem:[#allocation2 + $0x1660] sm:$0xff]  }
 0x30f   :  { %13803 = vmatpush3.bf16.msra.mxu1 %v10571_v34  ;;  %v10631_v34 = vld [vmem:[#allocation2 + $0x1698] sm:$0xff]  }
 0x310   :  { %13837 = vmatprep.subr.bf16.mxu1 %v10604_v36  ;;  %6142 = vmatmul.mubr.f32.vlgmr.msra.gmra.mrb[40].mxu0 %v3254_v37  ;;  %v10640_v36 = vld [vmem:[#allocation2 + $0x16e0] sm:$0xff]  }
 0x311   :  { %13807 = vmatpush3.bf16.msra.mxu0 %v10580_v39  ;;  %6281 = vmatprep.mubr.f32.mxu0 %v3259_v43  ;;  %v10616_v37 = vld [vmem:[#allocation2 + $0x1620] sm:$0xff]   ;;  %v10625_v39 = vld [vmem:[#allocation2 + $0x1668] sm:$0xff]  }
 0x312   :  { %6212 = vmatmul.mubr.f32.vlgmr.msra.gmra.mrb[40].mxu1 %v3256_v38  ;;  %13809 = vmatprep.subr.bf16.mxu0 %v10589_v41  ;;  %v10632_v38 = vld [vmem:[#allocation2 + $0x16a0] sm:$0xff]   ;;  %v10617_v41 = vld [vmem:[#allocation2 + $0x1628] sm:$0xff]  }
 0x313   :  { %13839 = vmatpush3.bf16.msra.mxu1 %v10596_v40  ;;  %6351 = vmatprep.mubr.f32.mxu1 %v3261_v44  ;;  %v10641_v40 = vld [vmem:[#allocation2 + $0x16e8] sm:$0xff]  }
 0x314   :  { %13841 = vmatprep.subr.bf16.mxu1 %v10605_v42  ;;  %v10633_v42 = vld [vmem:[#allocation2 + $0x16a8] sm:$0xff]  }
 0x315   :  { %13811 = vmatpush3.bf16.msra.mxu0 %v10581_v45  ;;  %v10626_v45 = vld [vmem:[#allocation2 + $0x1670] sm:$0xff]  }
 0x316   :  { %13813 = vmatprep.subr.bf16.mxu0 %v10590_v47 }
 0x317   :  { %13843 = vmatpush3.bf16.msra.mxu1 %v10597_v46  ;;  %v10642_v46 = vld [vmem:[#allocation2 + $0x16f0] sm:$0xff]  }
 0x318   :  { %13845 = vmatprep.subr.bf16.mxu1 %v10606_v48 }
 0x319   :  { %13815 = vmatpush3.bf16.msra.mxu0 %v10582_v49 }
 0x31a   :  { %13817 = vmatprep.subr.bf16.mxu0 %v10591_v51  ;;  %v10618_v51 = vld [vmem:[#allocation2 + $0x1630] sm:$0xff]  }
 0x31b   :  { %13847 = vmatpush3.bf16.msra.mxu1 %v10598_v50 }
 0x31c   :  { %13849 = vmatprep.subr.bf16.mxu1 %v10607_v52  ;;  %v10634_v52 = vld [vmem:[#allocation2 + $0x16b0] sm:$0xff]  }
 0x31d   :  { %13819 = vmatpush3.bf16.msra.mxu0 %v10583_v53 }
 0x31e   :  { %13821 = vmatprep.subr.bf16.mxu0 %v10592_v55  ;;  %v10643_v55 = vld [vmem:[#allocation2 + $0x16f8] sm:$0xff]  }
 0x31f   :  { %13851 = vmatpush3.bf16.msra.mxu1 %v10599_v54  ;;  %v10627_v54 = vld [vmem:[#allocation2 + $0x1678] sm:$0xff]  }
 0x320   :  { %13853 = vmatprep.subr.bf16.mxu1 %v10608_v56 }
 0x321   :  { %13823 = vmatpush3.bf16.msra.mxu0 %v10584_v57  ;;  %v10619_v57 = vld [vmem:[#allocation2 + $0x1638] sm:$0xff]  }
 0x322   :  { %13825 = vmatprep.subr.bf16.mxu0 %v10593_v59  ;;  %v10652_v59 = vld [vmem:[#allocation2 + $0x1740] sm:$0xff]  }
 0x323   :  { %13855 = vmatpush3.bf16.msra.mxu1 %v10600_v58  ;;  %v11688_v63 = vpop.f32.mrb[28].mxu0  ;;  %v10635_v58 = vld [vmem:[#allocation2 + $0x16b8] sm:$0xff]  }
 0x324   :  { %13857 = vmatprep.subr.bf16.mxu1 %v10609_v60  ;;  %v11689_v3 = vpop.f32.mrb[29].mxu0  ;;  %v10668_v60 = vld [vmem:[#allocation2 + $0x17c0] sm:$0xff]  }
 0x325   :  { %v11723_v0 = vpop.f32.mrb[28].mxu1  ;;  %v11690_v5 = vadd.f32 %v11689_v3, %v11688_v63  ;;  %13827 = vmatpush3.bf16.msra.mxu0 %v10585_v61  ;;  %v3262_v61 = vld [vmem:[%s14677_s0 + $0x2c0] sm:$0xff]  ;;  %v3267_v3 = vld [vmem:[%s14677_s0 + $0x2e8] sm:$0xff] }
 0x326   :  { %v11724_v4 = vpop.f32.mrb[29].mxu1  ;;  %13829 = vmatprep.subr.bf16.mxu0 %v10594_v1  ;;  %v10644_v63 = vld [vmem:[#allocation2 + $0x1700] sm:$0xff]   ;;  %v10653_v1 = vld [vmem:[#allocation2 + $0x1748] sm:$0xff]  }
 0x327   :  { %v11725_v6 = vadd.f32 %v11724_v4, %v11723_v0  ;;  %13859 = vmatpush3.bf16.msra.mxu1 %v10601_v62  ;;  %v5304_v9 = vadd.f32 %v11690_v5, %v14607_v32  ;;  %v10639_v32 = vld [vmem:[#allocation2 + $0x16d8] sm:$0xff]   ;;  %v3264_v62 = vld [vmem:[%s14677_s0 + $0x2d0] sm:$0xff]  ;;  %v10660_v0 = vld [vmem:[#allocation2 + $0x1780] sm:$0xff]  }
 0x328   :  { %13861 = vmatprep.subr.bf16.mxu1 %v10610_v2  ;;  %v10669_v2 = vld [vmem:[#allocation2 + $0x17c8] sm:$0xff]   ;;  %v3269_v4 = vld [vmem:[%s14677_s0 + $0x2f8] sm:$0xff] }
 0x329   :  { %v14622_v12 = vadd.f32 %v11725_v6, %v5304_v9  ;;  %13831 = vmatpush3.bf16.msra.mxu0 %v10586_v7  ;;  %v10645_v5 = vld [vmem:[#allocation2 + $0x1708] sm:$0xff]   ;;  %v10654_v7 = vld [vmem:[#allocation2 + $0x1750] sm:$0xff]  }
 0x32a   :  { %13833 = vmatprep.subr.bf16.mxu0 %v10595_v10  ;;  %v10661_v6 = vld [vmem:[#allocation2 + $0x1788] sm:$0xff]   ;;  %v10646_v9 = vld [vmem:[#allocation2 + $0x1710] sm:$0xff]  }
 0x32b   :  { %13863 = vmatpush3.bf16.msra.mxu1 %v10602_v8  ;;  %v10670_v8 = vld [vmem:[#allocation2 + $0x17d0] sm:$0xff]  }
 0x32c   :  { %13865 = vmatprep.subr.bf16.mxu1 %v10611_v11  ;;  %v10662_v10 = vld [vmem:[#allocation2 + $0x1790] sm:$0xff]   ;;  %v10655_v11 = vld [vmem:[#allocation2 + $0x1758] sm:$0xff]  }
 0x32d   :  { %13835 = vmatpush3.bf16.msra.mxu0 %v10587_v13  ;;  %v10647_v13 = vld [vmem:[#allocation2 + $0x1718] sm:$0xff]  }
 0x32e   :  { %13869 = vmatprep.subr.bf16.mxu0 %v10620_v15  ;;  %v10656_v15 = vld [vmem:[#allocation2 + $0x1760] sm:$0xff]  }
 0x32f   :  { %13867 = vmatpush3.bf16.msra.mxu1 %v10603_v14  ;;  %v10663_v14 = vld [vmem:[#allocation2 + $0x1798] sm:$0xff]  }
 0x330   :  { %13901 = vmatprep.subr.bf16.mxu1 %v10636_v16  ;;  %6282 = vmatmul.mubr.f32.vlgmr.msra.gmra.mrb[42].mxu0 %v3258_v17  ;;  %v10672_v16 = vld [vmem:[#allocation2 + $0x17e0] sm:$0xff]  }
 0x331   :  { %13871 = vmatpush3.bf16.msra.mxu0 %v10612_v19  ;;  %6421 = vmatprep.mubr.f32.mxu0 %v3263_v23  ;;  %v10648_v17 = vld [vmem:[#allocation2 + $0x1720] sm:$0xff]   ;;  %v10657_v19 = vld [vmem:[#allocation2 + $0x1768] sm:$0xff]  }
 0x332   :  { %6352 = vmatmul.mubr.f32.vlgmr.msra.gmra.mrb[42].mxu1 %v3260_v18  ;;  %13873 = vmatprep.subr.bf16.mxu0 %v10621_v21  ;;  %v10664_v18 = vld [vmem:[#allocation2 + $0x17a0] sm:$0xff]   ;;  %v10649_v21 = vld [vmem:[#allocation2 + $0x1728] sm:$0xff]  }
 0x333   :  { %13903 = vmatpush3.bf16.msra.mxu1 %v10628_v20  ;;  %6491 = vmatprep.mubr.f32.mxu1 %v3265_v24  ;;  %v10673_v20 = vld [vmem:[#allocation2 + $0x17e8] sm:$0xff]  }
 0x334   :  { %13905 = vmatprep.subr.bf16.mxu1 %v10637_v22  ;;  %v10665_v22 = vld [vmem:[#allocation2 + $0x17a8] sm:$0xff]  }
 0x335   :  { %13875 = vmatpush3.bf16.msra.mxu0 %v10613_v25  ;;  %v10658_v25 = vld [vmem:[#allocation2 + $0x1770] sm:$0xff]  }
 0x336   :  { %13877 = vmatprep.subr.bf16.mxu0 %v10622_v27 }
 0x337   :  { %13907 = vmatpush3.bf16.msra.mxu1 %v10629_v26  ;;  %v10674_v26 = vld [vmem:[#allocation2 + $0x17f0] sm:$0xff]  }
 0x338   :  { %13909 = vmatprep.subr.bf16.mxu1 %v10638_v28 }
 0x339   :  { %13879 = vmatpush3.bf16.msra.mxu0 %v10614_v29 }
 0x33a   :  { %13881 = vmatprep.subr.bf16.mxu0 %v10623_v31  ;;  %v10650_v31 = vld [vmem:[#allocation2 + $0x1730] sm:$0xff]  }
 0x33b   :  { %13911 = vmatpush3.bf16.msra.mxu1 %v10630_v30 }
 0x33c   :  { %13913 = vmatprep.subr.bf16.mxu1 %v10639_v32  ;;  %v10666_v32 = vld [vmem:[#allocation2 + $0x17b0] sm:$0xff]  }
 0x33d   :  { %13883 = vmatpush3.bf16.msra.mxu0 %v10615_v33 }
 0x33e   :  { %13885 = vmatprep.subr.bf16.mxu0 %v10624_v35  ;;  %v10675_v35 = vld [vmem:[#allocation2 + $0x17f8] sm:$0xff]  }
 0x33f   :  { %13915 = vmatpush3.bf16.msra.mxu1 %v10631_v34  ;;  %v10659_v34 = vld [vmem:[#allocation2 + $0x1778] sm:$0xff]  }
 0x340   :  { %13917 = vmatprep.subr.bf16.mxu1 %v10640_v36 }
 0x341   :  { %13887 = vmatpush3.bf16.msra.mxu0 %v10616_v37  ;;  %v10651_v37 = vld [vmem:[#allocation2 + $0x1738] sm:$0xff]  }
 0x342   :  { %13889 = vmatprep.subr.bf16.mxu0 %v10625_v39  ;;  %v3266_v39 = vld [vmem:[%s14677_s0 + $0x2e0] sm:$0xff] }
 0x343   :  { %13919 = vmatpush3.bf16.msra.mxu1 %v10632_v38  ;;  %v11758_v43 = vpop.f32.mrb[30].mxu0  ;;  %v10667_v38 = vld [vmem:[#allocation2 + $0x17b8] sm:$0xff]  }
 0x344   :  { %13921 = vmatprep.subr.bf16.mxu1 %v10641_v40  ;;  %v11759_v47 = vpop.f32.mrb[31].mxu0  ;;  %v3268_v40 = vld [vmem:[%s14677_s0 + $0x2f0] sm:$0xff] }
 0x345   :  { %v11793_v44 = vpop.f32.mrb[30].mxu1  ;;  %v11760_v49 = vadd.f32 %v11759_v47, %v11758_v43  ;;  %13891 = vmatpush3.bf16.msra.mxu0 %v10617_v41 }
 0x346   :  { %v11794_v48 = vpop.f32.mrb[31].mxu1  ;;  %13893 = vmatprep.subr.bf16.mxu0 %v10626_v45 }
 0x347   :  { %v11795_v50 = vadd.f32 %v11794_v48, %v11793_v44  ;;  %13923 = vmatpush3.bf16.msra.mxu1 %v10633_v42  ;;  %v5444_v53 = vadd.f32 %v11760_v49, %v14622_v12  ;;  %v10671_v12 = vld [vmem:[#allocation2 + $0x17d8] sm:$0xff]  }
 0x348   :  { %13925 = vmatprep.subr.bf16.mxu1 %v10642_v46 }
 0x349   :  { %v14637_v56 = vadd.f32 %v11795_v50, %v5444_v53  ;;  %13895 = vmatpush3.bf16.msra.mxu0 %v10618_v51 }
 0x34a   :  { %13897 = vmatprep.subr.bf16.mxu0 %v10627_v54 }
 0x34b   :  { %13927 = vmatpush3.bf16.msra.mxu1 %v10634_v52 }
 0x34c   :  { %13929 = vmatprep.subr.bf16.mxu1 %v10643_v55 }
 0x34d   :  { %13899 = vmatpush3.bf16.msra.mxu0 %v10619_v57  ;;  %v6638_v57 = vld [vmem:[#allocation6] sm:$0xff] }
 0x34e   :  { %13933 = vmatprep.subr.bf16.mxu0 %v10652_v59  ;;  %v6640_v59 = vld [vmem:[#allocation6 + $0x10] sm:$0xff] }
 0x34f   :  { %13931 = vmatpush3.bf16.msra.mxu1 %v10635_v58  ;;  %v6639_v58 = vld [vmem:[#allocation6 + $0x8] sm:$0xff] }
 0x350   :  { %13965 = vmatprep.subr.bf16.mxu1 %v10668_v60  ;;  %6422 = vmatmul.mubr.f32.vlgmr.msra.gmra.mrb[44].mxu0 %v3262_v61  ;;  %v14207_v60 = vmov 0.0|0.0   ;;  %v13997_v61 = vpack.c.bf16 %v6639_v58, %v6638_v57 }
 0x351   :  { %13935 = vmatpush3.bf16.msra.mxu0 %v10644_v63  ;;  %6561 = vmatprep.mubr.f32.mxu0 %v3267_v3  ;;  %v6644_v3 = vld [vmem:[#allocation6 + $0x30] sm:$0xff] }
 0x352   :  { %6492 = vmatmul.mubr.f32.vlgmr.msra.gmra.mrb[44].mxu1 %v3264_v62  ;;  %13937 = vmatprep.subr.bf16.mxu0 %v10653_v1  ;;  %v6641_v62 = vld [vmem:[#allocation6 + $0x18] sm:$0xff]  ;;  %v6643_v1 = vld [vmem:[#allocation6 + $0x28] sm:$0xff] }
 0x353   :  { %13967 = vmatpush3.bf16.msra.mxu1 %v10660_v0  ;;  %6631 = vmatprep.mubr.f32.mxu1 %v3269_v4  ;;  %v14000_v63 = vpack.c.bf16 %v6641_v62, %v6640_v59  ;;  %v6642_v0 = vld [vmem:[#allocation6 + $0x20] sm:$0xff]  ;;  %v6645_v4 = vld [vmem:[#allocation6 + $0x38] sm:$0xff] }
 0x354   :  { %13969 = vmatprep.subr.bf16.mxu1 %v10669_v2  ;;  %v14003_v2 = vpack.c.bf16 %v6643_v1, %v6642_v0 }
 0x355   :  { %13939 = vmatpush3.bf16.msra.mxu0 %v10645_v5  ;;  %v14006_v5 = vpack.c.bf16 %v6645_v4, %v6644_v3 }
 0x356   :  { %13941 = vmatprep.subr.bf16.mxu0 %v10654_v7  ;;  %v6647_v7 = vld [vmem:[#allocation6 + $0x48] sm:$0xff] }
 0x357   :  { %13971 = vmatpush3.bf16.msra.mxu1 %v10661_v6  ;;  %v6646_v6 = vld [vmem:[#allocation6 + $0x40] sm:$0xff] }
 0x358   :  { %13973 = vmatprep.subr.bf16.mxu1 %v10670_v8  ;;  %v14009_v8 = vpack.c.bf16 %v6647_v7, %v6646_v6 }
 0x359   :  { %13943 = vmatpush3.bf16.msra.mxu0 %v10646_v9  ;;  %v6648_v9 = vld [vmem:[#allocation6 + $0x50] sm:$0xff] }
 0x35a   :  { %13945 = vmatprep.subr.bf16.mxu0 %v10655_v11 }
 0x35b   :  { %13975 = vmatpush3.bf16.msra.mxu1 %v10662_v10  ;;  %v6649_v10 = vld [vmem:[#allocation6 + $0x58] sm:$0xff] }
 0x35c   :  { %13977 = vmatprep.subr.bf16.mxu1 %v10671_v12  ;;  %v14012_v11 = vpack.c.bf16 %v6649_v10, %v6648_v9 }
 0x35d   :  { %13947 = vmatpush3.bf16.msra.mxu0 %v10647_v13 }
 0x35e   :  { %13949 = vmatprep.subr.bf16.mxu0 %v10656_v15  ;;  %v6651_v15 = vld [vmem:[#allocation6 + $0x68] sm:$0xff] }
 0x35f   :  { %13979 = vmatpush3.bf16.msra.mxu1 %v10663_v14  ;;  %v6650_v14 = vld [vmem:[#allocation6 + $0x60] sm:$0xff] }
 0x360   :  { %13981 = vmatprep.subr.bf16.mxu1 %v10672_v16 }
 0x361   :  { %13951 = vmatpush3.bf16.msra.mxu0 %v10648_v17 }
 0x362   :  { %13953 = vmatprep.subr.bf16.mxu0 %v10657_v19 }
 0x363   :  { %13983 = vmatpush3.bf16.msra.mxu1 %v10664_v18  ;;  %v11828_v23 = vpop.f32.mrb[32].mxu0  ;;  %v14015_v18 = vpack.c.bf16 %v6651_v15, %v6650_v14 }
 0x364   :  { %13985 = vmatprep.subr.bf16.mxu1 %v10673_v20  ;;  %v11829_v27 = vpop.f32.mrb[33].mxu0 }
 0x365   :  { %v11863_v24 = vpop.f32.mrb[32].mxu1  ;;  %v11830_v29 = vadd.f32 %v11829_v27, %v11828_v23  ;;  %13955 = vmatpush3.bf16.msra.mxu0 %v10649_v21  ;;  %v6653_v23 = vld [vmem:[#allocation6 + $0x78] sm:$0xff]  ;;  %v6732_v27 = vld [vmem:[#allocation9] sm:$0xff] }
 0x366   :  { %v11864_v28 = vpop.f32.mrb[33].mxu1  ;;  %13957 = vmatprep.subr.bf16.mxu0 %v10658_v25 }
 0x367   :  { %v11865_v30 = vadd.f32 %v11864_v28, %v11863_v24  ;;  %13987 = vmatpush3.bf16.msra.mxu1 %v10665_v22  ;;  %v5584_v33 = vadd.f32 %v11830_v29, %v14637_v56  ;;  %v6652_v22 = vld [vmem:[#allocation6 + $0x70] sm:$0xff] }
 0x368   :  { %13989 = vmatprep.subr.bf16.mxu1 %v10674_v26  ;;  %v14018_v24 = vpack.c.bf16 %v6653_v23, %v6652_v22  ;;  %v14209_v26 = vmov 0.0   ;;  %v6733_v28 = vld [vmem:[#allocation9 + $0x8] sm:$0xff]  ;;  %v6734_v29 = vld [vmem:[#allocation9 + $0x10] sm:$0xff] }
 0x369   :  { %v5654_v36 = vadd.f32 %v11865_v30, %v5584_v33  ;;  %13959 = vmatpush3.bf16.msra.mxu0 %v10650_v31  ;;  %v14021_v30 = vpack.c.bf16 %v6733_v28, %v6732_v27  ;;  %v6735_v31 = vld [vmem:[#allocation9 + $0x18] sm:$0xff]  ;;  %v6736_v33 = vld [vmem:[#allocation9 + $0x20] sm:$0xff] }
 0x36a   :  { %13961 = vmatprep.subr.bf16.mxu0 %v10659_v34  ;;  %v6737_v34 = vld [vmem:[#allocation9 + $0x28] sm:$0xff] }
 0x36b   :  { %13991 = vmatpush3.bf16.msra.mxu1 %v10666_v32  ;;  %v14024_v32 = vpack.c.bf16 %v6735_v31, %v6734_v29 }
 0x36c   :  { %13993 = vmatprep.subr.bf16.mxu1 %v10675_v35  ;;  %v14027_v35 = vpack.c.bf16 %v6737_v34, %v6736_v33 }
 0x36d   :  { %13963 = vmatpush3.bf16.msra.mxu0 %v10651_v37  ;;  %v6739_v37 = vld [vmem:[#allocation9 + $0x38] sm:$0xff] }
 0x36e   :  { %13996 = vmatprep.subr.bf16.mxu0 %v14207_v60 }
 0x36f   :  { %13995 = vmatpush3.bf16.msra.mxu1 %v10667_v38 }
 0x370   :  { %6562 = vmatmul.mubr.f32.vlgmr.msra.gmra.mrb[46].mxu0 %v3266_v39  ;;  %14020 = vmatprep.subr.bf16.mxu1 %v14207_v60  ;;  %v6740_v39 = vld [vmem:[#allocation9 + $0x40] sm:$0xff] }
 0x371   :  { %13998 = vmatpush3.bf16.msra.mxu0 %v13997_v61  ;;  %12422 = vmatprep.mubr.msk.f32.mxu0 %vm14208_vm0, %v14209_v26 }
 0x372   :  { %6632 = vmatmul.mubr.f32.vlgmr.msra.gmra.mrb[46].mxu1 %v3268_v40  ;;  %13999 = vmatprep.subr.bf16.mxu0 %v14207_v60  ;;  %v6741_v40 = vld [vmem:[#allocation9 + $0x48] sm:$0xff] }
 0x373   :  { %12457 = vmatprep.mubr.msk.f32.mxu1 %vm14208_vm0, %v14209_v26  ;;  %14022 = vmatpush3.bf16.msra.mxu1 %v14021_v30 }
 0x374   :  { %14023 = vmatprep.subr.bf16.mxu1 %v14207_v60 }
 0x375   :  { %14001 = vmatpush3.bf16.msra.mxu0 %v14000_v63 }
 0x376   :  { %14002 = vmatprep.subr.bf16.mxu0 %v14207_v60 }
 0x377   :  { %14025 = vmatpush3.bf16.msra.mxu1 %v14024_v32 }
 0x378   :  { %14026 = vmatprep.subr.bf16.mxu1 %v14207_v60 }
 0x379   :  { %14004 = vmatpush3.bf16.msra.mxu0 %v14003_v2 }
 0x37a   :  { %14005 = vmatprep.subr.bf16.mxu0 %v14207_v60 }
 0x37b   :  { %14028 = vmatpush3.bf16.msra.mxu1 %v14027_v35 }
 0x37c   :  { %14029 = vmatprep.subr.bf16.mxu1 %v14207_v60 }
 0x37d   :  { %14007 = vmatpush3.bf16.msra.mxu0 %v14006_v5 }
 0x37e   :  { %14008 = vmatprep.subr.bf16.mxu0 %v14207_v60 }
 0x381   :  { %14010 = vmatpush3.bf16.msra.mxu0 %v14009_v8 }
 0x382   :  { %14011 = vmatprep.subr.bf16.mxu0 %v14207_v60 }
 0x383   :  { %v11898_v41 = vpop.f32.mrb[34].mxu0 }
 0x384   :  { %v11899_v43 = vpop.f32.mrb[35].mxu0 }
 0x385   :  { %v11933_v42 = vpop.f32.mrb[34].mxu1  ;;  %v11900_v45 = vadd.f32 %v11899_v43, %v11898_v41  ;;  %14013 = vmatpush3.bf16.msra.mxu0 %v14012_v11  ;;  %v14033_v41 = vpack.c.bf16 %v6741_v40, %v6740_v39  ;;  %v6743_v43 = vld [vmem:[#allocation9 + $0x58] sm:$0xff] }
 0x386   :  { %v11934_v44 = vpop.f32.mrb[35].mxu1  ;;  %14014 = vmatprep.subr.bf16.mxu0 %v14207_v60 }
 0x387   :  { %v11935_v46 = vadd.f32 %v11934_v44, %v11933_v42  ;;  %v5724_v47 = vadd.f32 %v11900_v45, %v5654_v36  ;;  %v6738_v36 = vld [vmem:[#allocation9 + $0x30] sm:$0xff]  ;;  %v6744_v45 = vld [vmem:[#allocation9 + $0x60] sm:$0xff] }
 0x388   :  { %v14030_v38 = vpack.c.bf16 %v6739_v37, %v6738_v36  ;;  %v6742_v42 = vld [vmem:[#allocation9 + $0x50] sm:$0xff] }
 0x389   :  { %v5794_v48 = vadd.f32 %v11935_v46, %v5724_v47  ;;  %14016 = vmatpush3.bf16.msra.mxu0 %v14015_v18  ;;  %v14036_v44 = vpack.c.bf16 %v6743_v43, %v6742_v42  ;;  %v6745_v46 = vld [vmem:[#allocation9 + $0x68] sm:$0xff]  ;;  %v6747_v18 = vld [vmem:[#allocation9 + $0x78] sm:$0xff] }
 0x38a   :  { %14017 = vmatprep.subr.bf16.mxu0 %v14207_v60  ;;  %14031 = vmatpush3.bf16.msra.mxu1 %v14030_v38 }
 0x38b   :  { %14032 = vmatprep.subr.bf16.mxu1 %v14207_v60 }
 0x38d   :  { %14019 = vmatpush3.bf16.msra.mxu0 %v14018_v24 }
 0x38e   :  { %14034 = vmatpush3.bf16.msra.mxu1 %v14033_v41 }
 0x38f   :  { %14035 = vmatprep.subr.bf16.mxu1 %v14207_v60 }
 0x392   :  { %14037 = vmatpush3.bf16.msra.mxu1 %v14036_v44 }
 0x393   :  { %14038 = vmatprep.subr.bf16.mxu1 %v14207_v60 }
 0x3a3   :  { %v11968_v49 = vpop.f32.mrb[36].mxu0 }
 0x3a4   :  { %v11969_v51 = vpop.f32.mrb[37].mxu0 }
 0x3a5   :  { %v12003_v50 = vpop.f32.mrb[36].mxu1  ;;  %v11970_v53 = vadd.f32 %v11969_v51, %v11968_v49  ;;  %v14039_v51 = vpack.c.bf16 %v6745_v46, %v6744_v45 }
 0x3a6   :  { %v12004_v52 = vpop.f32.mrb[37].mxu1 }
 0x3a7   :  { %v12005_v54 = vadd.f32 %v12004_v52, %v12003_v50  ;;  %v5864_v55 = vadd.f32 %v11970_v53, %v5794_v48  ;;  %14040 = vmatpush3.bf16.msra.mxu1 %v14039_v51 }
 0x3a8   :  { %14041 = vmatprep.subr.bf16.mxu1 %v14207_v60 }
 0x3a9   :  { %v5934_v56 = vadd.f32 %v12005_v54, %v5864_v55 }
 0x3c3   :  { %v12038_v12 = vpop.f32.mrb[38].mxu0 }
 0x3c4   :  { %v12039_v16 = vpop.f32.mrb[39].mxu0 }
 0x3c5   :  { %v12073_v13 = vpop.f32.mrb[38].mxu1  ;;  %v12040_v19 = vadd.f32 %v12039_v16, %v12038_v12 }
 0x3c6   :  { %v12074_v17 = vpop.f32.mrb[39].mxu1 }
 0x3c7   :  { %v12075_v20 = vadd.f32 %v12074_v17, %v12073_v13  ;;  %v6004_v21 = vadd.f32 %v12040_v19, %v5934_v56  ;;  %v6746_v17 = vld [vmem:[#allocation9 + $0x70] sm:$0xff] }
 0x3c8   :  { %v14042_v19 = vpack.c.bf16 %v6747_v18, %v6746_v17 }
 0x3c9   :  { %v6074_v25 = vadd.f32 %v12075_v20, %v6004_v21  ;;  %v6835_v20 = vld [vmem:[#allocation7] ss:$0 sm:$0xff] }
 0x3ca   :  { %14043 = vmatpush3.bf16.msra.mxu1 %v14042_v19 }
 0x3e3   :  { %v12108_v47 = vpop.f32.mrb[40].mxu0 }
 0x3e4   :  { %v12109_v49 = vpop.f32.mrb[41].mxu0 }
 0x3e5   :  { %v12143_v48 = vpop.f32.mrb[40].mxu1  ;;  %v12110_v52 = vadd.f32 %v12109_v49, %v12108_v47 }
 0x3e6   :  { %v12144_v50 = vpop.f32.mrb[41].mxu1 }
 0x3e7   :  { %v12145_v53 = vadd.f32 %v12144_v50, %v12143_v48  ;;  %v6144_v54 = vadd.f32 %v12110_v52, %v6074_v25  ;;  %v6836_v25 = vld [vmem:[#allocation10] ss:$0 sm:$0xff] }
 0x3e9   :  { %v6214_v55 = vadd.f32 %v12145_v53, %v6144_v54 }
 0x403   :  { %v12178_v56 = vpop.f32.mrb[42].mxu0 }
 0x404   :  { %v12179_v58 = vpop.f32.mrb[43].mxu0 }
 0x405   :  { %v12213_v57 = vpop.f32.mrb[42].mxu1  ;;  %v12180_v61 = vadd.f32 %v12179_v58, %v12178_v56 }
 0x406   :  { %v12214_v59 = vpop.f32.mrb[43].mxu1 }
 0x407   :  { %v12215_v62 = vadd.f32 %v12214_v59, %v12213_v57  ;;  %v6284_v63 = vadd.f32 %v12180_v61, %v6214_v55 }
 0x409   :  { %v6354_v0 = vadd.f32 %v12215_v62, %v6284_v63 }
 0x423   :  { %v12248_v1 = vpop.f32.mrb[44].mxu0 }
 0x424   :  { %v12249_v3 = vpop.f32.mrb[45].mxu0 }
 0x425   :  { %v12283_v2 = vpop.f32.mrb[44].mxu1  ;;  %v12250_v5 = vadd.f32 %v12249_v3, %v12248_v1 }
 0x426   :  { %v12284_v4 = vpop.f32.mrb[45].mxu1 }
 0x427   :  { %v12285_v6 = vadd.f32 %v12284_v4, %v12283_v2  ;;  %v6424_v7 = vadd.f32 %v12250_v5, %v6354_v0 }
 0x429   :  { %v6494_v8 = vadd.f32 %v12285_v6, %v6424_v7 }
 0x443   :  { %v12318_v9 = vpop.f32.mrb[46].mxu0 }
 0x444   :  { %v12319_v11 = vpop.f32.mrb[47].mxu0 }
 0x445   :  { %v12353_v10 = vpop.f32.mrb[46].mxu1  ;;  %v12320_v12 = vadd.f32 %v12319_v11, %v12318_v9 }
 0x446   :  { %v12354_v60 = vpop.f32.mrb[47].mxu1 }
 0x447   :  { %v12355_v13 = vadd.f32 %v12354_v60, %v12353_v10  ;;  %v6564_v14 = vadd.f32 %v12320_v12, %v6494_v8 }
 0x449   :  { %v6634_v15 = vadd.f32 %v12355_v13, %v6564_v14 }
 0x44b   :  { %v6637_v16 = vmax.f32 %v6634_v15, 0.0 }
 0x44d   :  { %12423 = vmatmul.mubr.f32.vlgmr.msra.gmra.mrb[48].mxu0 %v6637_v16 }
 0x520   :  { %v6727_v21 = vpop.f32.mrb[48].mxu0 }
 0x521   :  { %v6728_v22 = vadd.f32 %v6835_v20, %v6727_v21  ;;  %v12424_v23 = vpop.f32.mrb[49].mxu0 }
 0x523   :  { %v6731_v24 = vmax.f32 %v6728_v22, 0.0 }
 0x525   :  { %12458 = vmatmul.mubr.f32.vlgmr.msra.gmra.mrb[48].mxu1 %v6731_v24 }
 0x5f8   :  { %v6821_v26 = vpop.f32.mrb[48].mxu1 }
 0x5f9   :  { %v6822_v27 = vadd.f32 %v6836_v25, %v6821_v26  ;;  %v12459_v28 = vpop.f32.mrb[49].mxu1 }
 0x5fb   :  { %6825 = vst [vmem:[%s14684_s7] sm:$0xff] %v6822_v27 }
 0x5fc   :  { %6830 = vsyncpa [#allocation3], 1 }
 0x5fd   :  { %6831 = vsyncpa [#allocation5], 1 }
 0x5fe   :  { %6832 = vsyncpa [#allocation8], 1 }
 0x5ff   :  { %6833 = vsyncpa [#allocation11], 1 }

</bundles_post_ra>
